<compile_context>
chip_gen: v7x
topology: tpu7x:2x2x1
jax: 0.10.0
libtpu: 0.0.40
codegen_flags: <defaults>
</compile_context>

<pallas_src>
import functools

import jax
import jax.numpy as jnp
from jax import lax
from jax.experimental import pallas as pl
from jax.experimental.pallas import tpu as pltpu

NEG_SLOPE = 0.01  # nn.LeakyReLU() default negative_slope

# Geometry fixed by the module definition.
KD, KH1, KW1 = 3, 40, 2        # conv1 kernel [3, 40, 2]
C2, KH2, KW2 = 4, 5, 10        # conv2: 4 out channels, kernel [5, 10]
LIN1_IN, LIN1_OUT = 8820, 400

# lin1/lin2 fused kernel tiling.
TK = 1792                      # K tile (multiple of 128); 8820 -> 8960 (1.6% pad)
NT = 256                       # N tile: padded 512 output cols -> 2 parallel tiles


def _round_up(x, m):
    return (x + m - 1) // m * m


# ----------------------------------------------------------------------------
# Pallas kernel 1: fused conv1 (3D) + conv2 (2D) via banded weight matmuls
# ----------------------------------------------------------------------------
def _conv_fused_kernel(xs_ref, t1_ref, b1_ref, t2_ref, b2_ref, o_ref, *,
                       batch, ho2):
    # xs_ref : (KD*KW1, B, Do1, Hp)   input H-rows per (dd, ww) offset
    # t1_ref : (KD*KW1, Hp, NL1)      banded conv1 filters along H
    # t2_ref : (KH2, NL1, NL2)        banded conv2 filters along W, channels on lanes
    for b in range(batch):
        # conv1 for this batch element: (Do1, Hp) @ (Hp, NL1), summed over (dd, ww)
        acc1 = jnp.dot(xs_ref[0, b, :, :], t1_ref[0, :, :],
                       preferred_element_type=jnp.float32)
        for i in range(1, KD * KW1):
            acc1 = acc1 + jnp.dot(xs_ref[i, b, :, :], t1_ref[i, :, :],
                                  preferred_element_type=jnp.float32)
        a1 = acc1 + b1_ref[...]                      # (Do1, NL1) + (1, NL1)
        a1 = jnp.where(a1 >= 0, a1, NEG_SLOPE * a1)  # LeakyReLU

        # conv2: (Ho2, NL1) @ (NL1, NL2), summed over kh row-offsets.
        # Padded columns of a1 (>= Ho1) never contaminate: those T2 rows are 0.
        acc2 = jnp.dot(a1[0:ho2, :], t2_ref[0, :, :],
                       preferred_element_type=jnp.float32)
        for kh in range(1, KH2):
            acc2 = acc2 + jnp.dot(a1[kh:kh + ho2, :], t2_ref[kh, :, :],
                                  preferred_element_type=jnp.float32)
        ob = acc2 + b2_ref[...]                      # (Ho2, NL2) + (1, NL2)
        o_ref[b, :, :] = jnp.where(ob >= 0, ob, NEG_SLOPE * ob)


# ----------------------------------------------------------------------------
# Pallas kernel 2: fused lin1 (K-tiled) + LeakyReLU + lin2 epilogue
# ----------------------------------------------------------------------------
def _lin_fused_kernel(x_ref, w1_ref, b1_ref, w2_ref, o_ref, acc_ref):
    k = pl.program_id(1)

    @pl.when(k == 0)
    def _():
        acc_ref[...] = jnp.zeros_like(acc_ref)

    acc_ref[...] += jnp.dot(x_ref[...], w1_ref[...],
                            preferred_element_type=jnp.float32)

    @pl.when(k == pl.num_programs(1) - 1)
    def _():
        h = acc_ref[...] + b1_ref[...]               # (Mp, NT) + (1, NT)
        h = jnp.where(h >= 0, h, NEG_SLOPE * h)      # LeakyReLU(lin1)
        # lin2 partial for this N-tile; wrapper sums the partials over tiles.
        o_ref[0, :, :] = jnp.dot(h, w2_ref[...],
                                 preferred_element_type=jnp.float32)


# ----------------------------------------------------------------------------
# One-time weight preparation (hoisted out of the forward pass)
# ----------------------------------------------------------------------------
def prepare_params(params, x_shape):
    B, D, H, W = x_shape
    assert W == KW1, "module geometry forces input W == conv1 kw == 2"
    do1, ho1 = D - KD + 1, H - KH1 + 1
    ho2, wo2 = do1 - KH2 + 1, ho1 - KW2 + 1
    nf = C2 * wo2
    assert C2 * ho2 * wo2 == LIN1_IN, "input spatial dims incompatible with lin1"

    hp = _round_up(H, 128)     # padded contraction dim for conv1 matmuls
    nl1 = _round_up(ho1, 128)  # padded conv1-output lane dim
    nl2 = _round_up(nf, 128)   # padded conv2-output lane dim

    w1 = params["conv1_w"][0, 0].astype(jnp.float32)   # (KD, KH1, KW1)
    w2 = params["conv2_w"][:, 0].astype(jnp.float32)   # (C2, KH2, KW2)

    # conv1 as banded matmuls along H:  T1[i][h, ho] = w1[dd, h-ho, ww]
    h_idx = jnp.arange(hp)[:, None]
    o_idx = jnp.arange(nl1)[None, :]
    rel = h_idx - o_idx
    valid = (rel >= 0) & (rel < KH1) & (o_idx < ho1) & (h_idx < H)
    relc = jnp.clip(rel, 0, KH1 - 1)
    t1 = jnp.stack([jnp.where(valid, w1[dd, relc, ww], 0.0)
                    for dd in range(KD) for ww in range(KW1)], axis=0)

    # conv2 as banded matmuls along W, channels packed on lanes:
    #   T2[kh][w, c*wo2 + wo] = w2[c, kh, w - wo]
    w_idx = jnp.arange(nl1)[:, None]
    col = jnp.arange(nl2)[None, :]
    c_idx = jnp.clip(col // wo2, 0, C2 - 1)
    wo_idx = col % wo2
    rel2 = w_idx - wo_idx
    valid2 = (rel2 >= 0) & (rel2 < KW2) & (w_idx < ho1) & (col < nf)
    rel2c = jnp.clip(rel2, 0, KW2 - 1)
    t2 = jnp.stack([jnp.where(valid2, w2[c_idx, kh, rel2c], 0.0)
                    for kh in range(KH2)], axis=0)

    b1v = jnp.full((1, nl1), params["conv1_b"][0], jnp.float32)
    b2v = jnp.where(col < nf, params["conv2_b"][c_idx], 0.0).astype(jnp.float32)

    # lin1/lin2: pre-transposed + padded weights (done once, not per forward).
    kp = _round_up(LIN1_IN, TK)              # 8960
    npad = _round_up(LIN1_OUT, 2 * NT)       # 512
    w1p = jnp.pad(params["lin1_w"].T.astype(jnp.float32),
                  ((0, kp - LIN1_IN), (0, npad - LIN1_OUT)))
    b1p = jnp.pad(params["lin1_b"].astype(jnp.float32).reshape(1, LIN1_OUT),
                  ((0, 0), (0, npad - LIN1_OUT)))
    w2p = jnp.pad(params["lin2_w"].T.astype(jnp.float32),
                  ((0, npad - LIN1_OUT), (0, 127)))       # (512, 128)

    return {"t1": t1, "b1v": b1v, "t2": t2, "b2v": b2v,
            "w1p": w1p, "b1p": b1p, "w2p": w2p,
            "lin2_b": params["lin2_b"].astype(jnp.float32)}


# ----------------------------------------------------------------------------
# BeamCNN forward (Pallas)
# ----------------------------------------------------------------------------
def beam_cnn_forward(x, prep):
    B, D, H, W = x.shape
    do1, ho1 = D - KD + 1, H - KH1 + 1
    ho2, wo2 = do1 - KH2 + 1, ho1 - KW2 + 1
    nf = C2 * wo2
    k1 = C2 * ho2 * wo2

    hp = prep["t1"].shape[1]
    nl2 = prep["t2"].shape[2]
    kp, npad = prep["w1p"].shape
    nj, kt = npad // NT, kp // TK
    mp = _round_up(B, 8)

    # ---- fused conv1 + conv2 (single pallas_call, everything in VMEM) -----
    # xs[i = dd*KW1 + ww, b, do, h] = x[b, do+dd, h, ww]
    xs = jnp.stack([x[:, dd:dd + do1, :, ww]
                    for dd in range(KD) for ww in range(KW1)], axis=0)
    xs = jnp.pad(xs.astype(jnp.float32), ((0, 0), (0, 0), (0, 0), (0, hp - H)))

    conv_kernel = functools.partial(_conv_fused_kernel, batch=B, ho2=ho2)
    out2 = pl.pallas_call(
        conv_kernel,
        out_shape=jax.ShapeDtypeStruct((B, ho2, nl2), jnp.float32),
    )(xs, prep["t1"], prep["b1v"], prep["t2"], prep["b2v"])

    # Columns are (c, wo) c-major; reorder to torch.flatten's (c, ho, wo).
    flat = (out2[:, :, :nf].reshape(B, ho2, C2, wo2)
            .transpose(0, 2, 1, 3).reshape(B, k1))

    # ---- fused lin1 + LeakyReLU + lin2 (K-tiled, N-parallel) ---------------
    xf = jnp.pad(flat, ((0, mp - B), (0, kp - k1)))
    part = pl.pallas_call(
        _lin_fused_kernel,
        out_shape=jax.ShapeDtypeStruct((nj, mp, 128), jnp.float32),
        grid=(nj, kt),
        in_specs=[
            pl.BlockSpec((mp, TK), lambda n, k: (0, k)),
            pl.BlockSpec((TK, NT), lambda n, k: (k, n)),
            pl.BlockSpec((1, NT), lambda n, k: (0, n)),
            pl.BlockSpec((NT, 128), lambda n, k: (n, 0)),
        ],
        out_specs=pl.BlockSpec((1, mp, 128), lambda n, k: (n, 0, 0)),
        scratch_shapes=[pltpu.VMEM((mp, NT), jnp.float32)],
        compiler_params=pltpu.CompilerParams(
            dimension_semantics=("parallel", "arbitrary")),
    )(xf, prep["w1p"], prep["b1p"], prep["w2p"])

    y = part.sum(axis=0)[:B, 0] + prep["lin2_b"][0]
    return jnp.squeeze(y)


# ----------------------------------------------------------------------------
# Deterministic parameter init (shapes from the PyTorch __init__)
# ----------------------------------------------------------------------------
def init_params(key):
    ks = jax.random.split(key, 8)

    def u(k, shape, fan_in):
        s = 1.0 / (fan_in ** 0.5)
        return jax.random.uniform(k, shape, jnp.float32, -s, s)

    return {
        "conv1_w": u(ks[0], (1, 1, 3, 40, 2), 3 * 40 * 2),
        "conv1_b": u(ks[1], (1,), 3 * 40 * 2),
        "conv2_w": u(ks[2], (4, 1, 5, 10), 5 * 10),
        "conv2_b": u(ks[3], (4,), 5 * 10),
        "lin1_w": u(ks[4], (400, 8820), 8820),
        "lin1_b": u(ks[5], (400,), 8820),
        "lin2_w": u(ks[6], (1, 400), 400),
        "lin2_b": u(ks[7], (1,), 400),
    }


# ----------------------------------------------------------------------------
# Pure-JAX reference (lax.conv) for correctness check
# ----------------------------------------------------------------------------
def _leaky(v):
    return jnp.where(v >= 0, v, NEG_SLOPE * v)


def reference_forward(x, params):
    B = x.shape[0]
    y1 = lax.conv_general_dilated(
        x[:, None].astype(jnp.float32), params["conv1_w"],
        window_strides=(1, 1, 1), padding="VALID",
        dimension_numbers=("NCDHW", "OIDHW", "NCDHW"))
    y1 = _leaky(y1 + params["conv1_b"].reshape(1, 1, 1, 1, 1))[..., 0]
    y2 = lax.conv_general_dilated(
        y1, params["conv2_w"], window_strides=(1, 1), padding="VALID",
        dimension_numbers=("NCHW", "OIHW", "NCHW"))
    y2 = _leaky(y2 + params["conv2_b"].reshape(1, 4, 1, 1))
    flat = y2.reshape(B, -1)
    h = _leaky(flat @ params["lin1_w"].T + params["lin1_b"])
    out = h @ params["lin2_w"].T + params["lin2_b"]
    return jnp.squeeze(out)


if __name__ == "__main__":
    key = jax.random.PRNGKey(0)
    pkey, xkey = jax.random.split(key)
    params = init_params(pkey)

    # Input (B, D, H, W). The module's shapes force W = 2 (conv1 kw=2 then
    # squeeze(-1)) and 4*(D-6)*(H-48) == 8820  =>  D = 51, H = 97.
    x = jax.random.normal(xkey, (2, 51, 97, 2), jnp.float32)

    prep = prepare_params(params, x.shape)   # one-time weight prep (hoisted)
    fwd = jax.jit(beam_cnn_forward)

    y = jax.block_until_ready(fwd(x, prep))
    y_ref = jax.block_until_ready(reference_forward(x, params))

    assert y.shape == y_ref.shape, (y.shape, y_ref.shape)
    if not jnp.allclose(y, y_ref, rtol=1e-3, atol=1e-3):
        raise AssertionError(f"Pallas vs reference mismatch: {y} vs {y_ref}")
    print("KERNEL_OK")
</pallas_src>

<mosaic_0001>
module attributes {stable_mosaic.version = 11 : i64} {
  func.func @_conv_fused_kernel(%arg0: memref<6x2x49x128xf32, #tpu.memory_space<vmem>>, %arg1: memref<6x128x128xf32, #tpu.memory_space<vmem>>, %arg2: memref<1x128xf32, #tpu.memory_space<vmem>>, %arg3: memref<5x128x256xf32, #tpu.memory_space<vmem>>, %arg4: memref<1x256xf32, #tpu.memory_space<vmem>>, %arg5: memref<2x45x256xf32, #tpu.memory_space<vmem>>) attributes {dimension_semantics = [], scalar_prefetch = 0 : i64, scratch_operands = 0 : i64, tpu.core_type = #tpu.core_type<tc>} {
    %c0 = arith.constant 0 : index
    %c0_0 = arith.constant 0 : index
    %c0_1 = arith.constant 0 : index
    %c0_2 = arith.constant 0 : index
    %0 = vector.load %arg0[%c0, %c0_0, %c0_1, %c0_2] : memref<6x2x49x128xf32, #tpu.memory_space<vmem>>, vector<1x1x49x128xf32>
    %1 = vector.shape_cast %0 : vector<1x1x49x128xf32> to vector<49x128xf32>
    %c0_3 = arith.constant 0 : index
    %c0_4 = arith.constant 0 : index
    %c0_5 = arith.constant 0 : index
    %2 = vector.load %arg1[%c0_3, %c0_4, %c0_5] : memref<6x128x128xf32, #tpu.memory_space<vmem>>, vector<1x128x128xf32>
    %3 = vector.shape_cast %2 : vector<1x128x128xf32> to vector<128x128xf32>
    %cst = arith.constant dense<0.000000e+00> : vector<49x128xf32>
    %4 = tpu.matmul %1, %3, %cst {dimension_numbers = #tpu.dot_dimension_numbers<[1], [0], [0], [1], [0, 0, 1, 1], [], []>} : vector<49x128xf32>, vector<128x128xf32>, vector<49x128xf32> -> vector<49x128xf32>
    %c1 = arith.constant 1 : index
    %c0_6 = arith.constant 0 : index
    %c0_7 = arith.constant 0 : index
    %c0_8 = arith.constant 0 : index
    %5 = vector.load %arg0[%c1, %c0_6, %c0_7, %c0_8] : memref<6x2x49x128xf32, #tpu.memory_space<vmem>>, vector<1x1x49x128xf32>
    %6 = vector.shape_cast %5 : vector<1x1x49x128xf32> to vector<49x128xf32>
    %c1_9 = arith.constant 1 : index
    %c0_10 = arith.constant 0 : index
    %c0_11 = arith.constant 0 : index
    %7 = vector.load %arg1[%c1_9, %c0_10, %c0_11] : memref<6x128x128xf32, #tpu.memory_space<vmem>>, vector<1x128x128xf32>
    %8 = vector.shape_cast %7 : vector<1x128x128xf32> to vector<128x128xf32>
    %cst_12 = arith.constant dense<0.000000e+00> : vector<49x128xf32>
    %9 = tpu.matmul %6, %8, %cst_12 {dimension_numbers = #tpu.dot_dimension_numbers<[1], [0], [0], [1], [0, 0, 1, 1], [], []>} : vector<49x128xf32>, vector<128x128xf32>, vector<49x128xf32> -> vector<49x128xf32>
    %10 = arith.addf %4, %9 : vector<49x128xf32>
    %c2 = arith.constant 2 : index
    %c0_13 = arith.constant 0 : index
    %c0_14 = arith.constant 0 : index
    %c0_15 = arith.constant 0 : index
    %11 = vector.load %arg0[%c2, %c0_13, %c0_14, %c0_15] : memref<6x2x49x128xf32, #tpu.memory_space<vmem>>, vector<1x1x49x128xf32>
    %12 = vector.shape_cast %11 : vector<1x1x49x128xf32> to vector<49x128xf32>
    %c2_16 = arith.constant 2 : index
    %c0_17 = arith.constant 0 : index
    %c0_18 = arith.constant 0 : index
    %13 = vector.load %arg1[%c2_16, %c0_17, %c0_18] : memref<6x128x128xf32, #tpu.memory_space<vmem>>, vector<1x128x128xf32>
    %14 = vector.shape_cast %13 : vector<1x128x128xf32> to vector<128x128xf32>
    %cst_19 = arith.constant dense<0.000000e+00> : vector<49x128xf32>
    %15 = tpu.matmul %12, %14, %cst_19 {dimension_numbers = #tpu.dot_dimension_numbers<[1], [0], [0], [1], [0, 0, 1, 1], [], []>} : vector<49x128xf32>, vector<128x128xf32>, vector<49x128xf32> -> vector<49x128xf32>
    %16 = arith.addf %10, %15 : vector<49x128xf32>
    %c3 = arith.constant 3 : index
    %c0_20 = arith.constant 0 : index
    %c0_21 = arith.constant 0 : index
    %c0_22 = arith.constant 0 : index
    %17 = vector.load %arg0[%c3, %c0_20, %c0_21, %c0_22] : memref<6x2x49x128xf32, #tpu.memory_space<vmem>>, vector<1x1x49x128xf32>
    %18 = vector.shape_cast %17 : vector<1x1x49x128xf32> to vector<49x128xf32>
    %c3_23 = arith.constant 3 : index
    %c0_24 = arith.constant 0 : index
    %c0_25 = arith.constant 0 : index
    %19 = vector.load %arg1[%c3_23, %c0_24, %c0_25] : memref<6x128x128xf32, #tpu.memory_space<vmem>>, vector<1x128x128xf32>
    %20 = vector.shape_cast %19 : vector<1x128x128xf32> to vector<128x128xf32>
    %cst_26 = arith.constant dense<0.000000e+00> : vector<49x128xf32>
    %21 = tpu.matmul %18, %20, %cst_26 {dimension_numbers = #tpu.dot_dimension_numbers<[1], [0], [0], [1], [0, 0, 1, 1], [], []>} : vector<49x128xf32>, vector<128x128xf32>, vector<49x128xf32> -> vector<49x128xf32>
    %22 = arith.addf %16, %21 : vector<49x128xf32>
    %c4 = arith.constant 4 : index
    %c0_27 = arith.constant 0 : index
    %c0_28 = arith.constant 0 : index
    %c0_29 = arith.constant 0 : index
    %23 = vector.load %arg0[%c4, %c0_27, %c0_28, %c0_29] : memref<6x2x49x128xf32, #tpu.memory_space<vmem>>, vector<1x1x49x128xf32>
    %24 = vector.shape_cast %23 : vector<1x1x49x128xf32> to vector<49x128xf32>
    %c4_30 = arith.constant 4 : index
    %c0_31 = arith.constant 0 : index
    %c0_32 = arith.constant 0 : index
    %25 = vector.load %arg1[%c4_30, %c0_31, %c0_32] : memref<6x128x128xf32, #tpu.memory_space<vmem>>, vector<1x128x128xf32>
    %26 = vector.shape_cast %25 : vector<1x128x128xf32> to vector<128x128xf32>
    %cst_33 = arith.constant dense<0.000000e+00> : vector<49x128xf32>
    %27 = tpu.matmul %24, %26, %cst_33 {dimension_numbers = #tpu.dot_dimension_numbers<[1], [0], [0], [1], [0, 0, 1, 1], [], []>} : vector<49x128xf32>, vector<128x128xf32>, vector<49x128xf32> -> vector<49x128xf32>
    %28 = arith.addf %22, %27 : vector<49x128xf32>
    %c5 = arith.constant 5 : index
    %c0_34 = arith.constant 0 : index
    %c0_35 = arith.constant 0 : index
    %c0_36 = arith.constant 0 : index
    %29 = vector.load %arg0[%c5, %c0_34, %c0_35, %c0_36] : memref<6x2x49x128xf32, #tpu.memory_space<vmem>>, vector<1x1x49x128xf32>
    %30 = vector.shape_cast %29 : vector<1x1x49x128xf32> to vector<49x128xf32>
    %c5_37 = arith.constant 5 : index
    %c0_38 = arith.constant 0 : index
    %c0_39 = arith.constant 0 : index
    %31 = vector.load %arg1[%c5_37, %c0_38, %c0_39] : memref<6x128x128xf32, #tpu.memory_space<vmem>>, vector<1x128x128xf32>
    %32 = vector.shape_cast %31 : vector<1x128x128xf32> to vector<128x128xf32>
    %cst_40 = arith.constant dense<0.000000e+00> : vector<49x128xf32>
    %33 = tpu.matmul %30, %32, %cst_40 {dimension_numbers = #tpu.dot_dimension_numbers<[1], [0], [0], [1], [0, 0, 1, 1], [], []>} : vector<49x128xf32>, vector<128x128xf32>, vector<49x128xf32> -> vector<49x128xf32>
    %34 = arith.addf %28, %33 : vector<49x128xf32>
    %c0_41 = arith.constant 0 : index
    %c0_42 = arith.constant 0 : index
    %35 = vector.load %arg2[%c0_41, %c0_42] : memref<1x128xf32, #tpu.memory_space<vmem>>, vector<1x128xf32>
    %36 = vector.broadcast %35 : vector<1x128xf32> to vector<49x128xf32>
    %37 = arith.addf %34, %36 : vector<49x128xf32>
    %cst_43 = arith.constant 0.000000e+00 : f32
    %38 = vector.broadcast %cst_43 : f32 to vector<49x128xf32>
    %39 = arith.cmpf oge, %37, %38 : vector<49x128xf32>
    %cst_44 = arith.constant 0.00999999977 : f32
    %40 = vector.broadcast %cst_44 : f32 to vector<49x128xf32>
    %41 = arith.mulf %40, %37 : vector<49x128xf32>
    %42 = arith.select %39, %37, %41 : vector<49x128xi1>, vector<49x128xf32>
    %43 = vector.extract_strided_slice %42 {offsets = [0, 0], sizes = [45, 128], strides = [1, 1]} : vector<49x128xf32> to vector<45x128xf32>
    %c0_45 = arith.constant 0 : index
    %c0_46 = arith.constant 0 : index
    %c0_47 = arith.constant 0 : index
    %44 = vector.load %arg3[%c0_45, %c0_46, %c0_47] : memref<5x128x256xf32, #tpu.memory_space<vmem>>, vector<1x128x256xf32>
    %45 = vector.shape_cast %44 : vector<1x128x256xf32> to vector<128x256xf32>
    %cst_48 = arith.constant dense<0.000000e+00> : vector<45x256xf32>
    %46 = tpu.matmul %43, %45, %cst_48 {dimension_numbers = #tpu.dot_dimension_numbers<[1], [0], [0], [1], [0, 0, 1, 1], [], []>} : vector<45x128xf32>, vector<128x256xf32>, vector<45x256xf32> -> vector<45x256xf32>
    %47 = vector.extract_strided_slice %42 {offsets = [1, 0], sizes = [45, 128], strides = [1, 1]} : vector<49x128xf32> to vector<45x128xf32>
    %c1_49 = arith.constant 1 : index
    %c0_50 = arith.constant 0 : index
    %c0_51 = arith.constant 0 : index
    %48 = vector.load %arg3[%c1_49, %c0_50, %c0_51] : memref<5x128x256xf32, #tpu.memory_space<vmem>>, vector<1x128x256xf32>
    %49 = vector.shape_cast %48 : vector<1x128x256xf32> to vector<128x256xf32>
    %cst_52 = arith.constant dense<0.000000e+00> : vector<45x256xf32>
    %50 = tpu.matmul %47, %49, %cst_52 {dimension_numbers = #tpu.dot_dimension_numbers<[1], [0], [0], [1], [0, 0, 1, 1], [], []>} : vector<45x128xf32>, vector<128x256xf32>, vector<45x256xf32> -> vector<45x256xf32>
    %51 = arith.addf %46, %50 : vector<45x256xf32>
    %52 = vector.extract_strided_slice %42 {offsets = [2, 0], sizes = [45, 128], strides = [1, 1]} : vector<49x128xf32> to vector<45x128xf32>
    %c2_53 = arith.constant 2 : index
    %c0_54 = arith.constant 0 : index
    %c0_55 = arith.constant 0 : index
    %53 = vector.load %arg3[%c2_53, %c0_54, %c0_55] : memref<5x128x256xf32, #tpu.memory_space<vmem>>, vector<1x128x256xf32>
    %54 = vector.shape_cast %53 : vector<1x128x256xf32> to vector<128x256xf32>
    %cst_56 = arith.constant dense<0.000000e+00> : vector<45x256xf32>
    %55 = tpu.matmul %52, %54, %cst_56 {dimension_numbers = #tpu.dot_dimension_numbers<[1], [0], [0], [1], [0, 0, 1, 1], [], []>} : vector<45x128xf32>, vector<128x256xf32>, vector<45x256xf32> -> vector<45x256xf32>
    %56 = arith.addf %51, %55 : vector<45x256xf32>
    %57 = vector.extract_strided_slice %42 {offsets = [3, 0], sizes = [45, 128], strides = [1, 1]} : vector<49x128xf32> to vector<45x128xf32>
    %c3_57 = arith.constant 3 : index
    %c0_58 = arith.constant 0 : index
    %c0_59 = arith.constant 0 : index
    %58 = vector.load %arg3[%c3_57, %c0_58, %c0_59] : memref<5x128x256xf32, #tpu.memory_space<vmem>>, vector<1x128x256xf32>
    %59 = vector.shape_cast %58 : vector<1x128x256xf32> to vector<128x256xf32>
    %cst_60 = arith.constant dense<0.000000e+00> : vector<45x256xf32>
    %60 = tpu.matmul %57, %59, %cst_60 {dimension_numbers = #tpu.dot_dimension_numbers<[1], [0], [0], [1], [0, 0, 1, 1], [], []>} : vector<45x128xf32>, vector<128x256xf32>, vector<45x256xf32> -> vector<45x256xf32>
    %61 = arith.addf %56, %60 : vector<45x256xf32>
    %62 = vector.extract_strided_slice %42 {offsets = [4, 0], sizes = [45, 128], strides = [1, 1]} : vector<49x128xf32> to vector<45x128xf32>
    %c4_61 = arith.constant 4 : index
    %c0_62 = arith.constant 0 : index
    %c0_63 = arith.constant 0 : index
    %63 = vector.load %arg3[%c4_61, %c0_62, %c0_63] : memref<5x128x256xf32, #tpu.memory_space<vmem>>, vector<1x128x256xf32>
    %64 = vector.shape_cast %63 : vector<1x128x256xf32> to vector<128x256xf32>
    %cst_64 = arith.constant dense<0.000000e+00> : vector<45x256xf32>
    %65 = tpu.matmul %62, %64, %cst_64 {dimension_numbers = #tpu.dot_dimension_numbers<[1], [0], [0], [1], [0, 0, 1, 1], [], []>} : vector<45x128xf32>, vector<128x256xf32>, vector<45x256xf32> -> vector<45x256xf32>
    %66 = arith.addf %61, %65 : vector<45x256xf32>
    %c0_65 = arith.constant 0 : index
    %c0_66 = arith.constant 0 : index
    %67 = vector.load %arg4[%c0_65, %c0_66] : memref<1x256xf32, #tpu.memory_space<vmem>>, vector<1x256xf32>
    %68 = vector.broadcast %67 : vector<1x256xf32> to vector<45x256xf32>
    %69 = arith.addf %66, %68 : vector<45x256xf32>
    %cst_67 = arith.constant 0.000000e+00 : f32
    %70 = vector.broadcast %cst_67 : f32 to vector<45x256xf32>
    %71 = arith.cmpf oge, %69, %70 : vector<45x256xf32>
    %cst_68 = arith.constant 0.00999999977 : f32
    %72 = vector.broadcast %cst_68 : f32 to vector<45x256xf32>
    %73 = arith.mulf %72, %69 : vector<45x256xf32>
    %74 = arith.select %71, %69, %73 : vector<45x256xi1>, vector<45x256xf32>
    %c0_69 = arith.constant 0 : index
    %c0_70 = arith.constant 0 : index
    %c0_71 = arith.constant 0 : index
    %75 = vector.load %arg5[%c0_69, %c0_70, %c0_71] : memref<2x45x256xf32, #tpu.memory_space<vmem>>, vector<1x45x256xf32>
    %76 = vector.shape_cast %75 : vector<1x45x256xf32> to vector<45x256xf32>
    %77 = vector.shape_cast %74 : vector<45x256xf32> to vector<1x45x256xf32>
    tpu.vector_store %arg5[%c0_69, %c0_70, %c0_71], %77 {strides = array<i32>} : memref<2x45x256xf32, #tpu.memory_space<vmem>>, vector<1x45x256xf32>,
    %c0_72 = arith.constant 0 : index
    %c1_73 = arith.constant 1 : index
    %c0_74 = arith.constant 0 : index
    %c0_75 = arith.constant 0 : index
    %78 = vector.load %arg0[%c0_72, %c1_73, %c0_74, %c0_75] : memref<6x2x49x128xf32, #tpu.memory_space<vmem>>, vector<1x1x49x128xf32>
    %79 = vector.shape_cast %78 : vector<1x1x49x128xf32> to vector<49x128xf32>
    %c0_76 = arith.constant 0 : index
    %c0_77 = arith.constant 0 : index
    %c0_78 = arith.constant 0 : index
    %80 = vector.load %arg1[%c0_76, %c0_77, %c0_78] : memref<6x128x128xf32, #tpu.memory_space<vmem>>, vector<1x128x128xf32>
    %81 = vector.shape_cast %80 : vector<1x128x128xf32> to vector<128x128xf32>
    %cst_79 = arith.constant dense<0.000000e+00> : vector<49x128xf32>
    %82 = tpu.matmul %79, %81, %cst_79 {dimension_numbers = #tpu.dot_dimension_numbers<[1], [0], [0], [1], [0, 0, 1, 1], [], []>} : vector<49x128xf32>, vector<128x128xf32>, vector<49x128xf32> -> vector<49x128xf32>
    %c1_80 = arith.constant 1 : index
    %c1_81 = arith.constant 1 : index
    %c0_82 = arith.constant 0 : index
    %c0_83 = arith.constant 0 : index
    %83 = vector.load %arg0[%c1_80, %c1_81, %c0_82, %c0_83] : memref<6x2x49x128xf32, #tpu.memory_space<vmem>>, vector<1x1x49x128xf32>
    %84 = vector.shape_cast %83 : vector<1x1x49x128xf32> to vector<49x128xf32>
    %c1_84 = arith.constant 1 : index
    %c0_85 = arith.constant 0 : index
    %c0_86 = arith.constant 0 : index
    %85 = vector.load %arg1[%c1_84, %c0_85, %c0_86] : memref<6x128x128xf32, #tpu.memory_space<vmem>>, vector<1x128x128xf32>
    %86 = vector.shape_cast %85 : vector<1x128x128xf32> to vector<128x128xf32>
    %cst_87 = arith.constant dense<0.000000e+00> : vector<49x128xf32>
    %87 = tpu.matmul %84, %86, %cst_87 {dimension_numbers = #tpu.dot_dimension_numbers<[1], [0], [0], [1], [0, 0, 1, 1], [], []>} : vector<49x128xf32>, vector<128x128xf32>, vector<49x128xf32> -> vector<49x128xf32>
    %88 = arith.addf %82, %87 : vector<49x128xf32>
    %c2_88 = arith.constant 2 : index
    %c1_89 = arith.constant 1 : index
    %c0_90 = arith.constant 0 : index
    %c0_91 = arith.constant 0 : index
    %89 = vector.load %arg0[%c2_88, %c1_89, %c0_90, %c0_91] : memref<6x2x49x128xf32, #tpu.memory_space<vmem>>, vector<1x1x49x128xf32>
    %90 = vector.shape_cast %89 : vector<1x1x49x128xf32> to vector<49x128xf32>
    %c2_92 = arith.constant 2 : index
    %c0_93 = arith.constant 0 : index
    %c0_94 = arith.constant 0 : index
    %91 = vector.load %arg1[%c2_92, %c0_93, %c0_94] : memref<6x128x128xf32, #tpu.memory_space<vmem>>, vector<1x128x128xf32>
    %92 = vector.shape_cast %91 : vector<1x128x128xf32> to vector<128x128xf32>
    %cst_95 = arith.constant dense<0.000000e+00> : vector<49x128xf32>
    %93 = tpu.matmul %90, %92, %cst_95 {dimension_numbers = #tpu.dot_dimension_numbers<[1], [0], [0], [1], [0, 0, 1, 1], [], []>} : vector<49x128xf32>, vector<128x128xf32>, vector<49x128xf32> -> vector<49x128xf32>
    %94 = arith.addf %88, %93 : vector<49x128xf32>
    %c3_96 = arith.constant 3 : index
    %c1_97 = arith.constant 1 : index
    %c0_98 = arith.constant 0 : index
    %c0_99 = arith.constant 0 : index
    %95 = vector.load %arg0[%c3_96, %c1_97, %c0_98, %c0_99] : memref<6x2x49x128xf32, #tpu.memory_space<vmem>>, vector<1x1x49x128xf32>
    %96 = vector.shape_cast %95 : vector<1x1x49x128xf32> to vector<49x128xf32>
    %c3_100 = arith.constant 3 : index
    %c0_101 = arith.constant 0 : index
    %c0_102 = arith.constant 0 : index
    %97 = vector.load %arg1[%c3_100, %c0_101, %c0_102] : memref<6x128x128xf32, #tpu.memory_space<vmem>>, vector<1x128x128xf32>
    %98 = vector.shape_cast %97 : vector<1x128x128xf32> to vector<128x128xf32>
    %cst_103 = arith.constant dense<0.000000e+00> : vector<49x128xf32>
    %99 = tpu.matmul %96, %98, %cst_103 {dimension_numbers = #tpu.dot_dimension_numbers<[1], [0], [0], [1], [0, 0, 1, 1], [], []>} : vector<49x128xf32>, vector<128x128xf32>, vector<49x128xf32> -> vector<49x128xf32>
    %100 = arith.addf %94, %99 : vector<49x128xf32>
    %c4_104 = arith.constant 4 : index
    %c1_105 = arith.constant 1 : index
    %c0_106 = arith.constant 0 : index
    %c0_107 = arith.constant 0 : index
    %101 = vector.load %arg0[%c4_104, %c1_105, %c0_106, %c0_107] : memref<6x2x49x128xf32, #tpu.memory_space<vmem>>, vector<1x1x49x128xf32>
    %102 = vector.shape_cast %101 : vector<1x1x49x128xf32> to vector<49x128xf32>
    %c4_108 = arith.constant 4 : index
    %c0_109 = arith.constant 0 : index
    %c0_110 = arith.constant 0 : index
    %103 = vector.load %arg1[%c4_108, %c0_109, %c0_110] : memref<6x128x128xf32, #tpu.memory_space<vmem>>, vector<1x128x128xf32>
    %104 = vector.shape_cast %103 : vector<1x128x128xf32> to vector<128x128xf32>
    %cst_111 = arith.constant dense<0.000000e+00> : vector<49x128xf32>
    %105 = tpu.matmul %102, %104, %cst_111 {dimension_numbers = #tpu.dot_dimension_numbers<[1], [0], [0], [1], [0, 0, 1, 1], [], []>} : vector<49x128xf32>, vector<128x128xf32>, vector<49x128xf32> -> vector<49x128xf32>
    %106 = arith.addf %100, %105 : vector<49x128xf32>
    %c5_112 = arith.constant 5 : index
    %c1_113 = arith.constant 1 : index
    %c0_114 = arith.constant 0 : index
    %c0_115 = arith.constant 0 : index
    %107 = vector.load %arg0[%c5_112, %c1_113, %c0_114, %c0_115] : memref<6x2x49x128xf32, #tpu.memory_space<vmem>>, vector<1x1x49x128xf32>
    %108 = vector.shape_cast %107 : vector<1x1x49x128xf32> to vector<49x128xf32>
    %c5_116 = arith.constant 5 : index
    %c0_117 = arith.constant 0 : index
    %c0_118 = arith.constant 0 : index
    %109 = vector.load %arg1[%c5_116, %c0_117, %c0_118] : memref<6x128x128xf32, #tpu.memory_space<vmem>>, vector<1x128x128xf32>
    %110 = vector.shape_cast %109 : vector<1x128x128xf32> to vector<128x128xf32>
    %cst_119 = arith.constant dense<0.000000e+00> : vector<49x128xf32>
    %111 = tpu.matmul %108, %110, %cst_119 {dimension_numbers = #tpu.dot_dimension_numbers<[1], [0], [0], [1], [0, 0, 1, 1], [], []>} : vector<49x128xf32>, vector<128x128xf32>, vector<49x128xf32> -> vector<49x128xf32>
    %112 = arith.addf %106, %111 : vector<49x128xf32>
    %c0_120 = arith.constant 0 : index
    %c0_121 = arith.constant 0 : index
    %113 = vector.load %arg2[%c0_120, %c0_121] : memref<1x128xf32, #tpu.memory_space<vmem>>, vector<1x128xf32>
    %114 = vector.broadcast %113 : vector<1x128xf32> to vector<49x128xf32>
    %115 = arith.addf %112, %114 : vector<49x128xf32>
    %cst_122 = arith.constant 0.000000e+00 : f32
    %116 = vector.broadcast %cst_122 : f32 to vector<49x128xf32>
    %117 = arith.cmpf oge, %115, %116 : vector<49x128xf32>
    %cst_123 = arith.constant 0.00999999977 : f32
    %118 = vector.broadcast %cst_123 : f32 to vector<49x128xf32>
    %119 = arith.mulf %118, %115 : vector<49x128xf32>
    %120 = arith.select %117, %115, %119 : vector<49x128xi1>, vector<49x128xf32>
    %121 = vector.extract_strided_slice %120 {offsets = [0, 0], sizes = [45, 128], strides = [1, 1]} : vector<49x128xf32> to vector<45x128xf32>
    %c0_124 = arith.constant 0 : index
    %c0_125 = arith.constant 0 : index
    %c0_126 = arith.constant 0 : index
    %122 = vector.load %arg3[%c0_124, %c0_125, %c0_126] : memref<5x128x256xf32, #tpu.memory_space<vmem>>, vector<1x128x256xf32>
    %123 = vector.shape_cast %122 : vector<1x128x256xf32> to vector<128x256xf32>
    %cst_127 = arith.constant dense<0.000000e+00> : vector<45x256xf32>
    %124 = tpu.matmul %121, %123, %cst_127 {dimension_numbers = #tpu.dot_dimension_numbers<[1], [0], [0], [1], [0, 0, 1, 1], [], []>} : vector<45x128xf32>, vector<128x256xf32>, vector<45x256xf32> -> vector<45x256xf32>
    %125 = vector.extract_strided_slice %120 {offsets = [1, 0], sizes = [45, 128], strides = [1, 1]} : vector<49x128xf32> to vector<45x128xf32>
    %c1_128 = arith.constant 1 : index
    %c0_129 = arith.constant 0 : index
    %c0_130 = arith.constant 0 : index
    %126 = vector.load %arg3[%c1_128, %c0_129, %c0_130] : memref<5x128x256xf32, #tpu.memory_space<vmem>>, vector<1x128x256xf32>
    %127 = vector.shape_cast %126 : vector<1x128x256xf32> to vector<128x256xf32>
    %cst_131 = arith.constant dense<0.000000e+00> : vector<45x256xf32>
    %128 = tpu.matmul %125, %127, %cst_131 {dimension_numbers = #tpu.dot_dimension_numbers<[1], [0], [0], [1], [0, 0, 1, 1], [], []>} : vector<45x128xf32>, vector<128x256xf32>, vector<45x256xf32> -> vector<45x256xf32>
    %129 = arith.addf %124, %128 : vector<45x256xf32>
    %130 = vector.extract_strided_slice %120 {offsets = [2, 0], sizes = [45, 128], strides = [1, 1]} : vector<49x128xf32> to vector<45x128xf32>
    %c2_132 = arith.constant 2 : index
    %c0_133 = arith.constant 0 : index
    %c0_134 = arith.constant 0 : index
    %131 = vector.load %arg3[%c2_132, %c0_133, %c0_134] : memref<5x128x256xf32, #tpu.memory_space<vmem>>, vector<1x128x256xf32>
    %132 = vector.shape_cast %131 : vector<1x128x256xf32> to vector<128x256xf32>
    %cst_135 = arith.constant dense<0.000000e+00> : vector<45x256xf32>
    %133 = tpu.matmul %130, %132, %cst_135 {dimension_numbers = #tpu.dot_dimension_numbers<[1], [0], [0], [1], [0, 0, 1, 1], [], []>} : vector<45x128xf32>, vector<128x256xf32>, vector<45x256xf32> -> vector<45x256xf32>
    %134 = arith.addf %129, %133 : vector<45x256xf32>
    %135 = vector.extract_strided_slice %120 {offsets = [3, 0], sizes = [45, 128], strides = [1, 1]} : vector<49x128xf32> to vector<45x128xf32>
    %c3_136 = arith.constant 3 : index
    %c0_137 = arith.constant 0 : index
    %c0_138 = arith.constant 0 : index
    %136 = vector.load %arg3[%c3_136, %c0_137, %c0_138] : memref<5x128x256xf32, #tpu.memory_space<vmem>>, vector<1x128x256xf32>
    %137 = vector.shape_cast %136 : vector<1x128x256xf32> to vector<128x256xf32>
    %cst_139 = arith.constant dense<0.000000e+00> : vector<45x256xf32>
    %138 = tpu.matmul %135, %137, %cst_139 {dimension_numbers = #tpu.dot_dimension_numbers<[1], [0], [0], [1], [0, 0, 1, 1], [], []>} : vector<45x128xf32>, vector<128x256xf32>, vector<45x256xf32> -> vector<45x256xf32>
    %139 = arith.addf %134, %138 : vector<45x256xf32>
    %140 = vector.extract_strided_slice %120 {offsets = [4, 0], sizes = [45, 128], strides = [1, 1]} : vector<49x128xf32> to vector<45x128xf32>
    %c4_140 = arith.constant 4 : index
    %c0_141 = arith.constant 0 : index
    %c0_142 = arith.constant 0 : index
    %141 = vector.load %arg3[%c4_140, %c0_141, %c0_142] : memref<5x128x256xf32, #tpu.memory_space<vmem>>, vector<1x128x256xf32>
    %142 = vector.shape_cast %141 : vector<1x128x256xf32> to vector<128x256xf32>
    %cst_143 = arith.constant dense<0.000000e+00> : vector<45x256xf32>
    %143 = tpu.matmul %140, %142, %cst_143 {dimension_numbers = #tpu.dot_dimension_numbers<[1], [0], [0], [1], [0, 0, 1, 1], [], []>} : vector<45x128xf32>, vector<128x256xf32>, vector<45x256xf32> -> vector<45x256xf32>
    %144 = arith.addf %139, %143 : vector<45x256xf32>
    %c0_144 = arith.constant 0 : index
    %c0_145 = arith.constant 0 : index
    %145 = vector.load %arg4[%c0_144, %c0_145] : memref<1x256xf32, #tpu.memory_space<vmem>>, vector<1x256xf32>
    %146 = vector.broadcast %145 : vector<1x256xf32> to vector<45x256xf32>
    %147 = arith.addf %144, %146 : vector<45x256xf32>
    %cst_146 = arith.constant 0.000000e+00 : f32
    %148 = vector.broadcast %cst_146 : f32 to vector<45x256xf32>
    %149 = arith.cmpf oge, %147, %148 : vector<45x256xf32>
    %cst_147 = arith.constant 0.00999999977 : f32
    %150 = vector.broadcast %cst_147 : f32 to vector<45x256xf32>
    %151 = arith.mulf %150, %147 : vector<45x256xf32>
    %152 = arith.select %149, %147, %151 : vector<45x256xi1>, vector<45x256xf32>
    %c1_148 = arith.constant 1 : index
    %c0_149 = arith.constant 0 : index
    %c0_150 = arith.constant 0 : index
    %153 = vector.load %arg5[%c1_148, %c0_149, %c0_150] : memref<2x45x256xf32, #tpu.memory_space<vmem>>, vector<1x45x256xf32>
    %154 = vector.shape_cast %153 : vector<1x45x256xf32> to vector<45x256xf32>
    %155 = vector.shape_cast %152 : vector<45x256xf32> to vector<1x45x256xf32>
    tpu.vector_store %arg5[%c1_148, %c0_149, %c0_150], %155 {strides = array<i32>} : memref<2x45x256xf32, #tpu.memory_space<vmem>>, vector<1x45x256xf32>,
    return
  }
}

module attributes {stable_mosaic.version = 11 : i64} {
  func.func @_lin_fused_kernel(%arg0: i32, %arg1: i32, %arg2: memref<8x1792xf32, #tpu.memory_space<vmem>>, %arg3: memref<1792x256xf32, #tpu.memory_space<vmem>>, %arg4: memref<1x256xf32, #tpu.memory_space<vmem>>, %arg5: memref<256x128xf32, #tpu.memory_space<vmem>>, %arg6: memref<1x8x128xf32, #tpu.memory_space<vmem>>, %arg7: memref<8x256xf32, #tpu.memory_space<vmem>>) attributes {dimension_semantics = [#tpu.dimension_semantics<parallel>, #tpu.dimension_semantics<arbitrary>], iteration_bounds = array<i64: 2, 5>, scalar_prefetch = 0 : i64, scratch_operands = 1 : i64, tpu.core_type = #tpu.core_type<tc>, window_params = [{transform_indices = @transform_0, window_bounds = array<i64: 8, 1792>}, {transform_indices = @transform_1, window_bounds = array<i64: 1792, 256>}, {transform_indices = @transform_2, window_bounds = array<i64: 1, 256>}, {transform_indices = @transform_3, window_bounds = array<i64: 256, 128>}, {transform_indices = @transform_4, window_bounds = array<i64: 1, 8, 128>}]} {
    %c0_i32 = arith.constant 0 : i32
    %0 = arith.cmpi eq, %arg1, %c0_i32 : i32
    %1 = arith.extui %0 : i1 to i32
    %c0_i32_0 = arith.constant 0 : i32
    %2 = arith.cmpi ne, %1, %c0_i32_0 : i32
    scf.if %2 {
      %cst_9 = arith.constant 0.000000e+00 : f32
      %12 = vector.broadcast %cst_9 : f32 to vector<8x256xf32>
      %c0_10 = arith.constant 0 : index
      %c0_11 = arith.constant 0 : index
      %13 = vector.load %arg7[%c0_10, %c0_11] : memref<8x256xf32, #tpu.memory_space<vmem>>, vector<8x256xf32>
      tpu.vector_store %arg7[%c0_10, %c0_11], %12 {strides = array<i32>} : memref<8x256xf32, #tpu.memory_space<vmem>>, vector<8x256xf32>,
    } else {
    }
    %c0 = arith.constant 0 : index
    %c0_1 = arith.constant 0 : index
    %3 = vector.load %arg7[%c0, %c0_1] : memref<8x256xf32, #tpu.memory_space<vmem>>, vector<8x256xf32>
    %c0_2 = arith.constant 0 : index
    %c0_3 = arith.constant 0 : index
    %4 = vector.load %arg2[%c0_2, %c0_3] : memref<8x1792xf32, #tpu.memory_space<vmem>>, vector<8x1792xf32>
    %c0_4 = arith.constant 0 : index
    %c0_5 = arith.constant 0 : index
    %5 = vector.load %arg3[%c0_4, %c0_5] : memref<1792x256xf32, #tpu.memory_space<vmem>>, vector<1792x256xf32>
    %cst = arith.constant dense<0.000000e+00> : vector<8x256xf32>
    %6 = tpu.matmul %4, %5, %cst {dimension_numbers = #tpu.dot_dimension_numbers<[1], [0], [0], [1], [0, 0, 1, 1], [], []>} : vector<8x1792xf32>, vector<1792x256xf32>, vector<8x256xf32> -> vector<8x256xf32>
    %7 = arith.addf %3, %6 : vector<8x256xf32>
    %c0_6 = arith.constant 0 : index
    %c0_7 = arith.constant 0 : index
    %8 = vector.load %arg7[%c0_6, %c0_7] : memref<8x256xf32, #tpu.memory_space<vmem>>, vector<8x256xf32>
    tpu.vector_store %arg7[%c0_6, %c0_7], %7 {strides = array<i32>} : memref<8x256xf32, #tpu.memory_space<vmem>>, vector<8x256xf32>,
    %c4_i32 = arith.constant 4 : i32
    %9 = arith.cmpi eq, %arg1, %c4_i32 : i32
    %10 = arith.extui %9 : i1 to i32
    %c0_i32_8 = arith.constant 0 : i32
    %11 = arith.cmpi ne, %10, %c0_i32_8 : i32
    scf.if %11 {
      %c0_9 = arith.constant 0 : index
      %c0_10 = arith.constant 0 : index
      %12 = vector.load %arg7[%c0_9, %c0_10] : memref<8x256xf32, #tpu.memory_space<vmem>>, vector<8x256xf32>
      %c0_11 = arith.constant 0 : index
      %c0_12 = arith.constant 0 : index
      %13 = vector.load %arg4[%c0_11, %c0_12] : memref<1x256xf32, #tpu.memory_space<vmem>>, vector<1x256xf32>
      %14 = vector.broadcast %13 : vector<1x256xf32> to vector<8x256xf32>
      %15 = arith.addf %12, %14 : vector<8x256xf32>
      %cst_13 = arith.constant 0.000000e+00 : f32
      %16 = vector.broadcast %cst_13 : f32 to vector<8x256xf32>
      %17 = arith.cmpf oge, %15, %16 : vector<8x256xf32>
      %cst_14 = arith.constant 0.00999999977 : f32
      %18 = vector.broadcast %cst_14 : f32 to vector<8x256xf32>
      %19 = arith.mulf %18, %15 : vector<8x256xf32>
      %20 = arith.select %17, %15, %19 : vector<8x256xi1>, vector<8x256xf32>
      %c0_15 = arith.constant 0 : index
      %c0_16 = arith.constant 0 : index
      %21 = vector.load %arg5[%c0_15, %c0_16] : memref<256x128xf32, #tpu.memory_space<vmem>>, vector<256x128xf32>
      %cst_17 = arith.constant dense<0.000000e+00> : vector<8x128xf32>
      %22 = tpu.matmul %20, %21, %cst_17 {dimension_numbers = #tpu.dot_dimension_numbers<[1], [0], [0], [1], [0, 0, 1, 1], [], []>} : vector<8x256xf32>, vector<256x128xf32>, vector<8x128xf32> -> vector<8x128xf32>
      %c0_18 = arith.constant 0 : index
      %c0_19 = arith.constant 0 : index
      %c0_20 = arith.constant 0 : index
      %23 = vector.load %arg6[%c0_18, %c0_19, %c0_20] : memref<1x8x128xf32, #tpu.memory_space<vmem>>, vector<1x8x128xf32>
      %24 = vector.shape_cast %23 : vector<1x8x128xf32> to vector<8x128xf32>
      %25 = vector.shape_cast %22 : vector<8x128xf32> to vector<1x8x128xf32>
      tpu.vector_store %arg6[%c0_18, %c0_19, %c0_20], %25 {strides = array<i32>} : memref<1x8x128xf32, #tpu.memory_space<vmem>>, vector<1x8x128xf32>,
    } else {
    }
    return
  }
  func.func @transform_0(%arg0: i32, %arg1: i32) -> (i32, i32) {
    %c0_i32 = arith.constant 0 : i32
    %c0_i32_0 = arith.constant 0 : i32
    return %c0_i32, %arg1 : i32, i32
  }
  func.func @transform_1(%arg0: i32, %arg1: i32) -> (i32, i32) {
    %c0_i32 = arith.constant 0 : i32
    return %arg1, %arg0 : i32, i32
  }
  func.func @transform_2(%arg0: i32, %arg1: i32) -> (i32, i32) {
    %c0_i32 = arith.constant 0 : i32
    %c0_i32_0 = arith.constant 0 : i32
    return %c0_i32, %arg0 : i32, i32
  }
  func.func @transform_3(%arg0: i32, %arg1: i32) -> (i32, i32) {
    %c0_i32 = arith.constant 0 : i32
    %c0_i32_0 = arith.constant 0 : i32
    return %arg0, %c0_i32 : i32, i32
  }
  func.func @transform_4(%arg0: i32, %arg1: i32) -> (i32, i32, i32) {
    %c0_i32 = arith.constant 0 : i32
    %c0_i32_0 = arith.constant 0 : i32
    %c0_i32_1 = arith.constant 0 : i32
    return %arg0, %c0_i32, %c0_i32_0 : i32, i32, i32
  }
}

</mosaic_0001>

<bundles_post_ra>
// kernel: beam_cnn_forward.3
= control target key start
LH: loop header
LB: loop body
LE: loop exit
PB: predicated region body
PF: predicated region fallthrough
CT: control target
= control target key end

     0   :  { %s3262_s0 = inlined_call_operand.vmem [shape: f32[8,8960], index: 0, kind: input, shape index: {}]   ;;  %s3263_s1 = inlined_call_operand.hbm [shape: f32[8960,512], index: 1, kind: input, shape index: {}]   ;;  %s3264_s2 = inlined_call_operand.hbm [shape: f32[1,512], index: 2, kind: input, shape index: {}]   ;;  %s3265_s3 = inlined_call_operand.hbm [shape: f32[512,128], index: 3, kind: input, shape index: {}]   ;;  %s3266_s4 = inlined_call_operand.vmem [shape: f32[2,8,128], index: 4, kind: output, shape index: {}]  }
   0x1   :  { %3275 = sst [smem:[#allocation16_spill]] %s3264_s2 }
   0x2   :  { %9 = vsyncpa [#allocation4], 0 }
   0x3   :  { %11 = vsyncpa [#allocation4 + $0x1], 0 }
   0x4   :  { %12 = vsyncpa [#allocation6], 0 }
   0x5   :  { %14 = vsyncpa [#allocation6 + $0x1], 0  ;;  %s2453_s15 = smov 0   ;;  %s2455_s16 = smov 0  }
   0x6   :  { %s2457_s17 = smov 0   ;;  %s2459_s18 = smov 0  }
   0x7   :  { %s2461_s19 = smov 0   ;;  %s2463_s20 = smov 0  }
   0x8   :  { %s2465_s21 = smov 0   ;;  %s2467_s22 = smov 0  }
   0x9   :  { %s2469_s23 = smov 0   ;;  %s2471_s24 = smov 0  }
   0xa   :  { %s2473_s25 = smov 0  }
   0xb LB: > { %3276 = sst [smem:[#allocation10_spill]] %s2385_s17  ;;  %s3267_s26 = sadd.s32 4294967295, %s2417_s25   ;;  %s2417_s25 = sphi %s2473_s25, %s20_s25   ;;  %s2413_s24 = sphi %s2471_s24, %s3311_s24   ;;  %s2409_s23 = sphi %s2469_s23, %s3310_s23   ;;  %s2405_s22 = sphi %s2467_s22, %s3309_s22   ;;  %s2401_s21 = sphi %s2465_s21, %s3308_s21   ;;  %s2397_s20 = sphi %s2463_s20, %s3301_s20   ;;  %s2393_s19 = sphi %s2461_s19, %s3307_s19   ;;  %s2389_s18 = sphi %s2459_s18, %s3306_s18   ;;  %s2385_s17 = sphi %s2457_s17, %s3299_s17   ;;  %s2381_s16 = sphi %s2455_s16, %s3305_s16   ;;  %s2377_s15 = sphi %s2453_s15, %s3304_s15  }
   0xc   : > { %3277 = sst [smem:[#allocation11_spill]] %s2397_s20  ;;  %s29_s27 = sadd.s32 1, %s2409_s23 }
   0xd   : > { %p30_p0 = scmp.ge.s32.totalorder %s29_s27, 5  ;;  %s32_s28 = sadd.s32 1, %s2413_s24 }
   0xe   : > { %s67_s29 = sadd.s32 1, %s2397_s20  ;;  %p74_p1 = scmp.ne.s32.totalorder %s2397_s20, %s2393_s19 }
   0xf   : > { %s3313_s27 = smov (%p30_p0, %s29_s27), 0  ;;  %s3315_s28 = smov (!%p30_p0, %s32_s28), %s2413_s24 }
  0x10   : > { %3278 = sst [smem:[#allocation12_spill]] %s3313_s27  ;;  %s62_s30 = ssub.s32 %s2409_s23, %s3313_s27 }
  0x11   : > { %p75_p2 = scmp.eq.s32.totalorder %s2417_s25, 0  ;;  %p34_p3 = scmp.ge.s32.totalorder %s3315_s28, 2 }
  0x12   : > { %p80_p4 = scmp.ne.s32.totalorder %s2393_s19, %s2389_s18  ;;  %p2527_p6 = scmp.eq.s32.totalorder %s3267_s26, 0 }
  0x13   : > { %p2521_p5 = por %p75_p2, %p74_p1  ;;  %s3317_s28 = smov (%p34_p3, %s3315_s28), 0 }
  0x14   : > { %3281 = sst [smem:[#allocation13_spill]] %s3317_s28  ;;  %p2535_p7 = por %p2527_p6, %p80_p4 }
  0x15   : > { %s93_s8 = sadd.s32 1, %s2385_s17  ;;  %s63_s9 = ssub.s32 %s2413_s24, %s3317_s28 }
  0x16   : > { %s3282_s7 = scalar_select %p2535_p7, 1, 0 }
  0x17   : > { %p100_p8 = scmp.ne.s32.totalorder %s2385_s17, %s2381_s16  ;;  %s64_s10 = sor.u32 %s63_s9, %s62_s30 }
  0x18   : > { %p91_p9 = scmp.eq.s32.totalorder %s63_s9, 0  ;;  %p65_p10 = scmp.eq.s32.totalorder %s64_s10, 0 }
  0x19   : > { %p2546_p11 = por %p100_p8, %p75_p2  ;;  %p106_p12 = scmp.ne.s32.totalorder %s2381_s16, %s2377_s15 }
  0x1a   : > { %s2551_s12 = scalar_select %p91_p9, %s2385_s17, %s93_s8  }
  0x1b   : > { %s2554_s13 = scalar_select %p65_p10, %s2397_s20, %s67_s29  }
  0x1c   : > { %3284 = sst [smem:[#allocation14_spill]] %s2551_s12  ;;  %p2138_p13 = scmp.lt.s32.totalorder %s2417_s25, 10 }
  0x1d   : > { %3285 = sst [smem:[#allocation15_spill]] %s2554_s13  ;;  %s215_s14 = sand.u32 1, %s2417_s25  }
  0x1e   : > { %p2562_p0 = por %p106_p12, %p2527_p6  ;;  %p2568_p1 = pnand %p2138_p13, %p2521_p5 }
  0x1f   : > { %s217_s9 = sand.u32 1, %s2385_s17   ;;  %s1591_s8 = sshll.u32 %s2413_s24, 5 }
  0x20   : > { %s3286_s18 = scalar_select %p2562_p0, 1, 0 }
  0x21   : > { %s1575_s10 = sshll.u32 %s217_s9, 1  ;;  %s3288_s2 = sld [smem:[#allocation16_spill]] }
  0x22   : > { %s219_s15 = scalar_lea.vmem [#allocation5], %s1575_s10  ;;  %p2583_p2 = pnand %p2138_p13, %p2546_p11 }
  0x23   : > { %s227_s6 = sshll.u32 %s219_s15, 4  ;;  %s2587_s27 = sshll.u32 %s217_s9, 8  ;;  %s2579_s6 = int_to_ptr.vmem [resolvable:$true] %s227_s6 }
  0x24   : > { %s2590_s26 = scalar_lea.sflag [#allocation6], %s215_s14  ;;  %p3274_p5 = pneg %p2583_p2 }
  0x27   : > { %s2577_s29 = scalar_lea.hbm %s3288_s2, %s1591_s8  ;;  %s2238_s8 = scalar_lea.hbm %s3288_s2, 64 }
  0x28   : > { %s2233_s28 = scalar_lea.hbm %s2577_s29, 32  ;;  %p2239_p9 = scmp.lt.u32.totalorder %s2577_s29, %s3288_s2 }
  0x29   : > { %p2234_p4 = scmp.ne.s32.totalorder %s2577_s29, %s2233_s28  ;;  %p2240_p10 = scmp.lt.u32.totalorder %s2238_s8, %s2233_s28 }
  0x2a   : > { %p2242_p12 = scmp.lt.u32.totalorder %s2233_s28, %s2577_s29 }
  0x2b   : > { %p2236_p6 = pnand %p3274_p5, %p2234_p4  ;;  %p2241_p11 = por %p2240_p10, %p2239_p9 }
  0x2d   : > { %p2237_p8 = pneg %p2236_p6  ;;  %p2243_p13 = por %p2242_p12, %p2241_p11 }
  0x2f   : > { %p2244_p3 = pnand %p2243_p13, %p2237_p8 }
  0x31   : > { %2247 = shalt.err (!%p2244_p3)
}
  0x32   : > { %s2248_s14 = scalar_lea.vmem %s2579_s6, 32  ;;  %s2419_s9 = smov [#allocation5]  }
  0x33   : > { %p2249_p4 = scmp.ne.s32.totalorder %s2579_s6, %s2248_s14  ;;  %s2253_s11 = sshll.u32 %s2419_s9, 4  ;;  %s2254_s11 = int_to_ptr.vmem [resolvable:$false] %s2253_s11 }
  0x34   : > { %s2255_s13 = scalar_lea.vmem %s2254_s11, 64  ;;  %p2256_p7 = scmp.lt.s32.totalorder %s2579_s6, %s2254_s11 }
  0x35   : > { %p2251_p6 = pnand %p2249_p4, %p3274_p5  ;;  %p2257_p9 = scmp.lt.s32.totalorder %s2255_s13, %s2248_s14 }
  0x37   : > { %p2252_p0 = pneg %p2251_p6  ;;  %p2258_p10 = por %p2257_p9, %p2256_p7 }
  0x39   : > { %p2259_p11 = pnand %p2258_p10, %p2252_p0 }
  0x3b   : > { %2262 = shalt.err (!%p2259_p11)
}
  0x3c   : > { %2134 = dma.hbm_to_vmem [thread:$0]  (!%p2583_p2), %s2577_s29, 32, %s2579_s6, %s2590_s26  }
  0x3d   : > { %s238_s28 = scalar_lea.vmem [#allocation7], %s2587_s27  ;;  %p253_p3 = scmp.lt.s32.totalorder %s2417_s25, 11 }
  0x3e   : > { %s245_s10 = sshll.u32 %s238_s28, 4  ;;  %p3290_p7 = scmp.ge.s32.totalorder %s2417_s25, 1  ;;  %s2620_s10 = int_to_ptr.vmem [resolvable:$true] %s245_s10 }
  0x3f   : > { %s191_s15 = sand.u32 1, %s2397_s20   ;;  %s1572_s14 = sshll.u32 %s2413_s24, 1 }
  0x40   : > { %p2624_p0 = pnand %p3290_p7, %p253_p3  ;;  %s2120_s9 = smul.u32 3584, %s191_s15 }
  0x41   : > { %s1590_s11 = smul.u32 896, %s2409_s23  ;;  %s2638_s17 = scalar_lea.sflag [#allocation4], %s191_s15 }
  0x42   : > { %s3291_s8 = scalar_select %p2624_p0, 1, 0 }
  0x43   : > { %s202_s13 = sadd.s32 %s1590_s11, %s1572_s14  ;;  %s195_s2 = scalar_lea.vmem [#allocation3], %s2120_s9 }
  0x44   : > { %s205_s12 = sshll.u32 %s195_s2, 4  ;;  %s1574_s29 = sshll.u32 %s202_s13, 7  ;;  %s2631_s12 = int_to_ptr.vmem [resolvable:$true] %s205_s12 }
  0x45   : > { %s2636_s28 = scalar_lea.hbm %s3263_s1, %s1574_s29  ;;  %p2265_p12 = pneg %p2568_p1 }
  0x46   : > { %s2263_s20 = scalar_lea.hbm %s2636_s28, 57344  ;;  %s2268_s9 = scalar_lea.hbm %s3263_s1, 573440 }
  0x47   : > { %p2264_p8 = scmp.ne.s32.totalorder %s2636_s28, %s2263_s20  ;;  %p2269_p6 = scmp.lt.u32.totalorder %s2636_s28, %s3263_s1 }
  0x48   : > { %p2270_p9 = scmp.lt.u32.totalorder %s2268_s9, %s2263_s20  ;;  %p2272_p11 = scmp.lt.u32.totalorder %s2263_s20, %s2636_s28 }
  0x49   : > { %p2266_p13 = pnand %p2265_p12, %p2264_p8 }
  0x4a   : > { %p2271_p10 = por %p2270_p9, %p2269_p6 }
  0x4b   : > { %p2267_p4 = pneg %p2266_p13 }
  0x4c   : > { %p2273_p3 = por %p2272_p11, %p2271_p10 }
  0x4e   : > { %p2274_p7 = pnand %p2273_p3, %p2267_p4 }
  0x50   : > { %2277 = shalt.err (!%p2274_p7)
}
  0x51   : > { %s2278_s15 = scalar_lea.vmem %s2631_s12, 57344  ;;  %s2420_s29 = smov [#allocation3]  }
  0x52   : > { %p2279_p8 = scmp.ne.s32.totalorder %s2631_s12, %s2278_s15  ;;  %s2283_s27 = sshll.u32 %s2420_s29, 4  ;;  %s2284_s27 = int_to_ptr.vmem [resolvable:$false] %s2283_s27 }
  0x53   : > { %s2285_s6 = scalar_lea.vmem %s2284_s27, 114688  ;;  %p2286_p0 = scmp.lt.s32.totalorder %s2631_s12, %s2284_s27 }
  0x54   : > { %p2281_p13 = pnand %p2279_p8, %p2265_p12  ;;  %p2287_p6 = scmp.lt.s32.totalorder %s2285_s6, %s2278_s15 }
  0x56   : > { %p2282_p5 = pneg %p2281_p13  ;;  %p2288_p9 = por %p2287_p6, %p2286_p0 }
  0x58   : > { %p2289_p10 = pnand %p2288_p9, %p2282_p5 }
  0x5a   : > { %2292 = shalt.err (!%p2289_p10)
}
  0x5b   : > { %s2421_s20 = smov 512   ;;  %s2422_s2 = smov 256  }
  0x5c   : > { %s2423_s14 = smov 16   ;;  %s1592_s9 = sshll.u32 %s2413_s24, 12 }
  0x5d   : > { %2131 = dma.hbm_to_vmem [thread:$0]  (!%p2568_p1), %s2636_s28, 57344, %s2631_s12, %s2638_s17, %s2421_s20, %s2422_s2, %s2423_s14  }
  0x5e   : > { %s2670_s29 = scalar_lea.hbm %s3265_s3, %s1592_s9  ;;  %p3292_p0 = pneg %p2583_p2 }
  0x5f   : > { %s2293_s15 = scalar_lea.hbm %s2670_s29, 4096  ;;  %s2298_s17 = scalar_lea.hbm %s3265_s3, 8192 }
  0x60   : > { %p2294_p5 = scmp.ne.s32.totalorder %s2670_s29, %s2293_s15  ;;  %p2299_p1 = scmp.lt.u32.totalorder %s2670_s29, %s3265_s3 }
  0x61   : > { %p2300_p11 = scmp.lt.u32.totalorder %s2298_s17, %s2293_s15  ;;  %p2302_p7 = scmp.lt.u32.totalorder %s2293_s15, %s2670_s29 }
  0x62   : > { %p2296_p12 = pnand %p2294_p5, %p3292_p0 }
  0x63   : > { %p2301_p3 = por %p2300_p11, %p2299_p1 }
  0x64   : > { %p2297_p4 = pneg %p2296_p12 }
  0x65   : > { %p2303_p8 = por %p2302_p7, %p2301_p3 }
  0x67   : > { %p2304_p13 = pnand %p2303_p8, %p2297_p4 }
  0x69   : > { %2307 = shalt.err (!%p2304_p13)
}
  0x6a   : > { %s2308_s28 = scalar_lea.vmem %s2620_s10, 4096  ;;  %p3293_p9 = pmov %p3292_p0 }
  0x6b   : > { %p2309_p6 = scmp.ne.s32.totalorder %s2620_s10, %s2308_s28  ;;  %s2424_s20 = smov [#allocation7]  }
  0x6c   : > { %s2313_s2 = sshll.u32 %s2424_s20, 4  ;;  %s2314_s2 = int_to_ptr.vmem [resolvable:$false] %s2313_s2 }
  0x6d   : > { %p2311_p10 = pnand %p2309_p6, %p3293_p9  ;;  %s2315_s14 = scalar_lea.vmem %s2314_s2, 8192 }
  0x6e   : > { %p2316_p0 = scmp.lt.s32.totalorder %s2620_s10, %s2314_s2  ;;  %p2317_p12 = scmp.lt.s32.totalorder %s2315_s14, %s2308_s28 }
  0x6f   : > { %p2312_p5 = pneg %p2311_p10 }
  0x70   : > { %p2318_p1 = por %p2317_p12, %p2316_p0 }
  0x72   : > { %p2319_p11 = pnand %p2318_p1, %p2312_p5 }
  0x74   : > { %2322 = shalt.err (!%p2319_p11)
}
  0x75   : > { %s2425_s9 = smov 128   ;;  %s2426_s11 = smov 8  }
  0x76   : > { %2137 = dma.hbm_to_vmem [thread:$0]  (!%p2583_p2), %s2670_s29, 4096, %s2620_s10, %s2590_s26, %s2425_s9, %s2425_s9, %s2426_s11  }
  0x77   : > { %p3294_p4 = scmp.ne.s32.totalorder %s3291_s8, 0 }
  0x78   : > { %s259_s13 = sand.u32 (!%p3294_p4), 1, %s2393_s19   ;;  %p3295_p3 = scmp.ne.s32.totalorder (!%p3294_p4), %s3282_s7, 0 }
  0x79   : > { %257 = sbr.rel (%p3294_p4) target bundleno = 855 (0x357), region = 36  ;;  %s260_s27 = scalar_lea.sflag (!%p3294_p4), [#allocation4], %s259_s13 }
  0x7a   : > { %s2121_s15 = smul.u32 (!%p3294_p4), 3584, %s259_s13 }
  0x7c   : > { %s2699_s6 = scalar_lea.vmem (!%p3294_p4), [#allocation3], %s2121_s15 }
  0x80   : > { %2368 = dma.done.wait (%p3295_p3), %s260_s27, 57344  }
  0x81   : > { %2370 = vsyncadd (%p3295_p3), %s260_s27, 4294909952  ;;  %s3296_s17 = sadd.s32 4294967295, %s2417_s25   ;;  %s270_s26 = sand.u32 1, %s2381_s16  }
  0x82   : > { %s268_s5 = sand.u32 1, %s3296_s17   ;;  %s2708_s10 = sshll.u32 %s270_s26, 1 }
  0x83   : > { %s269_s8 = scalar_lea.sflag [#allocation6], %s268_s5  ;;  %s272_s29 = scalar_lea.vmem [#allocation5], %s2708_s10 }
  0x84   : > { %p3297_p2 = scmp.ne.s32.totalorder %s3286_s18, 0 }
  0x86   : > { %2372 = dma.done.wait (%p3297_p2), %s269_s8, 4128  }
  0x87   : > { %2374 = vsyncadd (%p3297_p2), %s269_s8, 4294963168  ;;  %s1583_s7 = sshll.u32 %s270_s26, 8  ;;  %s320_s12 = smul.u32 14, %s2401_s21 }
  0x88   : > { %p330_p7 = scmp.lt.s32.totalorder %s2405_s22, 1  ;;  %s2728_s13 = scalar_lea.vmem [#allocation7], %s1583_s7 }
  0x89   : > { %p321_p8 = scmp.lt.s32.totalorder %s320_s12, 69  ;;  %p1586_p13 = scmp.ne.s32.totalorder %s2401_s21, 0 }
  0x8a   : > { %s3319_s22 = smov (!%p330_p7, %s2405_s22), 1  ;;  %v2427_v0 = vmov (!%p1586_p13), 0.0  }
  0x8b   : > { %s3321_s12 = smov (!%p321_p8, %s320_s12), 69  ;;  %s1585_s30 = sshll.u32 %s3319_s22, 3  ;;  %338 = vst [vmem:[#allocation2] sm:$0xff] (!%p1586_p13), %v2427_v0  ;;  %339 = vst [vmem:[#allocation2 + $0x8] sm:$0xff] (!%p1586_p13), %v2427_v0 }
  0x8c   : > { %s1584_s28 = sshll.u32 %s3321_s12, 3  ;;  %s2721_s14 = scalar_lea.vmem %s3266_s4, %s1585_s30 }
  0x8d   : > { %s2726_s18 = scalar_lea.vmem %s3262_s0, %s1584_s28  ;;  %337 = sbr.rel (%p1586_p13) target bundleno = 148 (0x94), region = 52 }
  0x94 PF: > { %v357_v1 = vld [vmem:[%s2699_s6 + $0x8] sm:$0xff]  ;;  %v359_v2 = vld [vmem:[%s2699_s6 + $0x18] sm:$0xff]  ;;  %v356_v6 = vld [vmem:[%s2699_s6] sm:$0xff]  ;;  %p1587_p6 = scmp.ne.s32.totalorder %s2401_s21, 4 }
  0x95   : > { %v549_v3 = vld [vmem:[%s2699_s6 + $0x608] sm:$0xff]  ;;  %v1628_v4 = vpack.c.bf16 %v359_v2, %v357_v1  ;;  %v551_v5 = vld [vmem:[%s2699_s6 + $0x618] sm:$0xff]  ;;  %v358_v7 = vld [vmem:[%s2699_s6 + $0x10] sm:$0xff] }
  0x96   : > { %v1820_v8 = vpack.c.bf16 %v551_v5, %v549_v3  ;;  %v1630_v9 = vpack.c.bf16 %v358_v7, %v356_v6  ;;  %v548_v10 = vld [vmem:[%s2699_s6 + $0x600] sm:$0xff]  ;;  %v550_v11 = vld [vmem:[%s2699_s6 + $0x610] sm:$0xff]  ;;  %v361_v12 = vld [vmem:[%s2699_s6 + $0x28] sm:$0xff] }
  0x97   : > { %1629 = vmatprep.subr.bf16.mxu1 %v1628_v4  ;;  %v1822_v13 = vpack.c.bf16 %v550_v11, %v548_v10  ;;  %v363_v14 = vld [vmem:[%s2699_s6 + $0x38] sm:$0xff]  ;;  %v553_v15 = vld [vmem:[%s2699_s6 + $0x628] sm:$0xff]  ;;  %v360_v19 = vld [vmem:[%s2699_s6 + $0x20] sm:$0xff] }
  0x98   : > { %v555_v16 = vld [vmem:[%s2699_s6 + $0x638] sm:$0xff]  ;;  %1821 = vmatprep.subr.bf16.mxu0 %v1820_v8  ;;  %1631 = vmatpush1.bf16.msra.mxu1 %v1630_v9  ;;  %v1632_v17 = vpack.c.bf16 %v363_v14, %v361_v12  ;;  %v362_v20 = vld [vmem:[%s2699_s6 + $0x30] sm:$0xff]  ;;  %v552_v21 = vld [vmem:[%s2699_s6 + $0x620] sm:$0xff] }
  0x99   : > { %v1824_v18 = vpack.c.bf16 %v555_v16, %v553_v15  ;;  %1823 = vmatpush1.bf16.msra.mxu0 %v1822_v13  ;;  %v1634_v22 = vpack.c.bf16 %v362_v20, %v360_v19  ;;  %v554_v23 = vld [vmem:[%s2699_s6 + $0x630] sm:$0xff]  ;;  %v365_v24 = vld [vmem:[%s2699_s6 + $0x48] sm:$0xff]  ;;  %v367_v25 = vld [vmem:[%s2699_s6 + $0x58] sm:$0xff] }
  0x9a   : > { %1633 = vmatprep.subr.bf16.mxu1 %v1632_v17  ;;  %v1826_v26 = vpack.c.bf16 %v554_v23, %v552_v21  ;;  %v1636_v27 = vpack.c.bf16 %v367_v25, %v365_v24  ;;  %v557_v28 = vld [vmem:[%s2699_s6 + $0x648] sm:$0xff]  ;;  %v559_v29 = vld [vmem:[%s2699_s6 + $0x658] sm:$0xff]  ;;  %v364_v30 = vld [vmem:[%s2699_s6 + $0x40] sm:$0xff] }
  0x9b   : > { %1825 = vmatprep.subr.bf16.mxu0 %v1824_v18  ;;  %v1828_v31 = vpack.c.bf16 %v559_v29, %v557_v28  ;;  %v366_v32 = vld [vmem:[%s2699_s6 + $0x50] sm:$0xff]  ;;  %v556_v33 = vld [vmem:[%s2699_s6 + $0x640] sm:$0xff]  ;;  %v369_v36 = vld [vmem:[%s2699_s6 + $0x68] sm:$0xff] }
  0x9c   : > { %v558_v34 = vld [vmem:[%s2699_s6 + $0x650] sm:$0xff]  ;;  %1635 = vmatpush1.bf16.msra.mxu1 %v1634_v22  ;;  %v1638_v35 = vpack.c.bf16 %v366_v32, %v364_v30  ;;  %v371_v37 = vld [vmem:[%s2699_s6 + $0x78] sm:$0xff]  ;;  %v561_v38 = vld [vmem:[%s2699_s6 + $0x668] sm:$0xff] }
  0x9d   : > { %1827 = vmatpush1.bf16.msra.mxu0 %v1826_v26  ;;  %1637 = vmatprep.subr.bf16.mxu1 %v1636_v27  ;;  %v1830_v39 = vpack.c.bf16 %v558_v34, %v556_v33  ;;  %v1640_v40 = vpack.c.bf16 %v371_v37, %v369_v36  ;;  %v563_v41 = vld [vmem:[%s2699_s6 + $0x678] sm:$0xff]  ;;  %v368_v42 = vld [vmem:[%s2699_s6 + $0x60] sm:$0xff]  ;;  %v370_v43 = vld [vmem:[%s2699_s6 + $0x70] sm:$0xff] }
  0x9e   : > { %1829 = vmatprep.subr.bf16.mxu0 %v1828_v31  ;;  %v1832_v44 = vpack.c.bf16 %v563_v41, %v561_v38  ;;  %v560_v45 = vld [vmem:[%s2699_s6 + $0x660] sm:$0xff]  ;;  %v562_v46 = vld [vmem:[%s2699_s6 + $0x670] sm:$0xff]  ;;  %v373_v47 = vld [vmem:[%s2699_s6 + $0x88] sm:$0xff]  ;;  %v1642_v51 = vpack.c.bf16 %v370_v43, %v368_v42 }
  0x9f   : > { %v375_v48 = vld [vmem:[%s2699_s6 + $0x98] sm:$0xff]  ;;  %v565_v49 = vld [vmem:[%s2699_s6 + $0x688] sm:$0xff]  ;;  %v1834_v52 = vpack.c.bf16 %v562_v46, %v560_v45  ;;  %v372_v54 = vld [vmem:[%s2699_s6 + $0x80] sm:$0xff] }
  0xa0   : > { %v567_v50 = vld [vmem:[%s2699_s6 + $0x698] sm:$0xff]  ;;  %1639 = vmatpush1.bf16.msra.mxu1 %v1638_v35  ;;  %v1644_v53 = vpack.c.bf16 %v375_v48, %v373_v47  ;;  %v374_v55 = vld [vmem:[%s2699_s6 + $0x90] sm:$0xff]  ;;  %v564_v56 = vld [vmem:[%s2699_s6 + $0x680] sm:$0xff] }
  0xa1   : > { %1831 = vmatpush1.bf16.msra.mxu0 %v1830_v39  ;;  %1641 = vmatprep.subr.bf16.mxu1 %v1640_v40  ;;  %v1836_v57 = vpack.c.bf16 %v567_v50, %v565_v49  ;;  %v566_v58 = vld [vmem:[%s2699_s6 + $0x690] sm:$0xff]  ;;  %v377_v59 = vld [vmem:[%s2699_s6 + $0xa8] sm:$0xff]  ;;  %v379_v60 = vld [vmem:[%s2699_s6 + $0xb8] sm:$0xff]  ;;  %v1646_v63 = vpack.c.bf16 %v374_v55, %v372_v54 }
  0xa2   : > { %1833 = vmatprep.subr.bf16.mxu0 %v1832_v44  ;;  %v569_v61 = vld [vmem:[%s2699_s6 + $0x6a8] sm:$0xff]  ;;  %v571_v62 = vld [vmem:[%s2699_s6 + $0x6b8] sm:$0xff]  ;;  %v1838_v0 = vpack.c.bf16 %v566_v58, %v564_v56  ;;  %v1648_v1 = vpack.c.bf16 %v379_v60, %v377_v59  ;;  %v376_v2 = vld [vmem:[%s2699_s6 + $0xa0] sm:$0xff] }
  0xa3   : > { %v378_v3 = vld [vmem:[%s2699_s6 + $0xb0] sm:$0xff]  ;;  %v568_v4 = vld [vmem:[%s2699_s6 + $0x6a0] sm:$0xff]  ;;  %v1840_v5 = vpack.c.bf16 %v571_v62, %v569_v61  ;;  %v381_v7 = vld [vmem:[%s2699_s6 + $0xc8] sm:$0xff] }
  0xa4   : > { %1643 = vmatpush1.bf16.msra.mxu1 %v1642_v51  ;;  %v570_v6 = vld [vmem:[%s2699_s6 + $0x6b0] sm:$0xff]  ;;  %v383_v8 = vld [vmem:[%s2699_s6 + $0xd8] sm:$0xff]  ;;  %v573_v9 = vld [vmem:[%s2699_s6 + $0x6c8] sm:$0xff]  ;;  %v1650_v11 = vpack.c.bf16 %v378_v3, %v376_v2 }
  0xa5   : > { %1835 = vmatpush1.bf16.msra.mxu0 %v1834_v52  ;;  %1645 = vmatprep.subr.bf16.mxu1 %v1644_v53  ;;  %v575_v10 = vld [vmem:[%s2699_s6 + $0x6d8] sm:$0xff]  ;;  %v1842_v12 = vpack.c.bf16 %v570_v6, %v568_v4  ;;  %v1652_v13 = vpack.c.bf16 %v383_v8, %v381_v7  ;;  %v380_v14 = vld [vmem:[%s2699_s6 + $0xc0] sm:$0xff]  ;;  %v382_v15 = vld [vmem:[%s2699_s6 + $0xd0] sm:$0xff] }
  0xa6   : > { %1837 = vmatprep.subr.bf16.mxu0 %v1836_v57  ;;  %v572_v16 = vld [vmem:[%s2699_s6 + $0x6c0] sm:$0xff]  ;;  %v1844_v17 = vpack.c.bf16 %v575_v10, %v573_v9  ;;  %v574_v18 = vld [vmem:[%s2699_s6 + $0x6d0] sm:$0xff]  ;;  %v385_v19 = vld [vmem:[%s2699_s6 + $0xe8] sm:$0xff]  ;;  %v1654_v23 = vpack.c.bf16 %v382_v15, %v380_v14 }
  0xa7   : > { %v387_v20 = vld [vmem:[%s2699_s6 + $0xf8] sm:$0xff]  ;;  %v577_v21 = vld [vmem:[%s2699_s6 + $0x6e8] sm:$0xff]  ;;  %v1846_v24 = vpack.c.bf16 %v574_v18, %v572_v16  ;;  %v384_v26 = vld [vmem:[%s2699_s6 + $0xe0] sm:$0xff] }
  0xa8   : > { %1647 = vmatpush1.bf16.msra.mxu1 %v1646_v63  ;;  %v579_v22 = vld [vmem:[%s2699_s6 + $0x6f8] sm:$0xff]  ;;  %v1656_v25 = vpack.c.bf16 %v387_v20, %v385_v19  ;;  %v386_v27 = vld [vmem:[%s2699_s6 + $0xf0] sm:$0xff]  ;;  %v576_v28 = vld [vmem:[%s2699_s6 + $0x6e0] sm:$0xff] }
  0xa9   : > { %1839 = vmatpush1.bf16.msra.mxu0 %v1838_v0  ;;  %1649 = vmatprep.subr.bf16.mxu1 %v1648_v1  ;;  %v1848_v29 = vpack.c.bf16 %v579_v22, %v577_v21  ;;  %v578_v30 = vld [vmem:[%s2699_s6 + $0x6f0] sm:$0xff]  ;;  %v389_v31 = vld [vmem:[%s2699_s6 + $0x108] sm:$0xff]  ;;  %v391_v32 = vld [vmem:[%s2699_s6 + $0x118] sm:$0xff]  ;;  %v1658_v35 = vpack.c.bf16 %v386_v27, %v384_v26 }
  0xaa   : > { %1841 = vmatprep.subr.bf16.mxu0 %v1840_v5  ;;  %v581_v33 = vld [vmem:[%s2699_s6 + $0x708] sm:$0xff]  ;;  %v583_v34 = vld [vmem:[%s2699_s6 + $0x718] sm:$0xff]  ;;  %v1850_v36 = vpack.c.bf16 %v578_v30, %v576_v28  ;;  %v1660_v37 = vpack.c.bf16 %v391_v32, %v389_v31  ;;  %v388_v38 = vld [vmem:[%s2699_s6 + $0x100] sm:$0xff] }
  0xab   : > { %v390_v39 = vld [vmem:[%s2699_s6 + $0x110] sm:$0xff]  ;;  %v580_v40 = vld [vmem:[%s2699_s6 + $0x700] sm:$0xff]  ;;  %v1852_v41 = vpack.c.bf16 %v583_v34, %v581_v33  ;;  %v393_v43 = vld [vmem:[%s2699_s6 + $0x128] sm:$0xff] }
  0xac   : > { %1651 = vmatpush1.bf16.msra.mxu1 %v1650_v11  ;;  %v582_v42 = vld [vmem:[%s2699_s6 + $0x710] sm:$0xff]  ;;  %v395_v44 = vld [vmem:[%s2699_s6 + $0x138] sm:$0xff]  ;;  %v585_v45 = vld [vmem:[%s2699_s6 + $0x728] sm:$0xff]  ;;  %v1662_v47 = vpack.c.bf16 %v390_v39, %v388_v38 }
  0xad   : > { %1843 = vmatpush1.bf16.msra.mxu0 %v1842_v12  ;;  %1653 = vmatprep.subr.bf16.mxu1 %v1652_v13  ;;  %v587_v46 = vld [vmem:[%s2699_s6 + $0x738] sm:$0xff]  ;;  %v1854_v48 = vpack.c.bf16 %v582_v42, %v580_v40  ;;  %v1664_v49 = vpack.c.bf16 %v395_v44, %v393_v43  ;;  %v392_v50 = vld [vmem:[%s2699_s6 + $0x120] sm:$0xff]  ;;  %v394_v51 = vld [vmem:[%s2699_s6 + $0x130] sm:$0xff] }
  0xae   : > { %1845 = vmatprep.subr.bf16.mxu0 %v1844_v17  ;;  %v584_v52 = vld [vmem:[%s2699_s6 + $0x720] sm:$0xff]  ;;  %v1856_v53 = vpack.c.bf16 %v587_v46, %v585_v45  ;;  %v586_v54 = vld [vmem:[%s2699_s6 + $0x730] sm:$0xff]  ;;  %v397_v55 = vld [vmem:[%s2699_s6 + $0x148] sm:$0xff]  ;;  %v1666_v59 = vpack.c.bf16 %v394_v51, %v392_v50 }
  0xaf   : > { %v399_v56 = vld [vmem:[%s2699_s6 + $0x158] sm:$0xff]  ;;  %v589_v57 = vld [vmem:[%s2699_s6 + $0x748] sm:$0xff]  ;;  %v1858_v60 = vpack.c.bf16 %v586_v54, %v584_v52  ;;  %v396_v62 = vld [vmem:[%s2699_s6 + $0x140] sm:$0xff] }
  0xb0   : > { %1655 = vmatpush1.bf16.msra.mxu1 %v1654_v23  ;;  %v591_v58 = vld [vmem:[%s2699_s6 + $0x758] sm:$0xff]  ;;  %v1668_v61 = vpack.c.bf16 %v399_v56, %v397_v55  ;;  %v398_v63 = vld [vmem:[%s2699_s6 + $0x150] sm:$0xff]  ;;  %v588_v0 = vld [vmem:[%s2699_s6 + $0x740] sm:$0xff] }
  0xb1   : > { %1847 = vmatpush1.bf16.msra.mxu0 %v1846_v24  ;;  %1657 = vmatprep.subr.bf16.mxu1 %v1656_v25  ;;  %v1860_v1 = vpack.c.bf16 %v591_v58, %v589_v57  ;;  %v590_v2 = vld [vmem:[%s2699_s6 + $0x750] sm:$0xff]  ;;  %v401_v3 = vld [vmem:[%s2699_s6 + $0x168] sm:$0xff]  ;;  %v403_v4 = vld [vmem:[%s2699_s6 + $0x178] sm:$0xff]  ;;  %v1670_v7 = vpack.c.bf16 %v398_v63, %v396_v62 }
  0xb2   : > { %1849 = vmatprep.subr.bf16.mxu0 %v1848_v29  ;;  %v593_v5 = vld [vmem:[%s2699_s6 + $0x768] sm:$0xff]  ;;  %v595_v6 = vld [vmem:[%s2699_s6 + $0x778] sm:$0xff]  ;;  %v400_v8 = vld [vmem:[%s2699_s6 + $0x160] sm:$0xff]  ;;  %v1862_v9 = vpack.c.bf16 %v590_v2, %v588_v0  ;;  %v1672_v10 = vpack.c.bf16 %v403_v4, %v401_v3 }
  0xb3   : > { %v402_v11 = vld [vmem:[%s2699_s6 + $0x170] sm:$0xff]  ;;  %v592_v12 = vld [vmem:[%s2699_s6 + $0x760] sm:$0xff]  ;;  %v1864_v14 = vpack.c.bf16 %v595_v6, %v593_v5  ;;  %v405_v15 = vld [vmem:[%s2699_s6 + $0x188] sm:$0xff] }
  0xb4   : > { %1659 = vmatpush1.bf16.msra.mxu1 %v1658_v35  ;;  %v594_v13 = vld [vmem:[%s2699_s6 + $0x770] sm:$0xff]  ;;  %v407_v16 = vld [vmem:[%s2699_s6 + $0x198] sm:$0xff]  ;;  %v597_v18 = vld [vmem:[%s2699_s6 + $0x788] sm:$0xff]  ;;  %v1674_v21 = vpack.c.bf16 %v402_v11, %v400_v8 }
  0xb5   : > { %1851 = vmatpush1.bf16.msra.mxu0 %v1850_v36  ;;  %1661 = vmatprep.subr.bf16.mxu1 %v1660_v37  ;;  %v343_v17 = vld [vmem:[%s2726_s18 + $0x8] sm:$0xff]  ;;  %v349_v20 = vld [vmem:[%s2726_s18 + $0x38] sm:$0xff]  ;;  %v1866_v22 = vpack.c.bf16 %v594_v13, %v592_v12  ;;  %v1676_v23 = vpack.c.bf16 %v407_v16, %v405_v15  ;;  %v404_v24 = vld [vmem:[%s2699_s6 + $0x180] sm:$0xff] }
  0xb6   : > { %1853 = vmatprep.subr.bf16.mxu0 %v1852_v41  ;;  %v599_v19 = vld [vmem:[%s2699_s6 + $0x798] sm:$0xff]  ;;  %868 = vmatprep.mubr.f32.mxu1 %v343_v17  ;;  %v406_v25 = vld [vmem:[%s2699_s6 + $0x190] sm:$0xff]  ;;  %v596_v26 = vld [vmem:[%s2699_s6 + $0x780] sm:$0xff] }
  0xb7   : > { %1081 = vmatprep.mubr.f32.mxu0 %v349_v20  ;;  %v1868_v27 = vpack.c.bf16 %v599_v19, %v597_v18  ;;  %v598_v28 = vld [vmem:[%s2699_s6 + $0x790] sm:$0xff]  ;;  %v409_v29 = vld [vmem:[%s2699_s6 + $0x1a8] sm:$0xff]  ;;  %v411_v30 = vld [vmem:[%s2699_s6 + $0x1b8] sm:$0xff]  ;;  %v1678_v33 = vpack.c.bf16 %v406_v25, %v404_v24 }
  0xb8   : > { %1663 = vmatpush1.bf16.msra.mxu1 %v1662_v47  ;;  %v601_v31 = vld [vmem:[%s2699_s6 + $0x7a8] sm:$0xff]  ;;  %v603_v32 = vld [vmem:[%s2699_s6 + $0x7b8] sm:$0xff]  ;;  %v1870_v34 = vpack.c.bf16 %v598_v28, %v596_v26  ;;  %v1680_v35 = vpack.c.bf16 %v411_v30, %v409_v29  ;;  %v408_v36 = vld [vmem:[%s2699_s6 + $0x1a0] sm:$0xff] }
  0xb9   : > { %1855 = vmatpush1.bf16.msra.mxu0 %v1854_v48  ;;  %1665 = vmatprep.subr.bf16.mxu1 %v1664_v49  ;;  %v410_v37 = vld [vmem:[%s2699_s6 + $0x1b0] sm:$0xff]  ;;  %v600_v38 = vld [vmem:[%s2699_s6 + $0x7a0] sm:$0xff]  ;;  %v1872_v39 = vpack.c.bf16 %v603_v32, %v601_v31  ;;  %v413_v41 = vld [vmem:[%s2699_s6 + $0x1c8] sm:$0xff] }
  0xba   : > { %1857 = vmatprep.subr.bf16.mxu0 %v1856_v53  ;;  %v602_v40 = vld [vmem:[%s2699_s6 + $0x7b0] sm:$0xff]  ;;  %v415_v42 = vld [vmem:[%s2699_s6 + $0x1d8] sm:$0xff]  ;;  %v605_v43 = vld [vmem:[%s2699_s6 + $0x7c8] sm:$0xff]  ;;  %v1682_v45 = vpack.c.bf16 %v410_v37, %v408_v36 }
  0xbb   : > { %v607_v44 = vld [vmem:[%s2699_s6 + $0x7d8] sm:$0xff]  ;;  %v1874_v46 = vpack.c.bf16 %v602_v40, %v600_v38  ;;  %v1684_v47 = vpack.c.bf16 %v415_v42, %v413_v41  ;;  %v412_v48 = vld [vmem:[%s2699_s6 + $0x1c0] sm:$0xff]  ;;  %v414_v49 = vld [vmem:[%s2699_s6 + $0x1d0] sm:$0xff] }
  0xbc   : > { %1667 = vmatpush1.bf16.msra.mxu1 %v1666_v59  ;;  %v604_v50 = vld [vmem:[%s2699_s6 + $0x7c0] sm:$0xff]  ;;  %v1876_v51 = vpack.c.bf16 %v607_v44, %v605_v43  ;;  %v606_v52 = vld [vmem:[%s2699_s6 + $0x7d0] sm:$0xff]  ;;  %v417_v53 = vld [vmem:[%s2699_s6 + $0x1e8] sm:$0xff]  ;;  %v1686_v57 = vpack.c.bf16 %v414_v49, %v412_v48 }
  0xbd   : > { %1859 = vmatpush1.bf16.msra.mxu0 %v1858_v60  ;;  %1669 = vmatprep.subr.bf16.mxu1 %v1668_v61  ;;  %v419_v54 = vld [vmem:[%s2699_s6 + $0x1f8] sm:$0xff]  ;;  %v609_v55 = vld [vmem:[%s2699_s6 + $0x7e8] sm:$0xff]  ;;  %v1878_v58 = vpack.c.bf16 %v606_v52, %v604_v50  ;;  %v416_v60 = vld [vmem:[%s2699_s6 + $0x1e0] sm:$0xff] }
  0xbe   : > { %1861 = vmatprep.subr.bf16.mxu0 %v1860_v1  ;;  %v611_v56 = vld [vmem:[%s2699_s6 + $0x7f8] sm:$0xff]  ;;  %v1688_v59 = vpack.c.bf16 %v419_v54, %v417_v53  ;;  %v418_v61 = vld [vmem:[%s2699_s6 + $0x1f0] sm:$0xff]  ;;  %v608_v62 = vld [vmem:[%s2699_s6 + $0x7e0] sm:$0xff] }
  0xbf   : > { %v1880_v63 = vpack.c.bf16 %v611_v56, %v609_v55  ;;  %v610_v0 = vld [vmem:[%s2699_s6 + $0x7f0] sm:$0xff]  ;;  %v421_v1 = vld [vmem:[%s2699_s6 + $0x208] sm:$0xff]  ;;  %v423_v2 = vld [vmem:[%s2699_s6 + $0x218] sm:$0xff]  ;;  %v1690_v5 = vpack.c.bf16 %v418_v61, %v416_v60 }
  0xc0   : > { %1671 = vmatpush1.bf16.msra.mxu1 %v1670_v7  ;;  %v613_v3 = vld [vmem:[%s2699_s6 + $0x808] sm:$0xff]  ;;  %v615_v4 = vld [vmem:[%s2699_s6 + $0x818] sm:$0xff]  ;;  %v1882_v6 = vpack.c.bf16 %v610_v0, %v608_v62  ;;  %v1692_v7 = vpack.c.bf16 %v423_v2, %v421_v1  ;;  %v420_v8 = vld [vmem:[%s2699_s6 + $0x200] sm:$0xff] }
  0xc1   : > { %1863 = vmatpush1.bf16.msra.mxu0 %v1862_v9  ;;  %1673 = vmatprep.subr.bf16.mxu1 %v1672_v10  ;;  %v422_v9 = vld [vmem:[%s2699_s6 + $0x210] sm:$0xff]  ;;  %v612_v10 = vld [vmem:[%s2699_s6 + $0x800] sm:$0xff]  ;;  %v1884_v11 = vpack.c.bf16 %v615_v4, %v613_v3  ;;  %v425_v13 = vld [vmem:[%s2699_s6 + $0x228] sm:$0xff] }
  0xc2   : > { %1865 = vmatprep.subr.bf16.mxu0 %v1864_v14  ;;  %v614_v12 = vld [vmem:[%s2699_s6 + $0x810] sm:$0xff]  ;;  %v427_v14 = vld [vmem:[%s2699_s6 + $0x238] sm:$0xff]  ;;  %v617_v15 = vld [vmem:[%s2699_s6 + $0x828] sm:$0xff]  ;;  %v1694_v18 = vpack.c.bf16 %v422_v9, %v420_v8 }
  0xc3   : > { %v619_v16 = vld [vmem:[%s2699_s6 + $0x838] sm:$0xff]  ;;  %v342_v17 = vld [vmem:[%s2726_s18] sm:$0xff]  ;;  %v348_v19 = vld [vmem:[%s2726_s18 + $0x30] sm:$0xff]  ;;  %v1886_v20 = vpack.c.bf16 %v614_v12, %v612_v10 }
  0xc4   : > { %1675 = vmatpush1.bf16.msra.mxu1 %v1674_v21  ;;  %v1696_v21 = vpack.c.bf16 %v427_v14, %v425_v13  ;;  %v616_v24 = vld [vmem:[%s2699_s6 + $0x820] sm:$0xff]  ;;  %v1888_v25 = vpack.c.bf16 %v619_v16, %v617_v15  ;;  %v618_v26 = vld [vmem:[%s2699_s6 + $0x830] sm:$0xff]  ;;  %v431_v28 = vld [vmem:[%s2699_s6 + $0x258] sm:$0xff] }
  0xc5   : > { %1867 = vmatpush1.bf16.msra.mxu0 %v1866_v22  ;;  %1677 = vmatprep.subr.bf16.mxu1 %v1676_v23  ;;  %v424_v22 = vld [vmem:[%s2699_s6 + $0x220] sm:$0xff]  ;;  %v426_v23 = vld [vmem:[%s2699_s6 + $0x230] sm:$0xff]  ;;  %v621_v29 = vld [vmem:[%s2699_s6 + $0x848] sm:$0xff]  ;;  %v1890_v32 = vpack.c.bf16 %v618_v26, %v616_v24 }
  0xc6   : > { %1869 = vmatprep.subr.bf16.mxu0 %v1868_v27  ;;  %v429_v27 = vld [vmem:[%s2699_s6 + $0x248] sm:$0xff]  ;;  %v623_v30 = vld [vmem:[%s2699_s6 + $0x858] sm:$0xff]  ;;  %v1698_v31 = vpack.c.bf16 %v426_v23, %v424_v22  ;;  %v620_v36 = vld [vmem:[%s2699_s6 + $0x840] sm:$0xff] }
  0xc7   : > { %v1892_v37 = vpack.c.bf16 %v623_v30, %v621_v29  ;;  %v622_v38 = vld [vmem:[%s2699_s6 + $0x850] sm:$0xff]  ;;  %v435_v40 = vld [vmem:[%s2699_s6 + $0x278] sm:$0xff]  ;;  %v625_v41 = vld [vmem:[%s2699_s6 + $0x868] sm:$0xff] }
  0xc8   : > { %1679 = vmatpush1.bf16.msra.mxu1 %v1678_v33  ;;  %v1700_v33 = vpack.c.bf16 %v431_v28, %v429_v27  ;;  %v627_v42 = vld [vmem:[%s2699_s6 + $0x878] sm:$0xff]  ;;  %v1894_v44 = vpack.c.bf16 %v622_v38, %v620_v36  ;;  %v624_v48 = vld [vmem:[%s2699_s6 + $0x860] sm:$0xff]  ;;  %v626_v50 = vld [vmem:[%s2699_s6 + $0x870] sm:$0xff] }
  0xc9   : > { %1871 = vmatpush1.bf16.msra.mxu0 %v1870_v34  ;;  %1681 = vmatprep.subr.bf16.mxu1 %v1680_v35  ;;  %v428_v34 = vld [vmem:[%s2699_s6 + $0x240] sm:$0xff]  ;;  %v430_v35 = vld [vmem:[%s2699_s6 + $0x250] sm:$0xff]  ;;  %v1896_v49 = vpack.c.bf16 %v627_v42, %v625_v41  ;;  %v439_v52 = vld [vmem:[%s2699_s6 + $0x298] sm:$0xff]  ;;  %v1898_v56 = vpack.c.bf16 %v626_v50, %v624_v48 }
  0xca   : > { %1873 = vmatprep.subr.bf16.mxu0 %v1872_v39  ;;  %v433_v39 = vld [vmem:[%s2699_s6 + $0x268] sm:$0xff]  ;;  %v1702_v43 = vpack.c.bf16 %v430_v35, %v428_v34  ;;  %v631_v54 = vld [vmem:[%s2699_s6 + $0x898] sm:$0xff]  ;;  %v628_v60 = vld [vmem:[%s2699_s6 + $0x880] sm:$0xff] }
  0xcb   : > { %v629_v53 = vld [vmem:[%s2699_s6 + $0x888] sm:$0xff]  ;;  %v630_v62 = vld [vmem:[%s2699_s6 + $0x890] sm:$0xff]  ;;  %v443_v0 = vld [vmem:[%s2699_s6 + $0x2b8] sm:$0xff] }
  0xcc   : > { %1683 = vmatpush1.bf16.msra.mxu1 %v1682_v45  ;;  %v1704_v45 = vpack.c.bf16 %v435_v40, %v433_v39  ;;  %v1900_v61 = vpack.c.bf16 %v631_v54, %v629_v53  ;;  %v633_v1 = vld [vmem:[%s2699_s6 + $0x8a8] sm:$0xff]  ;;  %v635_v2 = vld [vmem:[%s2699_s6 + $0x8b8] sm:$0xff]  ;;  %v1902_v4 = vpack.c.bf16 %v630_v62, %v628_v60  ;;  %v632_v8 = vld [vmem:[%s2699_s6 + $0x8a0] sm:$0xff] }
  0xcd   : > { %1875 = vmatpush1.bf16.msra.mxu0 %v1874_v46  ;;  %1685 = vmatprep.subr.bf16.mxu1 %v1684_v47  ;;  %v432_v46 = vld [vmem:[%s2699_s6 + $0x260] sm:$0xff]  ;;  %v434_v47 = vld [vmem:[%s2699_s6 + $0x270] sm:$0xff]  ;;  %v1904_v9 = vpack.c.bf16 %v635_v2, %v633_v1  ;;  %v447_v12 = vld [vmem:[%s2699_s6 + $0x2d8] sm:$0xff] }
  0xce   : > { %1877 = vmatprep.subr.bf16.mxu0 %v1876_v51  ;;  %v437_v51 = vld [vmem:[%s2699_s6 + $0x288] sm:$0xff]  ;;  %v1706_v55 = vpack.c.bf16 %v434_v47, %v432_v46  ;;  %v634_v10 = vld [vmem:[%s2699_s6 + $0x8b0] sm:$0xff]  ;;  %v639_v14 = vld [vmem:[%s2699_s6 + $0x8d8] sm:$0xff] }
  0xcf   : > { %v637_v13 = vld [vmem:[%s2699_s6 + $0x8c8] sm:$0xff]  ;;  %v444_v16 = vld [vmem:[%s2699_s6 + $0x2c0] sm:$0xff]  ;;  %v451_v24 = vld [vmem:[%s2699_s6 + $0x2f8] sm:$0xff] }
  0xd0   : > { %1687 = vmatpush1.bf16.msra.mxu1 %v1686_v57  ;;  %v1708_v57 = vpack.c.bf16 %v439_v52, %v437_v51  ;;  %v1908_v22 = vpack.c.bf16 %v639_v14, %v637_v13  ;;  %v449_v23 = vld [vmem:[%s2699_s6 + $0x2e8] sm:$0xff]  ;;  %v643_v27 = vld [vmem:[%s2699_s6 + $0x8f8] sm:$0xff]  ;;  %v640_v34 = vld [vmem:[%s2699_s6 + $0x8e0] sm:$0xff] }
  0xd1   : > { %1879 = vmatpush1.bf16.msra.mxu0 %v1878_v58  ;;  %1689 = vmatprep.subr.bf16.mxu1 %v1688_v59  ;;  %v436_v58 = vld [vmem:[%s2699_s6 + $0x280] sm:$0xff]  ;;  %v438_v59 = vld [vmem:[%s2699_s6 + $0x290] sm:$0xff]  ;;  %v641_v26 = vld [vmem:[%s2699_s6 + $0x8e8] sm:$0xff] }
  0xd2   : > { %1881 = vmatprep.subr.bf16.mxu0 %v1880_v63  ;;  %v441_v63 = vld [vmem:[%s2699_s6 + $0x2a8] sm:$0xff]  ;;  %v1710_v3 = vpack.c.bf16 %v438_v59, %v436_v58  ;;  %v351_v28 = vld [vmem:[%s2726_s18 + $0x48] sm:$0xff]  ;;  %v1912_v35 = vpack.c.bf16 %v643_v27, %v641_v26  ;;  %v642_v36 = vld [vmem:[%s2699_s6 + $0x8f0] sm:$0xff] }
  0xd3   : > { %v455_v38 = vld [vmem:[%s2699_s6 + $0x318] sm:$0xff]  ;;  %v645_v39 = vld [vmem:[%s2699_s6 + $0x908] sm:$0xff]  ;;  %v1914_v42 = vpack.c.bf16 %v642_v36, %v640_v34  ;;  %v644_v46 = vld [vmem:[%s2699_s6 + $0x900] sm:$0xff] }
  0xd4   : > { %1691 = vmatpush1.bf16.msra.mxu1 %v1690_v5  ;;  %v1712_v5 = vpack.c.bf16 %v443_v0, %v441_v63  ;;  %v647_v40 = vld [vmem:[%s2699_s6 + $0x918] sm:$0xff]  ;;  %v646_v48 = vld [vmem:[%s2699_s6 + $0x910] sm:$0xff]  ;;  %v649_v51 = vld [vmem:[%s2699_s6 + $0x928] sm:$0xff] }
  0xd5   : > { %1883 = vmatpush1.bf16.msra.mxu0 %v1882_v6  ;;  %1693 = vmatprep.subr.bf16.mxu1 %v1692_v7  ;;  %v440_v6 = vld [vmem:[%s2699_s6 + $0x2a0] sm:$0xff]  ;;  %v442_v7 = vld [vmem:[%s2699_s6 + $0x2b0] sm:$0xff]  ;;  %v1916_v47 = vpack.c.bf16 %v647_v40, %v645_v39  ;;  %v459_v50 = vld [vmem:[%s2699_s6 + $0x338] sm:$0xff]  ;;  %v1918_v54 = vpack.c.bf16 %v646_v48, %v644_v46 }
  0xd6   : > { %1885 = vmatprep.subr.bf16.mxu0 %v1884_v11  ;;  %v445_v11 = vld [vmem:[%s2699_s6 + $0x2c8] sm:$0xff]  ;;  %v1714_v15 = vpack.c.bf16 %v442_v7, %v440_v6  ;;  %v651_v52 = vld [vmem:[%s2699_s6 + $0x938] sm:$0xff]  ;;  %v648_v58 = vld [vmem:[%s2699_s6 + $0x920] sm:$0xff] }
  0xd7   : > { %869 = vmatmul.mubr.f32.vlgmr.msra.gmra.mrb[0].mxu1 %v342_v17  ;;  %v1906_v17 = vpack.c.bf16 %v634_v10, %v632_v8  ;;  %v1920_v59 = vpack.c.bf16 %v651_v52, %v649_v51  ;;  %v650_v60 = vld [vmem:[%s2699_s6 + $0x930] sm:$0xff]  ;;  %v463_v62 = vld [vmem:[%s2699_s6 + $0x358] sm:$0xff]  ;;  %v653_v63 = vld [vmem:[%s2699_s6 + $0x948] sm:$0xff] }
  0xd8   : > { %1695 = vmatpush1.bf16.msra.mxu1 %v1694_v18  ;;  %1082 = vmatmul.mubr.f32.vlgmr.msra.gmra.mrb[0].mxu0 %v348_v19  ;;  %v1716_v18 = vpack.c.bf16 %v447_v12, %v445_v11  ;;  %v446_v19 = vld [vmem:[%s2699_s6 + $0x2d0] sm:$0xff]  ;;  %v655_v0 = vld [vmem:[%s2699_s6 + $0x958] sm:$0xff]  ;;  %v1922_v2 = vpack.c.bf16 %v650_v60, %v648_v58  ;;  %v652_v6 = vld [vmem:[%s2699_s6 + $0x940] sm:$0xff] }
  0xd9   : > { %1887 = vmatpush1.bf16.msra.mxu0 %v1886_v20  ;;  %1697 = vmatprep.subr.bf16.mxu1 %v1696_v21  ;;  %v636_v20 = vld [vmem:[%s2699_s6 + $0x8c0] sm:$0xff]  ;;  %v638_v21 = vld [vmem:[%s2699_s6 + $0x8d0] sm:$0xff]  ;;  %v1718_v29 = vpack.c.bf16 %v446_v19, %v444_v16  ;;  %v1924_v7 = vpack.c.bf16 %v655_v0, %v653_v63  ;;  %v467_v10 = vld [vmem:[%s2699_s6 + $0x378] sm:$0xff] }
  0xda   : > { %1889 = vmatprep.subr.bf16.mxu0 %v1888_v25  ;;  %v345_v25 = vld [vmem:[%s2726_s18 + $0x18] sm:$0xff]  ;;  %1152 = vmatprep.mubr.f32.mxu0 %v351_v28  ;;  %v1910_v30 = vpack.c.bf16 %v638_v21, %v636_v20  ;;  %v654_v8 = vld [vmem:[%s2699_s6 + $0x950] sm:$0xff]  ;;  %v659_v12 = vld [vmem:[%s2699_s6 + $0x978] sm:$0xff] }
  0xdb   : > { %939 = vmatprep.mubr.f32.mxu1 %v345_v25  ;;  %v657_v11 = vld [vmem:[%s2699_s6 + $0x968] sm:$0xff]  ;;  %v1926_v14 = vpack.c.bf16 %v654_v8, %v652_v6  ;;  %v464_v16 = vld [vmem:[%s2699_s6 + $0x360] sm:$0xff]  ;;  %v658_v20 = vld [vmem:[%s2699_s6 + $0x970] sm:$0xff] }
  0xdc   : > { %1699 = vmatpush1.bf16.msra.mxu1 %v1698_v31  ;;  %v1720_v31 = vpack.c.bf16 %v451_v24, %v449_v23  ;;  %v1928_v19 = vpack.c.bf16 %v659_v12, %v657_v11  ;;  %v469_v21 = vld [vmem:[%s2699_s6 + $0x388] sm:$0xff]  ;;  %v663_v24 = vld [vmem:[%s2699_s6 + $0x998] sm:$0xff]  ;;  %v468_v28 = vld [vmem:[%s2699_s6 + $0x380] sm:$0xff] }
  0xdd   : > { %1891 = vmatpush1.bf16.msra.mxu0 %v1890_v32  ;;  %1701 = vmatprep.subr.bf16.mxu1 %v1700_v33  ;;  %v448_v32 = vld [vmem:[%s2699_s6 + $0x2e0] sm:$0xff]  ;;  %v450_v33 = vld [vmem:[%s2699_s6 + $0x2f0] sm:$0xff]  ;;  %v661_v23 = vld [vmem:[%s2699_s6 + $0x988] sm:$0xff] }
  0xde   : > { %1893 = vmatprep.subr.bf16.mxu0 %v1892_v37  ;;  %v453_v37 = vld [vmem:[%s2699_s6 + $0x308] sm:$0xff]  ;;  %v1722_v41 = vpack.c.bf16 %v450_v33, %v448_v32  ;;  %v662_v32 = vld [vmem:[%s2699_s6 + $0x990] sm:$0xff]  ;;  %v475_v34 = vld [vmem:[%s2699_s6 + $0x3b8] sm:$0xff] }
  0xdf   : > { %v473_v33 = vld [vmem:[%s2699_s6 + $0x3a8] sm:$0xff]  ;;  %v667_v36 = vld [vmem:[%s2699_s6 + $0x9b8] sm:$0xff]  ;;  %v472_v40 = vld [vmem:[%s2699_s6 + $0x3a0] sm:$0xff] }
  0xe0   : > { %1703 = vmatpush1.bf16.msra.mxu1 %v1702_v43  ;;  %v1724_v43 = vpack.c.bf16 %v455_v38, %v453_v37  ;;  %v1744_v39 = vpack.c.bf16 %v475_v34, %v473_v33  ;;  %v479_v46 = vld [vmem:[%s2699_s6 + $0x3d8] sm:$0xff]  ;;  %v476_v52 = vld [vmem:[%s2699_s6 + $0x3c0] sm:$0xff]  ;;  %v685_v33 = vld [vmem:[%s2699_s6 + $0xa48] sm:$0xff] }
  0xe1   : > { %1895 = vmatpush1.bf16.msra.mxu0 %v1894_v44  ;;  %1705 = vmatprep.subr.bf16.mxu1 %v1704_v45  ;;  %v452_v44 = vld [vmem:[%s2699_s6 + $0x300] sm:$0xff]  ;;  %v454_v45 = vld [vmem:[%s2699_s6 + $0x310] sm:$0xff]  ;;  %v671_v48 = vld [vmem:[%s2699_s6 + $0x9d8] sm:$0xff] }
  0xe2   : > { %1897 = vmatprep.subr.bf16.mxu0 %v1896_v49  ;;  %v457_v49 = vld [vmem:[%s2699_s6 + $0x328] sm:$0xff]  ;;  %v1726_v53 = vpack.c.bf16 %v454_v45, %v452_v44  ;;  %v666_v44 = vld [vmem:[%s2699_s6 + $0x9b0] sm:$0xff]  ;;  %v483_v58 = vld [vmem:[%s2699_s6 + $0x3f8] sm:$0xff] }
  0xe3   : > { %v477_v45 = vld [vmem:[%s2699_s6 + $0x3c8] sm:$0xff]  ;;  %v675_v60 = vld [vmem:[%s2699_s6 + $0x9f8] sm:$0xff]  ;;  %v480_v0 = vld [vmem:[%s2699_s6 + $0x3e0] sm:$0xff] }
  0xe4   : > { %1707 = vmatpush1.bf16.msra.mxu1 %v1706_v55  ;;  %v1728_v55 = vpack.c.bf16 %v459_v50, %v457_v49  ;;  %v1748_v51 = vpack.c.bf16 %v479_v46, %v477_v45  ;;  %v487_v6 = vld [vmem:[%s2699_s6 + $0x418] sm:$0xff]  ;;  %v484_v12 = vld [vmem:[%s2699_s6 + $0x400] sm:$0xff]  ;;  %v497_v45 = vld [vmem:[%s2699_s6 + $0x468] sm:$0xff] }
  0xe5   : > { %1899 = vmatpush1.bf16.msra.mxu0 %v1898_v56  ;;  %1709 = vmatprep.subr.bf16.mxu1 %v1708_v57  ;;  %v456_v56 = vld [vmem:[%s2699_s6 + $0x320] sm:$0xff]  ;;  %v458_v57 = vld [vmem:[%s2699_s6 + $0x330] sm:$0xff]  ;;  %v679_v8 = vld [vmem:[%s2699_s6 + $0xa18] sm:$0xff] }
  0xe6   : > { %1901 = vmatprep.subr.bf16.mxu0 %v1900_v61  ;;  %v461_v61 = vld [vmem:[%s2699_s6 + $0x348] sm:$0xff]  ;;  %v1730_v1 = vpack.c.bf16 %v458_v57, %v456_v56  ;;  %v670_v56 = vld [vmem:[%s2699_s6 + $0x9d0] sm:$0xff]  ;;  %v687_v34 = vld [vmem:[%s2699_s6 + $0xa58] sm:$0xff] }
  0xe7   : > { %v481_v57 = vld [vmem:[%s2699_s6 + $0x3e8] sm:$0xff]  ;;  %v499_v46 = vld [vmem:[%s2699_s6 + $0x478] sm:$0xff] }
  0xe8   : > { %1711 = vmatpush1.bf16.msra.mxu1 %v1710_v3  ;;  %v1732_v3 = vpack.c.bf16 %v463_v62, %v461_v61  ;;  %v1752_v63 = vpack.c.bf16 %v483_v58, %v481_v57  ;;  %v501_v57 = vld [vmem:[%s2699_s6 + $0x488] sm:$0xff]  ;;  %v503_v58 = vld [vmem:[%s2699_s6 + $0x498] sm:$0xff] }
  0xe9   : > { %1903 = vmatpush1.bf16.msra.mxu0 %v1902_v4  ;;  %1713 = vmatprep.subr.bf16.mxu1 %v1712_v5  ;;  %v460_v4 = vld [vmem:[%s2699_s6 + $0x340] sm:$0xff]  ;;  %v462_v5 = vld [vmem:[%s2699_s6 + $0x350] sm:$0xff] }
  0xea   : > { %1905 = vmatprep.subr.bf16.mxu0 %v1904_v9  ;;  %v465_v9 = vld [vmem:[%s2699_s6 + $0x368] sm:$0xff]  ;;  %v1734_v13 = vpack.c.bf16 %v462_v5, %v460_v4  ;;  %v674_v4 = vld [vmem:[%s2699_s6 + $0x9f0] sm:$0xff] }
  0xeb   : > { %v485_v5 = vld [vmem:[%s2699_s6 + $0x408] sm:$0xff] }
  0xec   : > { %1715 = vmatpush1.bf16.msra.mxu1 %v1714_v15  ;;  %v1736_v15 = vpack.c.bf16 %v467_v10, %v465_v9  ;;  %v1756_v11 = vpack.c.bf16 %v487_v6, %v485_v5  ;;  %v505_v5 = vld [vmem:[%s2699_s6 + $0x4a8] sm:$0xff]  ;;  %v507_v6 = vld [vmem:[%s2699_s6 + $0x4b8] sm:$0xff] }
  0xed   : > { %1907 = vmatpush1.bf16.msra.mxu0 %v1906_v17  ;;  %1717 = vmatprep.subr.bf16.mxu1 %v1716_v18  ;;  %v466_v17 = vld [vmem:[%s2699_s6 + $0x370] sm:$0xff]  ;;  %v656_v18 = vld [vmem:[%s2699_s6 + $0x960] sm:$0xff] }
  0xee   : > { %1909 = vmatprep.subr.bf16.mxu0 %v1908_v22  ;;  %v471_v22 = vld [vmem:[%s2699_s6 + $0x398] sm:$0xff]  ;;  %v1738_v25 = vpack.c.bf16 %v466_v17, %v464_v16  ;;  %v1930_v26 = vpack.c.bf16 %v658_v20, %v656_v18  ;;  %v678_v16 = vld [vmem:[%s2699_s6 + $0xa10] sm:$0xff]  ;;  %v489_v17 = vld [vmem:[%s2699_s6 + $0x428] sm:$0xff] }
  0xef   : > { %v1740_v27 = vpack.c.bf16 %v471_v22, %v469_v21  ;;  %v491_v18 = vld [vmem:[%s2699_s6 + $0x438] sm:$0xff]  ;;  %v344_v21 = vld [vmem:[%s2726_s18 + $0x10] sm:$0xff] }
  0xf0   : > { %1719 = vmatpush1.bf16.msra.mxu1 %v1718_v29  ;;  %v470_v29 = vld [vmem:[%s2699_s6 + $0x390] sm:$0xff]  ;;  %v683_v20 = vld [vmem:[%s2699_s6 + $0xa38] sm:$0xff] }
  0xf1   : > { %1911 = vmatpush1.bf16.msra.mxu0 %v1910_v30  ;;  %1721 = vmatprep.subr.bf16.mxu1 %v1720_v31  ;;  %v660_v30 = vld [vmem:[%s2699_s6 + $0x980] sm:$0xff]  ;;  %v1932_v31 = vpack.c.bf16 %v663_v24, %v661_v23  ;;  %v1742_v37 = vpack.c.bf16 %v470_v29, %v468_v28  ;;  %v350_v23 = vld [vmem:[%s2726_s18 + $0x40] sm:$0xff] }
  0xf2   : > { %1913 = vmatprep.subr.bf16.mxu0 %v1912_v35  ;;  %v665_v35 = vld [vmem:[%s2699_s6 + $0x9a8] sm:$0xff]  ;;  %v1934_v38 = vpack.c.bf16 %v662_v32, %v660_v30  ;;  %v680_v28 = vld [vmem:[%s2699_s6 + $0xa20] sm:$0xff]  ;;  %v682_v30 = vld [vmem:[%s2699_s6 + $0xa30] sm:$0xff] }
  0xf3   : > { %v495_v32 = vld [vmem:[%s2699_s6 + $0x458] sm:$0xff] }
  0xf4   : > { %1723 = vmatpush1.bf16.msra.mxu1 %v1722_v41  ;;  %v474_v41 = vld [vmem:[%s2699_s6 + $0x3b0] sm:$0xff] }
  0xf5   : > { %1915 = vmatpush1.bf16.msra.mxu0 %v1914_v42  ;;  %1725 = vmatprep.subr.bf16.mxu1 %v1724_v43  ;;  %v664_v42 = vld [vmem:[%s2699_s6 + $0x9a0] sm:$0xff]  ;;  %v1936_v43 = vpack.c.bf16 %v667_v36, %v665_v35  ;;  %v1746_v49 = vpack.c.bf16 %v474_v41, %v472_v40  ;;  %v347_v35 = vld [vmem:[%s2726_s18 + $0x28] sm:$0xff]  ;;  %v494_v41 = vld [vmem:[%s2699_s6 + $0x450] sm:$0xff] }
  0xf6   : > { %1917 = vmatprep.subr.bf16.mxu0 %v1916_v47  ;;  %v669_v47 = vld [vmem:[%s2699_s6 + $0x9c8] sm:$0xff]  ;;  %v1938_v50 = vpack.c.bf16 %v666_v44, %v664_v42  ;;  %v492_v40 = vld [vmem:[%s2699_s6 + $0x440] sm:$0xff]  ;;  %v686_v44 = vld [vmem:[%s2699_s6 + $0xa50] sm:$0xff] }
  0xf7   : > { %v684_v42 = vld [vmem:[%s2699_s6 + $0xa40] sm:$0xff] }
  0xf8   : > { %1727 = vmatpush1.bf16.msra.mxu1 %v1726_v53  ;;  %v478_v53 = vld [vmem:[%s2699_s6 + $0x3d0] sm:$0xff] }
  0xf9   : > { %1919 = vmatpush1.bf16.msra.mxu0 %v1918_v54  ;;  %1729 = vmatprep.subr.bf16.mxu1 %v1728_v55  ;;  %v668_v54 = vld [vmem:[%s2699_s6 + $0x9c0] sm:$0xff]  ;;  %v1940_v55 = vpack.c.bf16 %v671_v48, %v669_v47  ;;  %v1750_v61 = vpack.c.bf16 %v478_v53, %v476_v52  ;;  %v689_v47 = vld [vmem:[%s2699_s6 + $0xa68] sm:$0xff]  ;;  %v691_v48 = vld [vmem:[%s2699_s6 + $0xa78] sm:$0xff] }
  0xfa   : > { %1921 = vmatprep.subr.bf16.mxu0 %v1920_v59  ;;  %v673_v59 = vld [vmem:[%s2699_s6 + $0x9e8] sm:$0xff]  ;;  %v1942_v62 = vpack.c.bf16 %v670_v56, %v668_v54  ;;  %v496_v52 = vld [vmem:[%s2699_s6 + $0x460] sm:$0xff]  ;;  %v498_v53 = vld [vmem:[%s2699_s6 + $0x470] sm:$0xff] }
  0xfb   : > { %v688_v54 = vld [vmem:[%s2699_s6 + $0xa60] sm:$0xff]  ;;  %v690_v56 = vld [vmem:[%s2699_s6 + $0xa70] sm:$0xff] }
  0xfc   : > { %1731 = vmatpush1.bf16.msra.mxu1 %v1730_v1  ;;  %v482_v1 = vld [vmem:[%s2699_s6 + $0x3f0] sm:$0xff] }
  0xfd   : > { %1923 = vmatpush1.bf16.msra.mxu0 %v1922_v2  ;;  %1733 = vmatprep.subr.bf16.mxu1 %v1732_v3  ;;  %v672_v2 = vld [vmem:[%s2699_s6 + $0x9e0] sm:$0xff]  ;;  %v1944_v3 = vpack.c.bf16 %v675_v60, %v673_v59  ;;  %v1754_v9 = vpack.c.bf16 %v482_v1, %v480_v0  ;;  %v693_v59 = vld [vmem:[%s2699_s6 + $0xa88] sm:$0xff]  ;;  %v695_v60 = vld [vmem:[%s2699_s6 + $0xa98] sm:$0xff] }
  0xfe   : > { %1925 = vmatprep.subr.bf16.mxu0 %v1924_v7  ;;  %v677_v7 = vld [vmem:[%s2699_s6 + $0xa08] sm:$0xff]  ;;  %v1946_v10 = vpack.c.bf16 %v674_v4, %v672_v2  ;;  %v500_v0 = vld [vmem:[%s2699_s6 + $0x480] sm:$0xff]  ;;  %v502_v1 = vld [vmem:[%s2699_s6 + $0x490] sm:$0xff] }
  0xff   : > { %v692_v2 = vld [vmem:[%s2699_s6 + $0xa80] sm:$0xff]  ;;  %v694_v4 = vld [vmem:[%s2699_s6 + $0xa90] sm:$0xff] }
 0x100   : > { %1735 = vmatpush1.bf16.msra.mxu1 %v1734_v13  ;;  %v486_v13 = vld [vmem:[%s2699_s6 + $0x410] sm:$0xff] }
 0x101   : > { %1927 = vmatpush1.bf16.msra.mxu0 %v1926_v14  ;;  %1737 = vmatprep.subr.bf16.mxu1 %v1736_v15  ;;  %v676_v14 = vld [vmem:[%s2699_s6 + $0xa00] sm:$0xff]  ;;  %v1948_v15 = vpack.c.bf16 %v679_v8, %v677_v7  ;;  %v1758_v22 = vpack.c.bf16 %v486_v13, %v484_v12  ;;  %v697_v7 = vld [vmem:[%s2699_s6 + $0xaa8] sm:$0xff]  ;;  %v699_v8 = vld [vmem:[%s2699_s6 + $0xab8] sm:$0xff] }
 0x102   : > { %1929 = vmatprep.subr.bf16.mxu0 %v1928_v19  ;;  %v681_v19 = vld [vmem:[%s2699_s6 + $0xa28] sm:$0xff]  ;;  %v1950_v24 = vpack.c.bf16 %v678_v16, %v676_v14  ;;  %v504_v12 = vld [vmem:[%s2699_s6 + $0x4a0] sm:$0xff]  ;;  %v506_v13 = vld [vmem:[%s2699_s6 + $0x4b0] sm:$0xff] }
 0x103   : > { %v1952_v29 = vpack.c.bf16 %v683_v20, %v681_v19  ;;  %v696_v14 = vld [vmem:[%s2699_s6 + $0xaa0] sm:$0xff]  ;;  %v698_v16 = vld [vmem:[%s2699_s6 + $0xab0] sm:$0xff]  ;;  %v701_v19 = vld [vmem:[%s2699_s6 + $0xac8] sm:$0xff] }
 0x104   : > { %1739 = vmatpush1.bf16.msra.mxu1 %v1738_v25  ;;  %v1760_v25 = vpack.c.bf16 %v491_v18, %v489_v17  ;;  %v509_v17 = vld [vmem:[%s2699_s6 + $0x4c8] sm:$0xff]  ;;  %v511_v18 = vld [vmem:[%s2699_s6 + $0x4d8] sm:$0xff] }
 0x105   : > { %1931 = vmatpush1.bf16.msra.mxu0 %v1930_v26  ;;  %1741 = vmatprep.subr.bf16.mxu1 %v1740_v27  ;;  %v488_v26 = vld [vmem:[%s2699_s6 + $0x420] sm:$0xff]  ;;  %v490_v27 = vld [vmem:[%s2699_s6 + $0x430] sm:$0xff]  ;;  %v703_v20 = vld [vmem:[%s2699_s6 + $0xad8] sm:$0xff] }
 0x106   : > { %1933 = vmatprep.subr.bf16.mxu0 %v1932_v31  ;;  %v493_v31 = vld [vmem:[%s2699_s6 + $0x448] sm:$0xff]  ;;  %v1762_v36 = vpack.c.bf16 %v490_v27, %v488_v26  ;;  %v700_v26 = vld [vmem:[%s2699_s6 + $0xac0] sm:$0xff]  ;;  %v1972_v27 = vpack.c.bf16 %v703_v20, %v701_v19 }
 0x107   : > { %v528_v20 = vld [vmem:[%s2699_s6 + $0x560] sm:$0xff] }
 0x108   : > { %1743 = vmatpush1.bf16.msra.mxu1 %v1742_v37  ;;  %v353_v37 = vld [vmem:[%s2726_s18 + $0x58] sm:$0xff] }
 0x109   : > { %1935 = vmatpush1.bf16.msra.mxu0 %v1934_v38  ;;  %1745 = vmatprep.subr.bf16.mxu1 %v1744_v39  ;;  %v1954_v38 = vpack.c.bf16 %v682_v30, %v680_v28  ;;  %v1764_v39 = vpack.c.bf16 %v495_v32, %v493_v31  ;;  %v702_v28 = vld [vmem:[%s2699_s6 + $0xad0] sm:$0xff]  ;;  %v515_v30 = vld [vmem:[%s2699_s6 + $0x4f8] sm:$0xff]  ;;  %v705_v31 = vld [vmem:[%s2699_s6 + $0xae8] sm:$0xff] }
 0x10a   : > { %1937 = vmatprep.subr.bf16.mxu0 %v1936_v43  ;;  %v1956_v43 = vpack.c.bf16 %v687_v34, %v685_v33  ;;  %v707_v32 = vld [vmem:[%s2699_s6 + $0xaf8] sm:$0xff]  ;;  %v1974_v34 = vpack.c.bf16 %v702_v28, %v700_v26 }
 0x10b   : > { %v535_v26 = vld [vmem:[%s2699_s6 + $0x598] sm:$0xff] }
 0x10c   : > { %1747 = vmatpush1.bf16.msra.mxu1 %v1746_v49  ;;  %v1766_v49 = vpack.c.bf16 %v494_v41, %v492_v40  ;;  %v706_v40 = vld [vmem:[%s2699_s6 + $0xaf0] sm:$0xff]  ;;  %v517_v41 = vld [vmem:[%s2699_s6 + $0x508] sm:$0xff]  ;;  %v727_v28 = vld [vmem:[%s2699_s6 + $0xb98] sm:$0xff] }
 0x10d   : > { %1939 = vmatpush1.bf16.msra.mxu0 %v1938_v50  ;;  %1749 = vmatprep.subr.bf16.mxu1 %v1748_v51  ;;  %v1958_v50 = vpack.c.bf16 %v686_v44, %v684_v42  ;;  %v1768_v51 = vpack.c.bf16 %v499_v46, %v497_v45  ;;  %v519_v42 = vld [vmem:[%s2699_s6 + $0x518] sm:$0xff] }
 0x10e   : > { %1941 = vmatprep.subr.bf16.mxu0 %v1940_v55  ;;  %v1960_v55 = vpack.c.bf16 %v691_v48, %v689_v47  ;;  %v711_v44 = vld [vmem:[%s2699_s6 + $0xb18] sm:$0xff]  ;;  %v1788_v47 = vpack.c.bf16 %v519_v42, %v517_v41  ;;  %v516_v48 = vld [vmem:[%s2699_s6 + $0x500] sm:$0xff] }
 0x110   : > { %1751 = vmatpush1.bf16.msra.mxu1 %v1750_v61  ;;  %v1770_v61 = vpack.c.bf16 %v498_v53, %v496_v52  ;;  %v710_v52 = vld [vmem:[%s2699_s6 + $0xb10] sm:$0xff]  ;;  %v521_v53 = vld [vmem:[%s2699_s6 + $0x528] sm:$0xff] }
 0x111   : > { %1943 = vmatpush1.bf16.msra.mxu0 %v1942_v62  ;;  %1753 = vmatprep.subr.bf16.mxu1 %v1752_v63  ;;  %v1962_v62 = vpack.c.bf16 %v690_v56, %v688_v54  ;;  %v1772_v63 = vpack.c.bf16 %v503_v58, %v501_v57  ;;  %v523_v54 = vld [vmem:[%s2699_s6 + $0x538] sm:$0xff] }
 0x112   : > { %1945 = vmatprep.subr.bf16.mxu0 %v1944_v3  ;;  %v1964_v3 = vpack.c.bf16 %v695_v60, %v693_v59  ;;  %v715_v56 = vld [vmem:[%s2699_s6 + $0xb38] sm:$0xff]  ;;  %v1792_v59 = vpack.c.bf16 %v523_v54, %v521_v53  ;;  %v520_v60 = vld [vmem:[%s2699_s6 + $0x520] sm:$0xff] }
 0x114   : > { %1755 = vmatpush1.bf16.msra.mxu1 %v1754_v9  ;;  %v1774_v9 = vpack.c.bf16 %v502_v1, %v500_v0  ;;  %v714_v0 = vld [vmem:[%s2699_s6 + $0xb30] sm:$0xff]  ;;  %v525_v1 = vld [vmem:[%s2699_s6 + $0x548] sm:$0xff] }
 0x115   : > { %1947 = vmatpush1.bf16.msra.mxu0 %v1946_v10  ;;  %1757 = vmatprep.subr.bf16.mxu1 %v1756_v11  ;;  %v1966_v10 = vpack.c.bf16 %v694_v4, %v692_v2  ;;  %v1776_v11 = vpack.c.bf16 %v507_v6, %v505_v5  ;;  %v527_v2 = vld [vmem:[%s2699_s6 + $0x558] sm:$0xff] }
 0x116   : > { %1949 = vmatprep.subr.bf16.mxu0 %v1948_v15  ;;  %v1968_v15 = vpack.c.bf16 %v699_v8, %v697_v7  ;;  %v719_v4 = vld [vmem:[%s2699_s6 + $0xb58] sm:$0xff]  ;;  %v1796_v7 = vpack.c.bf16 %v527_v2, %v525_v1  ;;  %v524_v8 = vld [vmem:[%s2699_s6 + $0x540] sm:$0xff] }
 0x117   : > { %940 = vmatmul.mubr.f32.vlgmr.msra.gmra.mrb[0].mxu1 %v344_v21  ;;  %v1778_v21 = vpack.c.bf16 %v506_v13, %v504_v12  ;;  %v718_v12 = vld [vmem:[%s2699_s6 + $0xb50] sm:$0xff]  ;;  %v529_v13 = vld [vmem:[%s2699_s6 + $0x568] sm:$0xff] }
 0x118   : > { %1759 = vmatpush1.bf16.msra.mxu1 %v1758_v22  ;;  %1153 = vmatmul.mubr.f32.vlgmr.msra.gmra.mrb[0].mxu0 %v350_v23  ;;  %v1970_v22 = vpack.c.bf16 %v698_v16, %v696_v14  ;;  %v1780_v23 = vpack.c.bf16 %v511_v18, %v509_v17  ;;  %v531_v14 = vld [vmem:[%s2699_s6 + $0x578] sm:$0xff] }
 0x119   : > { %1951 = vmatpush1.bf16.msra.mxu0 %v1950_v24  ;;  %1761 = vmatprep.subr.bf16.mxu1 %v1760_v25  ;;  %v508_v24 = vld [vmem:[%s2699_s6 + $0x4c0] sm:$0xff]  ;;  %v510_v25 = vld [vmem:[%s2699_s6 + $0x4d0] sm:$0xff]  ;;  %v723_v16 = vld [vmem:[%s2699_s6 + $0xb78] sm:$0xff]  ;;  %v1800_v19 = vpack.c.bf16 %v531_v14, %v529_v13 }
 0x11a   : > { %1953 = vmatprep.subr.bf16.mxu0 %v1952_v29  ;;  %1010 = vmatprep.mubr.f32.mxu1 %v347_v35  ;;  %v513_v29 = vld [vmem:[%s2699_s6 + $0x4e8] sm:$0xff]  ;;  %v1782_v33 = vpack.c.bf16 %v510_v25, %v508_v24  ;;  %v722_v24 = vld [vmem:[%s2699_s6 + $0xb70] sm:$0xff]  ;;  %v740_v14 = vld [vmem:[%s2699_s6 + $0xc00] sm:$0xff] }
 0x11b   : > { %1223 = vmatprep.mubr.f32.mxu0 %v353_v37  ;;  %v1784_v35 = vpack.c.bf16 %v515_v30, %v513_v29  ;;  %v514_v37 = vld [vmem:[%s2699_s6 + $0x4f0] sm:$0xff]  ;;  %v533_v25 = vld [vmem:[%s2699_s6 + $0x588] sm:$0xff] }
 0x11c   : > { %1763 = vmatpush1.bf16.msra.mxu1 %v1762_v36  ;;  %v512_v36 = vld [vmem:[%s2699_s6 + $0x4e0] sm:$0xff] }
 0x11d   : > { %1955 = vmatpush1.bf16.msra.mxu0 %v1954_v38  ;;  %1765 = vmatprep.subr.bf16.mxu1 %v1764_v39  ;;  %v704_v38 = vld [vmem:[%s2699_s6 + $0xae0] sm:$0xff]  ;;  %v1976_v39 = vpack.c.bf16 %v707_v32, %v705_v31  ;;  %v1786_v45 = vpack.c.bf16 %v514_v37, %v512_v36  ;;  %v1804_v31 = vpack.c.bf16 %v535_v26, %v533_v25  ;;  %v726_v36 = vld [vmem:[%s2699_s6 + $0xb90] sm:$0xff]  ;;  %v537_v37 = vld [vmem:[%s2699_s6 + $0x5a8] sm:$0xff] }
 0x11e   : > { %1957 = vmatprep.subr.bf16.mxu0 %v1956_v43  ;;  %v709_v43 = vld [vmem:[%s2699_s6 + $0xb08] sm:$0xff]  ;;  %v1978_v46 = vpack.c.bf16 %v706_v40, %v704_v38  ;;  %v532_v32 = vld [vmem:[%s2699_s6 + $0x580] sm:$0xff]  ;;  %v539_v38 = vld [vmem:[%s2699_s6 + $0x5b8] sm:$0xff] }
 0x11f   : > { %v731_v40 = vld [vmem:[%s2699_s6 + $0xbb8] sm:$0xff]  ;;  %v749_v25 = vld [vmem:[%s2699_s6 + $0xc48] sm:$0xff] }
 0x120   : > { %1767 = vmatpush1.bf16.msra.mxu1 %v1766_v49  ;;  %v518_v49 = vld [vmem:[%s2699_s6 + $0x510] sm:$0xff]  ;;  %v751_v26 = vld [vmem:[%s2699_s6 + $0xc58] sm:$0xff] }
 0x121   : > { %1959 = vmatpush1.bf16.msra.mxu0 %v1958_v50  ;;  %1769 = vmatprep.subr.bf16.mxu1 %v1768_v51  ;;  %v708_v50 = vld [vmem:[%s2699_s6 + $0xb00] sm:$0xff]  ;;  %v1980_v51 = vpack.c.bf16 %v711_v44, %v709_v43  ;;  %v1790_v57 = vpack.c.bf16 %v518_v49, %v516_v48  ;;  %v1808_v43 = vpack.c.bf16 %v539_v38, %v537_v37  ;;  %v730_v48 = vld [vmem:[%s2699_s6 + $0xbb0] sm:$0xff]  ;;  %v541_v49 = vld [vmem:[%s2699_s6 + $0x5c8] sm:$0xff] }
 0x122   : > { %1961 = vmatprep.subr.bf16.mxu0 %v1960_v55  ;;  %v713_v55 = vld [vmem:[%s2699_s6 + $0xb28] sm:$0xff]  ;;  %v1982_v58 = vpack.c.bf16 %v710_v52, %v708_v50  ;;  %v536_v44 = vld [vmem:[%s2699_s6 + $0x5a0] sm:$0xff]  ;;  %v543_v50 = vld [vmem:[%s2699_s6 + $0x5d8] sm:$0xff] }
 0x123   : > { %v735_v52 = vld [vmem:[%s2699_s6 + $0xbd8] sm:$0xff]  ;;  %v757_v37 = vld [vmem:[%s2699_s6 + $0xc88] sm:$0xff] }
 0x124   : > { %1771 = vmatpush1.bf16.msra.mxu1 %v1770_v61  ;;  %v522_v61 = vld [vmem:[%s2699_s6 + $0x530] sm:$0xff]  ;;  %v759_v38 = vld [vmem:[%s2699_s6 + $0xc98] sm:$0xff] }
 0x125   : > { %1963 = vmatpush1.bf16.msra.mxu0 %v1962_v62  ;;  %1773 = vmatprep.subr.bf16.mxu1 %v1772_v63  ;;  %v712_v62 = vld [vmem:[%s2699_s6 + $0xb20] sm:$0xff]  ;;  %v1984_v63 = vpack.c.bf16 %v715_v56, %v713_v55  ;;  %v1794_v5 = vpack.c.bf16 %v522_v61, %v520_v60  ;;  %v1812_v55 = vpack.c.bf16 %v543_v50, %v541_v49  ;;  %v734_v60 = vld [vmem:[%s2699_s6 + $0xbd0] sm:$0xff]  ;;  %v545_v61 = vld [vmem:[%s2699_s6 + $0x5e8] sm:$0xff] }
 0x126   : > { %1965 = vmatprep.subr.bf16.mxu0 %v1964_v3  ;;  %v717_v3 = vld [vmem:[%s2699_s6 + $0xb48] sm:$0xff]  ;;  %v1986_v6 = vpack.c.bf16 %v714_v0, %v712_v62  ;;  %v540_v56 = vld [vmem:[%s2699_s6 + $0x5c0] sm:$0xff]  ;;  %v547_v62 = vld [vmem:[%s2699_s6 + $0x5f8] sm:$0xff] }
 0x127   : > { %v739_v0 = vld [vmem:[%s2699_s6 + $0xbf8] sm:$0xff]  ;;  %v765_v49 = vld [vmem:[%s2699_s6 + $0xcc8] sm:$0xff] }
 0x128   : > { %1775 = vmatpush1.bf16.msra.mxu1 %v1774_v9  ;;  %v526_v9 = vld [vmem:[%s2699_s6 + $0x550] sm:$0xff]  ;;  %v767_v50 = vld [vmem:[%s2699_s6 + $0xcd8] sm:$0xff] }
 0x129   : > { %1967 = vmatpush1.bf16.msra.mxu0 %v1966_v10  ;;  %1777 = vmatprep.subr.bf16.mxu1 %v1776_v11  ;;  %v716_v10 = vld [vmem:[%s2699_s6 + $0xb40] sm:$0xff]  ;;  %v1988_v11 = vpack.c.bf16 %v719_v4, %v717_v3  ;;  %v1798_v17 = vpack.c.bf16 %v526_v9, %v524_v8  ;;  %v1816_v3 = vpack.c.bf16 %v547_v62, %v545_v61  ;;  %v738_v8 = vld [vmem:[%s2699_s6 + $0xbf0] sm:$0xff]  ;;  %v741_v9 = vld [vmem:[%s2699_s6 + $0xc08] sm:$0xff] }
 0x12a   : > { %1969 = vmatprep.subr.bf16.mxu0 %v1968_v15  ;;  %v721_v15 = vld [vmem:[%s2699_s6 + $0xb68] sm:$0xff]  ;;  %v1990_v18 = vpack.c.bf16 %v718_v12, %v716_v10  ;;  %v544_v4 = vld [vmem:[%s2699_s6 + $0x5e0] sm:$0xff]  ;;  %v743_v10 = vld [vmem:[%s2699_s6 + $0xc18] sm:$0xff] }
 0x12b   : > { %v2012_v13 = vpack.c.bf16 %v743_v10, %v741_v9  ;;  %v773_v61 = vld [vmem:[%s2699_s6 + $0xd08] sm:$0xff]  ;;  %v775_v62 = vld [vmem:[%s2699_s6 + $0xd18] sm:$0xff] }
 0x12c   : > { %1779 = vmatpush1.bf16.msra.mxu1 %v1778_v21  ;;  %v530_v21 = vld [vmem:[%s2699_s6 + $0x570] sm:$0xff]  ;;  %v781_v9 = vld [vmem:[%s2699_s6 + $0xd48] sm:$0xff]  ;;  %v783_v10 = vld [vmem:[%s2699_s6 + $0xd58] sm:$0xff] }
 0x12d   : > { %1971 = vmatpush1.bf16.msra.mxu0 %v1970_v22  ;;  %1781 = vmatprep.subr.bf16.mxu1 %v1780_v23  ;;  %v720_v22 = vld [vmem:[%s2699_s6 + $0xb60] sm:$0xff]  ;;  %v1992_v23 = vpack.c.bf16 %v723_v16, %v721_v15  ;;  %v1802_v29 = vpack.c.bf16 %v530_v21, %v528_v20  ;;  %v742_v15 = vld [vmem:[%s2699_s6 + $0xc10] sm:$0xff]  ;;  %v745_v16 = vld [vmem:[%s2699_s6 + $0xc28] sm:$0xff] }
 0x12e   : > { %1973 = vmatprep.subr.bf16.mxu0 %v1972_v27  ;;  %v725_v27 = vld [vmem:[%s2699_s6 + $0xb88] sm:$0xff]  ;;  %v1994_v30 = vpack.c.bf16 %v722_v24, %v720_v22  ;;  %v2014_v20 = vpack.c.bf16 %v742_v15, %v740_v14  ;;  %v744_v22 = vld [vmem:[%s2699_s6 + $0xc20] sm:$0xff]  ;;  %v355_v24 = vld [vmem:[%s2726_s18 + $0x68] sm:$0xff] }
 0x12f   : > { %v782_v14 = vld [vmem:[%s2699_s6 + $0xd50] sm:$0xff]  ;;  %v785_v15 = vld [vmem:[%s2699_s6 + $0xd68] sm:$0xff] }
 0x130   : > { %1783 = vmatpush1.bf16.msra.mxu1 %v1782_v33  ;;  %v534_v33 = vld [vmem:[%s2699_s6 + $0x590] sm:$0xff] }
 0x131   : > { %1975 = vmatpush1.bf16.msra.mxu0 %v1974_v34  ;;  %1785 = vmatprep.subr.bf16.mxu1 %v1784_v35  ;;  %v724_v34 = vld [vmem:[%s2699_s6 + $0xb80] sm:$0xff]  ;;  %v1996_v35 = vpack.c.bf16 %v727_v28, %v725_v27  ;;  %v1806_v41 = vpack.c.bf16 %v534_v33, %v532_v32  ;;  %v2020_v28 = vpack.c.bf16 %v751_v26, %v749_v25  ;;  %v755_v32 = vld [vmem:[%s2699_s6 + $0xc78] sm:$0xff]  ;;  %v790_v26 = vld [vmem:[%s2699_s6 + $0xd90] sm:$0xff] }
 0x132   : > { %1977 = vmatprep.subr.bf16.mxu0 %v1976_v39  ;;  %v729_v39 = vld [vmem:[%s2699_s6 + $0xba8] sm:$0xff]  ;;  %v1998_v42 = vpack.c.bf16 %v726_v36, %v724_v34  ;;  %v754_v36 = vld [vmem:[%s2699_s6 + $0xc70] sm:$0xff]  ;;  %v788_v25 = vld [vmem:[%s2699_s6 + $0xd80] sm:$0xff] }
 0x134   : > { %1787 = vmatpush1.bf16.msra.mxu1 %v1786_v45  ;;  %v538_v45 = vld [vmem:[%s2699_s6 + $0x5b0] sm:$0xff] }
 0x135   : > { %1979 = vmatpush1.bf16.msra.mxu0 %v1978_v46  ;;  %1789 = vmatprep.subr.bf16.mxu1 %v1788_v47  ;;  %v728_v46 = vld [vmem:[%s2699_s6 + $0xba0] sm:$0xff]  ;;  %v2000_v47 = vpack.c.bf16 %v731_v40, %v729_v39  ;;  %v1810_v53 = vpack.c.bf16 %v538_v45, %v536_v44  ;;  %v2028_v40 = vpack.c.bf16 %v759_v38, %v757_v37  ;;  %v763_v44 = vld [vmem:[%s2699_s6 + $0xcb8] sm:$0xff]  ;;  %v798_v38 = vld [vmem:[%s2699_s6 + $0xdd0] sm:$0xff] }
 0x136   : > { %1981 = vmatprep.subr.bf16.mxu0 %v1980_v51  ;;  %v733_v51 = vld [vmem:[%s2699_s6 + $0xbc8] sm:$0xff]  ;;  %v2002_v54 = vpack.c.bf16 %v730_v48, %v728_v46  ;;  %v762_v48 = vld [vmem:[%s2699_s6 + $0xcb0] sm:$0xff]  ;;  %v796_v37 = vld [vmem:[%s2699_s6 + $0xdc0] sm:$0xff] }
 0x138   : > { %1791 = vmatpush1.bf16.msra.mxu1 %v1790_v57  ;;  %v542_v57 = vld [vmem:[%s2699_s6 + $0x5d0] sm:$0xff] }
 0x139   : > { %1983 = vmatpush1.bf16.msra.mxu0 %v1982_v58  ;;  %1793 = vmatprep.subr.bf16.mxu1 %v1792_v59  ;;  %v732_v58 = vld [vmem:[%s2699_s6 + $0xbc0] sm:$0xff]  ;;  %v2004_v59 = vpack.c.bf16 %v735_v52, %v733_v51  ;;  %v1814_v1 = vpack.c.bf16 %v542_v57, %v540_v56  ;;  %v2036_v52 = vpack.c.bf16 %v767_v50, %v765_v49  ;;  %v771_v56 = vld [vmem:[%s2699_s6 + $0xcf8] sm:$0xff]  ;;  %v340_v49 = vld [vmem:[#allocation2] sm:$0xff] }
 0x13a   : > { %1985 = vmatprep.subr.bf16.mxu0 %v1984_v63  ;;  %v737_v63 = vld [vmem:[%s2699_s6 + $0xbe8] sm:$0xff]  ;;  %v2006_v2 = vpack.c.bf16 %v734_v60, %v732_v58  ;;  %v770_v60 = vld [vmem:[%s2699_s6 + $0xcf0] sm:$0xff] }
 0x13c   : > { %1795 = vmatpush1.bf16.msra.mxu1 %v1794_v5  ;;  %v546_v5 = vld [vmem:[%s2699_s6 + $0x5f0] sm:$0xff] }
 0x13d   : > { %1987 = vmatpush1.bf16.msra.mxu0 %v1986_v6  ;;  %1797 = vmatprep.subr.bf16.mxu1 %v1796_v7  ;;  %v2008_v6 = vpack.c.bf16 %v739_v0, %v737_v63  ;;  %v736_v7 = vld [vmem:[%s2699_s6 + $0xbe0] sm:$0xff]  ;;  %v2044_v0 = vpack.c.bf16 %v775_v62, %v773_v61  ;;  %v1332_v62 = vld [vmem:[%s2728_s13 + $0x8] sm:$0xff] (!%p1587_p6) }
 0x13e   : > { %1989 = vmatprep.subr.bf16.mxu0 %v1988_v11  ;;  %v1818_v11 = vpack.c.bf16 %v546_v5, %v544_v4  ;;  %v2010_v12 = vpack.c.bf16 %v738_v8, %v736_v7  ;;  %v779_v4 = vld [vmem:[%s2699_s6 + $0xd38] sm:$0xff]  ;;  %v776_v7 = vld [vmem:[%s2699_s6 + $0xd20] sm:$0xff]  ;;  %v778_v8 = vld [vmem:[%s2699_s6 + $0xd30] sm:$0xff] }
 0x140   : > { %1799 = vmatpush1.bf16.msra.mxu1 %v1798_v17  ;;  %v747_v17 = vld [vmem:[%s2699_s6 + $0xc38] sm:$0xff] }
 0x141   : > { %1991 = vmatpush1.bf16.msra.mxu0 %v1990_v18  ;;  %1801 = vmatprep.subr.bf16.mxu1 %v1800_v19  ;;  %v346_v18 = vld [vmem:[%s2726_s18 + $0x20] sm:$0xff]  ;;  %v352_v19 = vld [vmem:[%s2726_s18 + $0x50] sm:$0xff]  ;;  %v2016_v21 = vpack.c.bf16 %v747_v17, %v745_v16  ;;  %v787_v16 = vld [vmem:[%s2699_s6 + $0xd78] sm:$0xff] }
 0x142   : > { %1993 = vmatprep.subr.bf16.mxu0 %v1992_v23  ;;  %v746_v23 = vld [vmem:[%s2699_s6 + $0xc30] sm:$0xff] }
 0x143   : > { %v2018_v27 = vpack.c.bf16 %v746_v23, %v744_v22  ;;  %v791_v22 = vld [vmem:[%s2699_s6 + $0xd98] sm:$0xff] }
 0x144   : > { %1803 = vmatpush1.bf16.msra.mxu1 %v1802_v29  ;;  %v748_v29 = vld [vmem:[%s2699_s6 + $0xc40] sm:$0xff] }
 0x145   : > { %1995 = vmatpush1.bf16.msra.mxu0 %v1994_v30  ;;  %1805 = vmatprep.subr.bf16.mxu1 %v1804_v31  ;;  %v750_v30 = vld [vmem:[%s2699_s6 + $0xc50] sm:$0xff]  ;;  %v753_v31 = vld [vmem:[%s2699_s6 + $0xc68] sm:$0xff] }
 0x146   : > { %1997 = vmatprep.subr.bf16.mxu0 %v1996_v35  ;;  %v2022_v33 = vpack.c.bf16 %v750_v30, %v748_v29  ;;  %v2024_v34 = vpack.c.bf16 %v755_v32, %v753_v31  ;;  %v752_v35 = vld [vmem:[%s2699_s6 + $0xc60] sm:$0xff]  ;;  %v2062_v29 = vpack.c.bf16 %v790_v26, %v788_v25  ;;  %v794_v32 = vld [vmem:[%s2699_s6 + $0xdb0] sm:$0xff] }
 0x147   : > { %v2026_v39 = vpack.c.bf16 %v754_v36, %v752_v35  ;;  %v792_v31 = vld [vmem:[%s2699_s6 + $0xda0] sm:$0xff] }
 0x148   : > { %1807 = vmatpush1.bf16.msra.mxu1 %v1806_v41  ;;  %v756_v41 = vld [vmem:[%s2699_s6 + $0xc80] sm:$0xff]  ;;  %v2066_v35 = vpack.c.bf16 %v794_v32, %v792_v31 }
 0x149   : > { %1999 = vmatpush1.bf16.msra.mxu0 %v1998_v42  ;;  %1809 = vmatprep.subr.bf16.mxu1 %v1808_v43  ;;  %v758_v42 = vld [vmem:[%s2699_s6 + $0xc90] sm:$0xff]  ;;  %v761_v43 = vld [vmem:[%s2699_s6 + $0xca8] sm:$0xff] }
 0x14a   : > { %2001 = vmatprep.subr.bf16.mxu0 %v2000_v47  ;;  %v2030_v45 = vpack.c.bf16 %v758_v42, %v756_v41  ;;  %v2032_v46 = vpack.c.bf16 %v763_v44, %v761_v43  ;;  %v760_v47 = vld [vmem:[%s2699_s6 + $0xca0] sm:$0xff]  ;;  %v2070_v41 = vpack.c.bf16 %v798_v38, %v796_v37  ;;  %v802_v44 = vld [vmem:[%s2699_s6 + $0xdf0] sm:$0xff] }
 0x14b   : > { %v2034_v51 = vpack.c.bf16 %v762_v48, %v760_v47  ;;  %v800_v43 = vld [vmem:[%s2699_s6 + $0xde0] sm:$0xff]  ;;  %v1360_v38 = vld [vmem:[%s2728_s13 + $0xe8] sm:$0xff] (!%p1587_p6) }
 0x14c   : > { %1811 = vmatpush1.bf16.msra.mxu1 %v1810_v53  ;;  %v764_v53 = vld [vmem:[%s2699_s6 + $0xcc0] sm:$0xff] }
 0x14d   : > { %2003 = vmatpush1.bf16.msra.mxu0 %v2002_v54  ;;  %1813 = vmatprep.subr.bf16.mxu1 %v1812_v55  ;;  %v766_v54 = vld [vmem:[%s2699_s6 + $0xcd0] sm:$0xff]  ;;  %v769_v55 = vld [vmem:[%s2699_s6 + $0xce8] sm:$0xff] }
 0x14e   : > { %2005 = vmatprep.subr.bf16.mxu0 %v2004_v59  ;;  %v2038_v57 = vpack.c.bf16 %v766_v54, %v764_v53  ;;  %v2040_v58 = vpack.c.bf16 %v771_v56, %v769_v55  ;;  %v768_v59 = vld [vmem:[%s2699_s6 + $0xce0] sm:$0xff] }
 0x14f   : > { %v2042_v63 = vpack.c.bf16 %v770_v60, %v768_v59  ;;  %v1331_v59 = vld [vmem:[%s2728_s13] sm:$0xff] (!%p1587_p6)  ;;  %v1313_v60 = vlaneseq (!%p1587_p6) }
 0x150   : > { %1815 = vmatpush1.bf16.msra.mxu1 %v1814_v1  ;;  %v772_v1 = vld [vmem:[%s2699_s6 + $0xd00] sm:$0xff] }
 0x151   : > { %2007 = vmatpush1.bf16.msra.mxu0 %v2006_v2  ;;  %1817 = vmatprep.subr.bf16.mxu1 %v1816_v3  ;;  %v774_v2 = vld [vmem:[%s2699_s6 + $0xd10] sm:$0xff]  ;;  %v777_v3 = vld [vmem:[%s2699_s6 + $0xd28] sm:$0xff] }
 0x152   : > { %2009 = vmatprep.subr.bf16.mxu0 %v2008_v6  ;;  %v2046_v5 = vpack.c.bf16 %v774_v2, %v772_v1  ;;  %v2048_v6 = vpack.c.bf16 %v779_v4, %v777_v3  ;;  %v2078_v1 = vpack.c.bf16 (!%p1587_p6), %v1332_v62, %v1331_v59  ;;  %v1333_v3 = vld [vmem:[%s2728_s13 + $0x10] sm:$0xff] (!%p1587_p6)  ;;  %v1334_v4 = vld [vmem:[%s2728_s13 + $0x18] sm:$0xff] (!%p1587_p6)  ;;  %v1339_v26 = vld [vmem:[%s2728_s13 + $0x40] sm:$0xff] (!%p1587_p6) }
 0x153   : > { %v1359_v37 = vld [vmem:[%s2728_s13 + $0xe0] sm:$0xff] (!%p1587_p6) }
 0x154   : > { %1819 = vmatpush1.bf16.msra.mxu1 %v1818_v11  ;;  %v2050_v11 = vpack.c.bf16 %v778_v8, %v776_v7  ;;  %v2082_v7 = vpack.c.bf16 (!%p1587_p6), %v1334_v4, %v1333_v3  ;;  %v1314_v8 = vshrl.u32 (!%p1587_p6), %v1313_v60, 7 }
 0x155   : > { %2011 = vmatpush1.bf16.msra.mxu0 %v2010_v12  ;;  %v2052_v12 = vpack.c.bf16 %v783_v10, %v781_v9  ;;  %v1335_v10 = vld [vmem:[%s2728_s13 + $0x20] sm:$0xff] (!%p1587_p6) }
 0x156   : > { %2013 = vmatprep.subr.bf16.mxu0 %v2012_v13  ;;  %v780_v13 = vld [vmem:[%s2699_s6 + $0xd40] sm:$0xff] }
 0x157   : > { %1011 = vmatmul.mubr.f32.vlgmr.msra.gmra.mrb[0].mxu1 %v346_v18  ;;  %v2054_v17 = vpack.c.bf16 %v782_v14, %v780_v13  ;;  %v2056_v18 = vpack.c.bf16 %v787_v16, %v785_v15  ;;  %v1354_v13 = vld [vmem:[%s2728_s13 + $0xb8] sm:$0xff] (!%p1587_p6)  ;;  %v1319_v15 = vsub.s32 (!%p1587_p6), 1, %v1314_v8 }
 0x158   : > { %1224 = vmatmul.mubr.f32.vlgmr.msra.gmra.mrb[0].mxu0 %v352_v19  ;;  %v784_v19 = vld [vmem:[%s2699_s6 + $0xd60] sm:$0xff] }
 0x159   : > { %2015 = vmatpush1.bf16.msra.mxu0 %v2014_v20  ;;  %1294 = vmatprep.mubr.f32.mxu0 %v355_v24  ;;  %v786_v20 = vld [vmem:[%s2699_s6 + $0xd70] sm:$0xff] }
 0x15a   : > { %2017 = vmatprep.subr.bf16.mxu0 %v2016_v21  ;;  %v789_v21 = vld [vmem:[%s2699_s6 + $0xd88] sm:$0xff]  ;;  %v2058_v23 = vpack.c.bf16 %v786_v20, %v784_v19 }
 0x15b   : > { %v2060_v24 = vpack.c.bf16 %v791_v22, %v789_v21  ;;  %v1355_v19 = vld [vmem:[%s2728_s13 + $0xc0] sm:$0xff] (!%p1587_p6)  ;;  %v1356_v20 = vld [vmem:[%s2728_s13 + $0xc8] sm:$0xff] (!%p1587_p6)  ;;  %v1311_v22 = vld [vmem:[%s272_s29] sm:$0x3] (!%p1587_p6) }
 0x15c   : > { %v2092_v25 = vpack.c.bf16 (!%p1587_p6), %v1356_v20, %v1355_v19 }
 0x15d   : > { %2019 = vmatpush1.bf16.msra.mxu0 %v2018_v27  ;;  %v793_v27 = vld [vmem:[%s2699_s6 + $0xda8] sm:$0xff] }
 0x15e   : > { %2021 = vmatprep.subr.bf16.mxu0 %v2020_v28  ;;  %v795_v28 = vld [vmem:[%s2699_s6 + $0xdb8] sm:$0xff] }
 0x15f   : > { %v2064_v30 = vpack.c.bf16 %v795_v28, %v793_v27  ;;  %v1340_v27 = vld [vmem:[%s2728_s13 + $0x48] sm:$0xff] (!%p1587_p6)  ;;  %v1357_v28 = vld [vmem:[%s2728_s13 + $0xd0] sm:$0xff] (!%p1587_p6) }
 0x160   : > { %v2094_v31 = vpack.c.bf16 (!%p1587_p6), %v1340_v27, %v1339_v26 }
 0x161   : > { %2023 = vmatpush1.bf16.msra.mxu0 %v2022_v33  ;;  %v797_v33 = vld [vmem:[%s2699_s6 + $0xdc8] sm:$0xff] }
 0x162   : > { %2025 = vmatprep.subr.bf16.mxu0 %v2024_v34  ;;  %v799_v34 = vld [vmem:[%s2699_s6 + $0xdd8] sm:$0xff] }
 0x163   : > { %v2068_v36 = vpack.c.bf16 %v799_v34, %v797_v33  ;;  %v1315_v33 = vsub.s32 (!%p1587_p6), 0, %v1314_v8 }
 0x165   : > { %2027 = vmatpush1.bf16.msra.mxu0 %v2026_v39  ;;  %v801_v39 = vld [vmem:[%s2699_s6 + $0xde8] sm:$0xff] }
 0x166   : > { %2029 = vmatprep.subr.bf16.mxu0 %v2028_v40  ;;  %v803_v40 = vld [vmem:[%s2699_s6 + $0xdf8] sm:$0xff] }
 0x167   : > { %v2072_v42 = vpack.c.bf16 %v803_v40, %v801_v39 }
 0x169   : > { %2031 = vmatpush1.bf16.msra.mxu0 %v2030_v45  ;;  %v2074_v45 = vpack.c.bf16 %v802_v44, %v800_v43  ;;  %v1343_v43 = vld [vmem:[%s2728_s13 + $0x60] sm:$0xff] (!%p1587_p6)  ;;  %v1344_v44 = vld [vmem:[%s2728_s13 + $0x68] sm:$0xff] (!%p1587_p6) }
 0x16a   : > { %2033 = vmatprep.subr.bf16.mxu0 %v2032_v46  ;;  %v354_v46 = vld [vmem:[%s2726_s18 + $0x60] sm:$0xff] }
 0x16d   : > { %2035 = vmatpush1.bf16.msra.mxu0 %v2034_v51 }
 0x16e   : > { %2037 = vmatprep.subr.bf16.mxu0 %v2036_v52  ;;  %v341_v52 = vld [vmem:[#allocation2 + $0x8] sm:$0xff] }
 0x171   : > { %2039 = vmatpush1.bf16.msra.mxu0 %v2038_v57  ;;  %v1347_v57 = vld [vmem:[%s2728_s13 + $0x80] sm:$0xff] (!%p1587_p6) }
 0x172   : > { %2041 = vmatprep.subr.bf16.mxu0 %v2040_v58  ;;  %v1348_v58 = vld [vmem:[%s2728_s13 + $0x88] sm:$0xff] (!%p1587_p6) }
 0x173   : > { %v2076_v61 = vpack.c.bf16 (!%p1587_p6), %v1348_v58, %v1347_v57 }
 0x175   : > { %2043 = vmatpush1.bf16.msra.mxu0 %v2042_v63  ;;  %v1349_v63 = vld [vmem:[%s2728_s13 + $0x90] sm:$0xff] (!%p1587_p6) }
 0x176   : > { %2045 = vmatprep.subr.bf16.mxu0 %v2044_v0  ;;  %v1350_v0 = vld [vmem:[%s2728_s13 + $0x98] sm:$0xff] (!%p1587_p6) }
 0x177   : > { %v2080_v2 = vpack.c.bf16 (!%p1587_p6), %v1350_v0, %v1349_v63 }
 0x179   : > { %2047 = vmatpush1.bf16.msra.mxu0 %v2046_v5  ;;  %v1351_v5 = vld [vmem:[%s2728_s13 + $0xa0] sm:$0xff] (!%p1587_p6) }
 0x17a   : > { %2049 = vmatprep.subr.bf16.mxu0 %v2048_v6  ;;  %v1352_v6 = vld [vmem:[%s2728_s13 + $0xa8] sm:$0xff] (!%p1587_p6) }
 0x17b   : > { %v2084_v9 = vpack.c.bf16 (!%p1587_p6), %v1352_v6, %v1351_v5 }
 0x17d   : > { %2051 = vmatpush1.bf16.msra.mxu0 %v2050_v11  ;;  %v1336_v11 = vld [vmem:[%s2728_s13 + $0x28] sm:$0xff] (!%p1587_p6) }
 0x17e   : > { %2053 = vmatprep.subr.bf16.mxu0 %v2052_v12  ;;  %v1353_v12 = vld [vmem:[%s2728_s13 + $0xb0] sm:$0xff] (!%p1587_p6)  ;;  %v2086_v14 = vpack.c.bf16 (!%p1587_p6), %v1336_v11, %v1335_v10 }
 0x17f   : > { %v2088_v16 = vpack.c.bf16 (!%p1587_p6), %v1354_v13, %v1353_v12 }
 0x181   : > { %2055 = vmatpush1.bf16.msra.mxu0 %v2054_v17  ;;  %v1337_v17 = vld [vmem:[%s2728_s13 + $0x30] sm:$0xff] (!%p1587_p6) }
 0x182   : > { %2057 = vmatprep.subr.bf16.mxu0 %v2056_v18  ;;  %v1338_v18 = vld [vmem:[%s2728_s13 + $0x38] sm:$0xff] (!%p1587_p6) }
 0x185   : > { %2059 = vmatpush1.bf16.msra.mxu0 %v2058_v23  ;;  %v2090_v23 = vpack.c.bf16 (!%p1587_p6), %v1338_v18, %v1337_v17 }
 0x186   : > { %2061 = vmatprep.subr.bf16.mxu0 %v2060_v24  ;;  %v1320_v24 = vrot.slane (!%p1587_p6), %v1311_v22, %v1319_v15 }
 0x189   : > { %2063 = vmatpush1.bf16.msra.mxu0 %v2062_v29  ;;  %v1358_v29 = vld [vmem:[%s2728_s13 + $0xd8] sm:$0xff] (!%p1587_p6) }
 0x18a   : > { %2065 = vmatprep.subr.bf16.mxu0 %v2064_v30  ;;  %v2096_v34 = vpack.c.bf16 (!%p1587_p6), %v1358_v29, %v1357_v28 }
 0x18d   : > { %2067 = vmatpush1.bf16.msra.mxu0 %v2066_v35  ;;  %v1341_v35 = vld [vmem:[%s2728_s13 + $0x50] sm:$0xff] (!%p1587_p6) }
 0x18e   : > { %2069 = vmatprep.subr.bf16.mxu0 %v2068_v36  ;;  %v1342_v36 = vld [vmem:[%s2728_s13 + $0x58] sm:$0xff] (!%p1587_p6) }
 0x18f   : > { %v2098_v40 = vpack.c.bf16 (!%p1587_p6), %v1342_v36, %v1341_v35 }
 0x191   : > { %2071 = vmatpush1.bf16.msra.mxu0 %v2070_v41  ;;  %v1316_v41 = vrot.slane (!%p1587_p6), %v1311_v22, %v1315_v33 }
 0x192   : > { %2073 = vmatprep.subr.bf16.mxu0 %v2072_v42  ;;  %v2100_v42 = vpack.c.bf16 (!%p1587_p6), %v1360_v38, %v1359_v37 }
 0x195   : > { %2075 = vmatpush1.bf16.msra.mxu0 %v2074_v45 }
 0x196   : > { %2077 = vmatprep.subr.bf16.mxu0 (!%p1587_p6), %v2076_v61 }
 0x198   : > { %1295 = vmatmul.mubr.f32.vlgmr.msra.gmra.mrb[0].mxu0 %v354_v46  ;;  %v1361_v46 = vld [vmem:[%s2728_s13 + $0xf0] sm:$0xff] (!%p1587_p6) }
 0x199   : > { %2079 = vmatpush3.bf16.msra.mxu0 (!%p1587_p6), %v2078_v1 }
 0x19a   : > { %2081 = vmatprep.subr.bf16.mxu0 (!%p1587_p6), %v2080_v2 }
 0x19d   : > { %2083 = vmatpush3.bf16.msra.mxu0 (!%p1587_p6), %v2082_v7 }
 0x19e   : > { %2085 = vmatprep.subr.bf16.mxu0 (!%p1587_p6), %v2084_v9 }
 0x1a1   : > { %2087 = vmatpush3.bf16.msra.mxu0 (!%p1587_p6), %v2086_v14 }
 0x1a2   : > { %2089 = vmatprep.subr.bf16.mxu0 (!%p1587_p6), %v2088_v16 }
 0x1a5   : > { %2091 = vmatpush3.bf16.msra.mxu0 (!%p1587_p6), %v2090_v23 }
 0x1a6   : > { %2093 = vmatprep.subr.bf16.mxu0 (!%p1587_p6), %v2092_v25 }
 0x1a9   : > { %2095 = vmatpush3.bf16.msra.mxu0 (!%p1587_p6), %v2094_v31 }
 0x1aa   : > { %2097 = vmatprep.subr.bf16.mxu0 (!%p1587_p6), %v2096_v34 }
 0x1ad   : > { %2099 = vmatpush3.bf16.msra.mxu0 (!%p1587_p6), %v2098_v40 }
 0x1ae   : > { %2101 = vmatprep.subr.bf16.mxu0 (!%p1587_p6), %v2100_v42 }
 0x22a   : > { %v1012_v47 = vpop.f32.mrb[0].mxu1 }
 0x22b   : > { %v1014_v48 = vpop.f32.mrb[1].mxu1 }
 0x26b   : > { %v1296_v50 = vpop.f32.mrb[0].mxu0  ;;  %1308 = sbr.rel (%p1587_p6) target bundleno = 855 (0x357), region = 56 }
 0x26c   : > { %v2108_v51 = vadd.f32 %v1296_v50, %v1012_v47  ;;  %v1298_v53 = vpop.f32.mrb[1].mxu0  ;;  %v1362_v47 = vld [vmem:[%s2728_s13 + $0xf8] sm:$0xff] (!%p1587_p6) }
 0x26d   : > { %v2109_v54 = vadd.f32 %v1298_v53, %v1014_v48  ;;  %v2102_v48 = vpack.c.bf16 (!%p1587_p6), %v1344_v44, %v1343_v43  ;;  %v2104_v50 = vpack.c.bf16 (!%p1587_p6), %v1362_v47, %v1361_v46 }
 0x26e   : > { %v1301_v55 = vadd.f32 %v2108_v51, %v340_v49  ;;  %v1345_v51 = vld [vmem:[%s2728_s13 + $0x70] sm:$0xff] (!%p1587_p6) }
 0x26f   : > { %v1302_v56 = vadd.f32 %v2109_v54, %v341_v52  ;;  %v1346_v52 = vld [vmem:[%s2728_s13 + $0x78] sm:$0xff] (!%p1587_p6)  ;;  %2103 = vmatpush3.bf16.msra.mxu0 (!%p1587_p6), %v2102_v48 }
 0x270   : > { %1303 = vst [vmem:[#allocation2] sm:$0xff] %v1301_v55  ;;  %v2106_v53 = vpack.c.bf16 (!%p1587_p6), %v1346_v52, %v1345_v51  ;;  %2105 = vmatprep.subr.bf16.mxu0 (!%p1587_p6), %v2104_v50 }
 0x271   : > { %1304 = vst [vmem:[#allocation2 + $0x8] sm:$0xff] %v1302_v56 }
 0x273   : > { %2107 = vmatpush3.bf16.msra.mxu0 %v2106_v53 }
 0x277   : > { %v1309_v45 = vld [vmem:[#allocation2] sm:$0xff] }
 0x278   : > { %v1310_v21 = vld [vmem:[#allocation2 + $0x8] sm:$0xff]  ;;  %v1323_v49 = vadd.f32 %v1316_v41, %v1309_v45 }
 0x279   : > { %v1324_v30 = vadd.f32 %v1320_v24, %v1310_v21 }
 0x27a   : > { %v1327_v54 = vmul.f32 0.01, %v1323_v49  ;;  %vm1325_vm1 = vcmp.ge.f32.partialorder %v1323_v49, 0.0 }
 0x27b   : > { %vm1326_vm0 = vcmp.ge.f32.partialorder %v1324_v30, 0.0  ;;  %v1328_v32 = vmul.f32 0.01, %v1324_v30 }
 0x27c   : > { %v1329_v55 = vsel %vm1325_vm1, %v1323_v49, %v1327_v54 }
 0x27d   : > { %v1330_v39 = vsel %vm1326_vm0, %v1324_v30, %v1328_v32 }
 0x27e   : > { %1427 = vmatprep.mubr.f32.mxu0 %v1330_v39 }
 0x27f   : > { %1428 = vmatmul.mubr.f32.vlgmr.msra.gmra.mrb[0].mxu0 %v1329_v55 }
 0x352   : > { %v1625_v56 = vpop.f32.mrb[0].mxu0 }
 0x353   : > { %v1626_v57 = vpop.f32.mrb[1].mxu0 }
 0x354   : > { %v1627_v58 = vadd.f32 %v1626_v57, %v1625_v56 }
 0x356   : > { %1433 = vst [vmem:[%s2721_s14] sm:$0xff] %v1627_v58 }
 0x357 PF: > { %s20_s25 = sadd.s32 1, %s2417_s25   ;;  %s3298_s21 = sld [smem:[#allocation10_spill]] }
 0x358   : > { %p17_p9 = scmp.ge.s32.totalorder %s20_s25, 12   ;;  %s3299_s17 = sld [smem:[#allocation14_spill]] }
 0x359   : > { %s3300_s22 = sld [smem:[#allocation11_spill]]  ;;  %s3301_s20 = sld [smem:[#allocation15_spill]] }
 0x35a   : > { %s3302_s27 = sld [smem:[#allocation12_spill]]  ;;  %s3303_s6 = sld [smem:[#allocation13_spill]] }
 0x35b   : > { %s3304_s15 = smov %s2381_s16  ;;  %s3306_s18 = smov %s2393_s19 }
 0x35c   :  { %19 = sbr.rel (!%p17_p9) target bundleno = 11 (0xb), region = 111 }
 0x35d   : > { %s3305_s16 = smov %s3298_s21  ;;  %s3308_s21 = smov %s2409_s23 }
 0x35f   : > { %s3307_s19 = smov %s3300_s22  ;;  %s3309_s22 = smov %s2413_s24 }
 0x360   : > { %s3310_s23 = smov %s3302_s27  ;;  %s3311_s24 = smov %s3303_s6 }
 0x363   :  { %1453 = vsyncpa [#allocation4], 1 }
 0x364   :  { %1455 = vsyncpa [#allocation4 + $0x1], 1 }
 0x365   :  { %1456 = vsyncpa [#allocation6], 1 }
 0x366   :  { %1458 = vsyncpa [#allocation6 + $0x1], 1 }

// kernel: beam_cnn_forward.2
= control target key start
LH: loop header
LB: loop body
LE: loop exit
PB: predicated region body
PF: predicated region fallthrough
CT: control target
= control target key end

     0   :  { %10 = vsyncpa [#allocation3], 0  ;;  %s6440_s0 = inlined_call_operand.vmem [shape: f32[6,2,49,128], index: 0, kind: input, shape index: {}]   ;;  %s6441_s1 = inlined_call_operand.hbm [shape: f32[6,128,128], index: 1, kind: input, shape index: {}]   ;;  %s6442_s2 = inlined_call_operand.hbm [shape: f32[1,128], index: 2, kind: input, shape index: {}]   ;;  %s6443_s3 = inlined_call_operand.hbm [shape: f32[5,128,256], index: 3, kind: input, shape index: {}]   ;;  %s6444_s4 = inlined_call_operand.hbm [shape: f32[1,256], index: 4, kind: input, shape index: {}]   ;;  %s6445_s5 = inlined_call_operand.vmem [shape: f32[2,45,256], index: 5, kind: output, shape index: {}]  }
   0x1   :  { %11 = vsyncpa [#allocation5], 0 }
   0x2   :  { %12 = vsyncpa [#allocation8], 0  ;;  %s5217_s18 = smov [#allocation4]   ;;  %s5218_s20 = smov [#allocation2]  }
   0x3   :  { %s33_s19 = sshll.u32 %s5217_s18, 4  ;;  %s20_s21 = sshll.u32 %s5218_s20, 4  ;;  %s34_s19 = int_to_ptr.vmem [resolvable:$true] %s33_s19  ;;  %s5258_s21 = int_to_ptr.vmem [resolvable:$true] %s20_s21 }
   0x4   :  { %s5123_s24 = scalar_lea.hbm %s6442_s2, 16 }
   0x5   :  { %p5124_p0 = scmp.ne.s32.totalorder %s6442_s2, %s5123_s24  ;;  %p5127_p1 = scmp.lt.u32.totalorder %s5123_s24, %s6442_s2 }
   0x7   :  { %p5129_p2 = pnand %p5127_p1, %p5124_p0 }
   0x9   :  { %5132 = shalt.err (!%p5129_p2)
}
   0xa   :  { %s5133_s29 = scalar_lea.vmem %s34_s19, 16  ;;  %s5137_s30 = scalar_lea.vmem %s34_s19, 32 }
   0xb   :  { %p5134_p3 = scmp.ne.s32.totalorder %s34_s19, %s5133_s29  ;;  %p5138_p4 = scmp.lt.s32.totalorder %s34_s19, %s34_s19 }
   0xc   :  { %p5139_p5 = scmp.lt.s32.totalorder %s5137_s30, %s5133_s29 }
   0xe   :  { %p5140_p6 = por %p5139_p5, %p5138_p4 }
  0x10   :  { %p5141_p7 = pnand %p5140_p6, %p5134_p3 }
  0x12   :  { %5144 = shalt.err (!%p5141_p7)
}
  0x13   :  { %36 = dma.hbm_to_vmem [thread:$0]  %s6442_s2, 16, %s34_s19, [#allocation5]  }
  0x14   :  { %s5145_s10 = scalar_lea.hbm %s6441_s1, 12288 }
  0x15   :  { %p5146_p8 = scmp.ne.s32.totalorder %s6441_s1, %s5145_s10  ;;  %p5149_p9 = scmp.lt.u32.totalorder %s5145_s10, %s6441_s1 }
  0x17   :  { %p5151_p10 = pnand %p5149_p9, %p5146_p8 }
  0x19   :  { %5154 = shalt.err (!%p5151_p10)
}
  0x1a   :  { %s5155_s15 = scalar_lea.vmem %s5258_s21, 12288  ;;  %p5160_p12 = scmp.lt.s32.totalorder %s5258_s21, %s5258_s21 }
  0x1b   :  { %p5156_p11 = scmp.ne.s32.totalorder %s5258_s21, %s5155_s15  ;;  %p5161_p13 = scmp.lt.s32.totalorder %s5155_s15, %s5155_s15 }
  0x1d   :  { %p5162_p0 = por %p5161_p13, %p5160_p12 }
  0x1f   :  { %p5163_p1 = pnand %p5162_p0, %p5156_p11 }
  0x21   :  { %5166 = shalt.err (!%p5163_p1)
}
  0x22   :  { %s5219_s2 = smov 128   ;;  %s5220_s16 = smov 8  }
  0x23   :  { %26 = dma.hbm_to_vmem [thread:$0]  %s6441_s1, 12288, %s5258_s21, [#allocation3], %s5219_s2, %s5219_s2, %s5220_s16  }
  0x24   :  { %s5221_s19 = smov [#allocation6]   ;;  %s5167_s24 = scalar_lea.hbm %s6443_s3, 20480 }
  0x25   :  { %s42_s20 = sshll.u32 %s5221_s19, 4  ;;  %p5168_p2 = scmp.ne.s32.totalorder %s6443_s3, %s5167_s24  ;;  %s43_s20 = int_to_ptr.vmem [resolvable:$true] %s42_s20 }
  0x26   :  { %p5171_p3 = scmp.lt.u32.totalorder %s5167_s24, %s6443_s3 }
  0x28   :  { %p5173_p4 = pnand %p5171_p3, %p5168_p2 }
  0x2a   :  { %5176 = shalt.err (!%p5173_p4)
}
  0x2b   :  { %s5177_s29 = scalar_lea.vmem %s43_s20, 20480  ;;  %p5182_p6 = scmp.lt.s32.totalorder %s43_s20, %s43_s20 }
  0x2c   :  { %p5178_p5 = scmp.ne.s32.totalorder %s43_s20, %s5177_s29  ;;  %p5183_p7 = scmp.lt.s32.totalorder %s5177_s29, %s5177_s29 }
  0x2e   :  { %p5184_p8 = por %p5183_p7, %p5182_p6 }
  0x30   :  { %p5185_p9 = pnand %p5184_p8, %p5178_p5 }
  0x32   :  { %5188 = shalt.err (!%p5185_p9)
}
  0x33   :  { %s5222_s1 = smov 256   ;;  %s5223_s21 = smov 16  }
  0x34   :  { %48 = dma.hbm_to_vmem [thread:$0]  %s6443_s3, 20480, %s43_s20, [#allocation5], %s5222_s1, %s5222_s1, %s5223_s21  }
  0x35   :  { %s5224_s7 = smov [#allocation7]   ;;  %s5189_s11 = scalar_lea.hbm %s6444_s4, 32 }
  0x36   :  { %s55_s8 = sshll.u32 %s5224_s7, 4  ;;  %p5190_p10 = scmp.ne.s32.totalorder %s6444_s4, %s5189_s11  ;;  %s56_s8 = int_to_ptr.vmem [resolvable:$true] %s55_s8 }
  0x37   :  { %p5193_p11 = scmp.lt.u32.totalorder %s5189_s11, %s6444_s4 }
  0x39   :  { %p5195_p12 = pnand %p5193_p11, %p5190_p10 }
  0x3b   :  { %5198 = shalt.err (!%p5195_p12)
}
  0x3c   :  { %s5199_s2 = scalar_lea.vmem %s56_s8, 32  ;;  %p5204_p0 = scmp.lt.s32.totalorder %s56_s8, %s56_s8 }
  0x3d   :  { %p5200_p13 = scmp.ne.s32.totalorder %s56_s8, %s5199_s2  ;;  %p5205_p1 = scmp.lt.s32.totalorder %s5199_s2, %s5199_s2 }
  0x3f   :  { %p5206_p2 = por %p5205_p1, %p5204_p0 }
  0x41   :  { %p5207_p3 = pnand %p5206_p2, %p5200_p13 }
  0x43   :  { %5210 = shalt.err (!%p5207_p3)
}
  0x44   :  { %58 = dma.hbm_to_vmem [thread:$0]  %s6444_s4, 32, %s56_s8, [#allocation8]  }
  0x45   :  { %5211 = dma.done.wait [#allocation3], 12288  }
  0x46   :  { %5212 = vsyncadd [#allocation3], 4294955008 }
  0x47   :  { %5213 = dma.done.wait [#allocation5], 20496  }
  0x48   :  { %5214 = vsyncadd [#allocation5], 4294946800 }
  0x49   :  { %5215 = dma.done.wait [#allocation8], 32  }
  0x4a   :  { %5216 = vsyncadd [#allocation8], 4294967264  ;;  %v5225_v0 = vmov 0.0|0.0   ;;  %vm5226_vm0 = vmmov 0   ;;  %v5227_v1 = vmov 0.0   ;;  %v103_v2 = vld [vmem:[#allocation2 + $0x80] sm:$0xff] }
  0x4b   :  { %4408 = vmatprep.subr.bf16.mxu0 %v5225_v0  ;;  %3804 = vmatprep.mubr.msk.f32.mxu0 %vm5226_vm0, %v5227_v1  ;;  %v104_v3 = vld [vmem:[#allocation2 + $0x88] sm:$0xff]  ;;  %v105_v4 = vld [vmem:[#allocation2 + $0x90] sm:$0xff]  ;;  %v106_v6 = vld [vmem:[#allocation2 + $0x98] sm:$0xff]  ;;  %vm953_vm2 = vcmask 1046528   ;;  %vm1206_vm3 = vcmask 1045504   ;;  %vm1370_vm4 = vcmask 1044480  }
  0x4c   :  { %4480 = vmatprep.subr.bf16.mxu1 %v5225_v0  ;;  %3963 = vmatprep.mubr.msk.f32.mxu1 %vm5226_vm0, %v5227_v1  ;;  %v5319_v5 = vpack.c.bf16 %v104_v3, %v103_v2  ;;  %v5322_v7 = vpack.c.bf16 %v106_v6, %v105_v4  ;;  %v107_v8 = vld [vmem:[#allocation2 + $0xa0] sm:$0xff]  ;;  %v108_v9 = vld [vmem:[#allocation2 + $0xa8] sm:$0xff]  ;;  %v109_v11 = vld [vmem:[#allocation2 + $0xb0] sm:$0xff]  ;;  %vm1535_vm6 = vcmask 1043456  }
  0x4d   :  { %v5326_v10 = vpack.c.bf16 %v108_v9, %v107_v8  ;;  %v110_v12 = vld [vmem:[#allocation2 + $0xb8] sm:$0xff]  ;;  %v111_v14 = vld [vmem:[#allocation2 + $0xc0] sm:$0xff]  ;;  %v112_v15 = vld [vmem:[#allocation2 + $0xc8] sm:$0xff] }
  0x4e   :  { %4410 = vmatpush3.bf16.msra.mxu0 %v5319_v5  ;;  %v5330_v13 = vpack.c.bf16 %v110_v12, %v109_v11  ;;  %v460_v16 = vld [vmem:[#allocation2 + $0x180] sm:$0xff]  ;;  %v461_v17 = vld [vmem:[#allocation2 + $0x188] sm:$0xff]  ;;  %v5334_v18 = vpack.c.bf16 %v112_v15, %v111_v14  ;;  %v462_v20 = vld [vmem:[#allocation2 + $0x190] sm:$0xff] }
  0x4f   :  { %4411 = vmatprep.subr.bf16.mxu0 %v5225_v0  ;;  %v5336_v19 = vpack.c.bf16 %v461_v17, %v460_v16  ;;  %v113_v21 = vld [vmem:[#allocation2 + $0xd0] sm:$0xff]  ;;  %v114_v22 = vld [vmem:[#allocation2 + $0xd8] sm:$0xff]  ;;  %v464_v25 = vld [vmem:[#allocation2 + $0x1a0] sm:$0xff] }
  0x50   :  { %v463_v23 = vld [vmem:[#allocation2 + $0x198] sm:$0xff]  ;;  %v465_v26 = vld [vmem:[#allocation2 + $0x1a8] sm:$0xff]  ;;  %v5342_v27 = vpack.c.bf16 %v114_v22, %v113_v21  ;;  %v115_v28 = vld [vmem:[#allocation2 + $0xe0] sm:$0xff] }
  0x51   :  { %4482 = vmatpush3.bf16.msra.mxu1 %v5336_v19  ;;  %v4484_v24 = vpack.c.bf16 %v463_v23, %v462_v20  ;;  %v116_v29 = vld [vmem:[#allocation2 + $0xe8] sm:$0xff]  ;;  %v4487_v30 = vpack.c.bf16 %v465_v26, %v464_v25  ;;  %v466_v31 = vld [vmem:[#allocation2 + $0x1b0] sm:$0xff]  ;;  %v467_v32 = vld [vmem:[#allocation2 + $0x1b8] sm:$0xff] }
  0x52   :  { %4413 = vmatpush3.bf16.msra.mxu0 %v5322_v7  ;;  %4483 = vmatprep.subr.bf16.mxu1 %v5225_v0  ;;  %v5347_v33 = vpack.c.bf16 %v116_v29, %v115_v28  ;;  %v117_v34 = vld [vmem:[#allocation2 + $0xf0] sm:$0xff]  ;;  %v118_v35 = vld [vmem:[#allocation2 + $0xf8] sm:$0xff]  ;;  %v4490_v36 = vpack.c.bf16 %v467_v32, %v466_v31  ;;  %v468_v37 = vld [vmem:[#allocation2 + $0x1c0] sm:$0xff] }
  0x53   :  { %4414 = vmatprep.subr.bf16.mxu0 %v5225_v0  ;;  %v469_v38 = vld [vmem:[#allocation2 + $0x1c8] sm:$0xff]  ;;  %v5352_v39 = vpack.c.bf16 %v118_v35, %v117_v34  ;;  %v78_v40 = vld [vmem:[#allocation2] sm:$0xff]  ;;  %v470_v43 = vld [vmem:[#allocation2 + $0x1d0] sm:$0xff] }
  0x54   :  { %v79_v41 = vld [vmem:[#allocation2 + $0x8] sm:$0xff]  ;;  %v4493_v42 = vpack.c.bf16 %v469_v38, %v468_v37  ;;  %v471_v44 = vld [vmem:[#allocation2 + $0x1d8] sm:$0xff]  ;;  %v3405_v45 = vld [vmem:[%s6440_s0 + $0x70] sm:$0xff] }
  0x55   :  { %4485 = vmatpush3.bf16.msra.mxu1 %v4484_v24  ;;  %v5360_v46 = vpack.c.bf16 %v79_v41, %v78_v40  ;;  %v80_v47 = vld [vmem:[#allocation2 + $0x10] sm:$0xff]  ;;  %v81_v48 = vld [vmem:[#allocation2 + $0x18] sm:$0xff]  ;;  %v4496_v49 = vpack.c.bf16 %v471_v44, %v470_v43  ;;  %v472_v50 = vld [vmem:[#allocation2 + $0x1e0] sm:$0xff] }
  0x56   :  { %4416 = vmatpush3.bf16.msra.mxu0 %v5326_v10  ;;  %4486 = vmatprep.subr.bf16.mxu1 %v5225_v0  ;;  %v473_v51 = vld [vmem:[#allocation2 + $0x1e8] sm:$0xff]  ;;  %v5365_v52 = vpack.c.bf16 %v81_v48, %v80_v47  ;;  %v3406_v53 = vld [vmem:[%s6440_s0 + $0x78] sm:$0xff]  ;;  %v82_v54 = vld [vmem:[#allocation2 + $0x20] sm:$0xff] }
  0x57   :  { %4417 = vmatprep.subr.bf16.mxu0 %v5225_v0  ;;  %v83_v55 = vld [vmem:[#allocation2 + $0x28] sm:$0xff]  ;;  %v4499_v56 = vpack.c.bf16 %v473_v51, %v472_v50  ;;  %v474_v57 = vld [vmem:[#allocation2 + $0x1f0] sm:$0xff]  ;;  %v475_v58 = vld [vmem:[#allocation2 + $0x1f8] sm:$0xff] }
  0x58   :  { %v5375_v59 = vpack.c.bf16 %v83_v55, %v82_v54  ;;  %v3407_v60 = vld [vmem:[%s6440_s0 + $0x80] sm:$0xff]  ;;  %v84_v61 = vld [vmem:[#allocation2 + $0x30] sm:$0xff]  ;;  %v85_v62 = vld [vmem:[#allocation2 + $0x38] sm:$0xff]  ;;  %v4502_v63 = vpack.c.bf16 %v475_v58, %v474_v57 }
  0x59   :  { %4488 = vmatpush3.bf16.msra.mxu1 %v4487_v30  ;;  %v724_v2 = vld [vmem:[#allocation2 + $0x280] sm:$0xff]  ;;  %v725_v3 = vld [vmem:[#allocation2 + $0x288] sm:$0xff]  ;;  %v5385_v4 = vpack.c.bf16 %v85_v62, %v84_v61  ;;  %v3419_v11 = vld [vmem:[%s6440_s0 + $0x150] sm:$0xff] }
  0x5a   :  { %4419 = vmatpush3.bf16.msra.mxu0 %v5330_v13  ;;  %4489 = vmatprep.subr.bf16.mxu1 %v5225_v0  ;;  %v3408_v6 = vld [vmem:[%s6440_s0 + $0x88] sm:$0xff]  ;;  %v86_v8 = vld [vmem:[#allocation2 + $0x40] sm:$0xff]  ;;  %v4529_v12 = vpack.c.bf16 %v725_v3, %v724_v2  ;;  %v726_v14 = vld [vmem:[#allocation2 + $0x290] sm:$0xff] }
  0x5b   :  { %4420 = vmatprep.subr.bf16.mxu0 %v5225_v0  ;;  %v87_v9 = vld [vmem:[#allocation2 + $0x48] sm:$0xff]  ;;  %v727_v15 = vld [vmem:[#allocation2 + $0x298] sm:$0xff]  ;;  %v3409_v17 = vld [vmem:[%s6440_s0 + $0x90] sm:$0xff] }
  0x5c   :  { %v5398_v16 = vpack.c.bf16 %v87_v9, %v86_v8  ;;  %v88_v20 = vld [vmem:[#allocation2 + $0x50] sm:$0xff]  ;;  %v89_v21 = vld [vmem:[#allocation2 + $0x58] sm:$0xff]  ;;  %v4532_v23 = vpack.c.bf16 %v727_v15, %v726_v14  ;;  %v728_v24 = vld [vmem:[#allocation2 + $0x2a0] sm:$0xff] }
  0x5d   :  { %4491 = vmatpush3.bf16.msra.mxu1 %v4490_v36  ;;  %v3420_v22 = vld [vmem:[%s6440_s0 + $0x158] sm:$0xff]  ;;  %v729_v25 = vld [vmem:[#allocation2 + $0x2a8] sm:$0xff]  ;;  %v5413_v26 = vpack.c.bf16 %v89_v21, %v88_v20  ;;  %v90_v29 = vld [vmem:[#allocation2 + $0x60] sm:$0xff] }
  0x5e   :  { %4422 = vmatpush3.bf16.msra.mxu0 %v5334_v18  ;;  %4492 = vmatprep.subr.bf16.mxu1 %v5225_v0  ;;  %v3410_v28 = vld [vmem:[%s6440_s0 + $0x98] sm:$0xff]  ;;  %v91_v30 = vld [vmem:[#allocation2 + $0x68] sm:$0xff]  ;;  %v3421_v31 = vld [vmem:[%s6440_s0 + $0x160] sm:$0xff]  ;;  %v4535_v32 = vpack.c.bf16 %v729_v25, %v728_v24 }
  0x5f   :  { %4423 = vmatprep.subr.bf16.mxu0 %v5225_v0  ;;  %v730_v34 = vld [vmem:[#allocation2 + $0x2b0] sm:$0xff]  ;;  %v731_v35 = vld [vmem:[#allocation2 + $0x2b8] sm:$0xff]  ;;  %v5428_v36 = vpack.c.bf16 %v91_v30, %v90_v29  ;;  %v3411_v37 = vld [vmem:[%s6440_s0 + $0xa0] sm:$0x1] }
  0x60   :  { %v92_v38 = vld [vmem:[#allocation2 + $0x70] sm:$0xff]  ;;  %v93_v40 = vld [vmem:[#allocation2 + $0x78] sm:$0xff]  ;;  %v3422_v41 = vld [vmem:[%s6440_s0 + $0x168] sm:$0xff] }
  0x61   :  { %4494 = vmatpush3.bf16.msra.mxu1 %v4493_v42  ;;  %v4538_v42 = vpack.c.bf16 %v731_v35, %v730_v34  ;;  %v732_v43 = vld [vmem:[#allocation2 + $0x2c0] sm:$0xff]  ;;  %v733_v44 = vld [vmem:[#allocation2 + $0x2c8] sm:$0xff]  ;;  %v734_v51 = vld [vmem:[#allocation2 + $0x2d0] sm:$0xff] }
  0x62   :  { %4425 = vmatpush3.bf16.msra.mxu0 %v5342_v27  ;;  %4495 = vmatprep.subr.bf16.mxu1 %v5225_v0  ;;  %v328_v47 = vld [vmem:[#allocation2 + $0x100] sm:$0xff]  ;;  %v329_v48 = vld [vmem:[#allocation2 + $0x108] sm:$0xff]  ;;  %v4541_v50 = vpack.c.bf16 %v733_v44, %v732_v43  ;;  %v331_v57 = vld [vmem:[#allocation2 + $0x118] sm:$0xff] }
  0x63   :  { %4426 = vmatprep.subr.bf16.mxu0 %v5225_v0  ;;  %v71_v54 = vld [vmem:[%s6440_s0] sm:$0xff]  ;;  %v5458_v55 = vpack.c.bf16 %v329_v48, %v328_v47  ;;  %v3424_v58 = vld [vmem:[%s6440_s0 + $0x178] sm:$0xff]  ;;  %v737_v62 = vld [vmem:[#allocation2 + $0x2e8] sm:$0xff] }
  0x64   :  { %v736_v61 = vld [vmem:[#allocation2 + $0x2e0] sm:$0xff]  ;;  %v73_v14 = vld [vmem:[%s6440_s0 + $0x10] sm:$0xff]  ;;  %v335_v20 = vld [vmem:[#allocation2 + $0x138] sm:$0xff] }
  0x65   :  { %4497 = vmatpush3.bf16.msra.mxu1 %v4496_v49  ;;  %v3423_v49 = vld [vmem:[%s6440_s0 + $0x170] sm:$0xff]  ;;  %v332_v3 = vld [vmem:[#allocation2 + $0x120] sm:$0xff]  ;;  %v4547_v9 = vpack.c.bf16 %v737_v62, %v736_v61  ;;  %v337_v25 = vld [vmem:[#allocation2 + $0x148] sm:$0xff] }
  0x66   :  { %4428 = vmatpush3.bf16.msra.mxu0 %v5347_v33  ;;  %4498 = vmatprep.subr.bf16.mxu1 %v5225_v0  ;;  %v3425_v8 = vld [vmem:[%s6440_s0 + $0x180] sm:$0x1]  ;;  %v3434_v34 = vld [vmem:[%s6440_s0 + $0x238] sm:$0xff]  ;;  %v76_v35 = vld [vmem:[%s6440_s0 + $0x28] sm:$0xff] }
  0x67   :  { %4429 = vmatprep.subr.bf16.mxu0 %v5225_v0  ;;  %v336_v24 = vld [vmem:[#allocation2 + $0x140] sm:$0xff]  ;;  %v342_v43 = vld [vmem:[#allocation2 + $0x170] sm:$0xff]  ;;  %v343_v44 = vld [vmem:[#allocation2 + $0x178] sm:$0xff] }
  0x68   :  { %v75_v29 = vld [vmem:[%s6440_s0 + $0x20] sm:$0xff]  ;;  %v5513_v30 = vpack.c.bf16 %v337_v25, %v336_v24  ;;  %v5556_v47 = vpack.c.bf16 %v343_v44, %v342_v43  ;;  %v3414_v61 = vld [vmem:[%s6440_s0 + $0xf0] sm:$0xff] }
  0x69   :  { %4500 = vmatpush3.bf16.msra.mxu1 %v4499_v56  ;;  %v330_v56 = vld [vmem:[#allocation2 + $0x110] sm:$0xff]  ;;  %v592_v48 = vld [vmem:[#allocation2 + $0x200] sm:$0xff] }
  0x6a   :  { %4431 = vmatpush3.bf16.msra.mxu0 %v5352_v39  ;;  %4501 = vmatprep.subr.bf16.mxu1 %v5225_v0  ;;  %v5473_v2 = vpack.c.bf16 %v331_v57, %v330_v56  ;;  %v3413_v56 = vld [vmem:[%s6440_s0 + $0xe8] sm:$0xff]  ;;  %v606_v25 = vld [vmem:[#allocation2 + $0x270] sm:$0xff]  ;;  %v918_v43 = vld [vmem:[#allocation6 + $0x118] sm:$0xff] }
  0x6b   :  { %4432 = vmatprep.subr.bf16.mxu0 %v5225_v0 }
  0x6d   :  { %3805 = vmatmul.mubr.f32.vlgmr.msra.gmra.mrb[0].mxu0 %v3405_v45  ;;  %4503 = vmatpush3.bf16.msra.mxu1 %v4502_v63  ;;  %v5443_v45 = vpack.c.bf16 %v93_v40, %v92_v38  ;;  %v72_v63 = vld [vmem:[%s6440_s0 + $0x8] sm:$0xff]  ;;  %v340_v38 = vld [vmem:[#allocation2 + $0x160] sm:$0xff] }
  0x6e   :  { %4434 = vmatpush3.bf16.msra.mxu0 %v5360_v46  ;;  %3807 = vmatprep.mubr.msk.f32.mxu0 %vm5226_vm0, %v5227_v1  ;;  %v341_v40 = vld [vmem:[#allocation2 + $0x168] sm:$0xff] }
  0x6f   :  { %4435 = vmatprep.subr.bf16.mxu0 %v5225_v0  ;;  %4528 = vmatprep.subr.bf16.mxu1 %v5225_v0 }
  0x70   :  { %3964 = vmatmul.mubr.f32.vlgmr.msra.gmra.mrb[0].mxu1 %v3419_v11  ;;  %v738_v11 = vld [vmem:[#allocation2 + $0x2f0] sm:$0xff] }
  0x71   :  { %3808 = vmatmul.mubr.f32.gmra.mrb[2].mxu0 %v3406_v53  ;;  %4530 = vmatpush3.bf16.msra.mxu1 %v4529_v12  ;;  %v735_v53 = vld [vmem:[#allocation2 + $0x2d8] sm:$0xff] }
  0x72   :  { %4437 = vmatpush3.bf16.msra.mxu0 %v5365_v52  ;;  %3810 = vmatprep.mubr.msk.f32.mxu0 %vm5226_vm0, %v5227_v1  ;;  %v739_v12 = vld [vmem:[#allocation2 + $0x2f8] sm:$0xff] }
  0x73   :  { %4438 = vmatprep.subr.bf16.mxu0 %v5225_v0  ;;  %3966 = vmatprep.mubr.msk.f32.mxu1 %vm5226_vm0, %v5227_v1  ;;  %v4550_v21 = vpack.c.bf16 %v739_v12, %v738_v11  ;;  %v602_v12 = vld [vmem:[#allocation2 + $0x250] sm:$0xff] }
  0x74   :  { %4531 = vmatprep.subr.bf16.mxu1 %v5225_v0  ;;  %3967 = vmatmul.mubr.f32.gmra.mrb[2].mxu1 %v3420_v22  ;;  %v74_v22 = vld [vmem:[%s6440_s0 + $0x18] sm:$0xff] }
  0x75   :  { %3811 = vmatmul.mubr.f32.gmra.mrb[4].mxu0 %v3407_v60  ;;  %4533 = vmatpush3.bf16.msra.mxu1 %v4532_v23  ;;  %v4544_v60 = vpack.c.bf16 %v735_v53, %v734_v51  ;;  %v594_v53 = vld [vmem:[#allocation2 + $0x210] sm:$0xff] }
  0x76   :  { %4440 = vmatpush3.bf16.msra.mxu0 %v5375_v59  ;;  %3813 = vmatprep.mubr.msk.f32.mxu0 %vm5226_vm0, %v5227_v1 }
  0x77   :  { %4441 = vmatprep.subr.bf16.mxu0 %v5225_v0  ;;  %3969 = vmatprep.mubr.msk.f32.mxu1 %vm5226_vm0, %v5227_v1 }
  0x78   :  { %4534 = vmatprep.subr.bf16.mxu1 %v5225_v0  ;;  %3970 = vmatmul.mubr.f32.gmra.mrb[4].mxu1 %v3421_v31  ;;  %v338_v31 = vld [vmem:[#allocation2 + $0x150] sm:$0xff] }
  0x79   :  { %3814 = vmatmul.mubr.f32.gmra.mrb[6].mxu0 %v3408_v6  ;;  %4536 = vmatpush3.bf16.msra.mxu1 %v4535_v32  ;;  %v333_v6 = vld [vmem:[#allocation2 + $0x128] sm:$0xff]  ;;  %v339_v32 = vld [vmem:[#allocation2 + $0x158] sm:$0xff] }
  0x7a   :  { %4443 = vmatpush3.bf16.msra.mxu0 %v5385_v4  ;;  %3816 = vmatprep.mubr.msk.f32.mxu0 %vm5226_vm0, %v5227_v1  ;;  %v5488_v15 = vpack.c.bf16 %v333_v6, %v332_v3  ;;  %v599_v3 = vld [vmem:[#allocation2 + $0x238] sm:$0xff] }
  0x7b   :  { %4444 = vmatprep.subr.bf16.mxu0 %v5225_v0  ;;  %3972 = vmatprep.mubr.msk.f32.mxu1 %vm5226_vm0, %v5227_v1 }
  0x7c   :  { %4537 = vmatprep.subr.bf16.mxu1 %v5225_v0  ;;  %3973 = vmatmul.mubr.f32.gmra.mrb[6].mxu1 %v3422_v41  ;;  %v77_v41 = vld [vmem:[%s6440_s0 + $0x30] sm:$0x1] }
  0x7d   :  { %3817 = vmatmul.mubr.f32.gmra.mrb[8].mxu0 %v3409_v17  ;;  %4539 = vmatpush3.bf16.msra.mxu1 %v4538_v42  ;;  %v334_v17 = vld [vmem:[#allocation2 + $0x130] sm:$0xff]  ;;  %v5545_v42 = vpack.c.bf16 %v341_v40, %v340_v38  ;;  %v3429_v38 = vld [vmem:[%s6440_s0 + $0x1d8] sm:$0xff]  ;;  %v3430_v40 = vld [vmem:[%s6440_s0 + $0x1e0] sm:$0xff] }
  0x7e   :  { %4446 = vmatpush3.bf16.msra.mxu0 %v5398_v16  ;;  %3819 = vmatprep.mubr.msk.f32.mxu0 %vm5226_vm0, %v5227_v1  ;;  %v5500_v23 = vpack.c.bf16 %v335_v20, %v334_v17  ;;  %v604_v20 = vld [vmem:[#allocation2 + $0x260] sm:$0xff] }
  0x7f   :  { %4447 = vmatprep.subr.bf16.mxu0 %v5225_v0  ;;  %3975 = vmatprep.mubr.msk.f32.mxu1 %vm5226_vm0, %v5227_v1 }
  0x80   :  { %4540 = vmatprep.subr.bf16.mxu1 %v5225_v0  ;;  %3976 = vmatmul.mubr.f32.gmra.mrb[8].mxu1 %v3423_v49  ;;  %v593_v49 = vld [vmem:[#allocation2 + $0x208] sm:$0xff] }
  0x81   :  { %3820 = vmatmul.mubr.f32.gmra.mrb[10].mxu0 %v3410_v28  ;;  %4542 = vmatpush3.bf16.msra.mxu1 %v4541_v50  ;;  %v3433_v28 = vld [vmem:[%s6440_s0 + $0x230] sm:$0xff]  ;;  %v3412_v50 = vld [vmem:[%s6440_s0 + $0xe0] sm:$0xff]  ;;  %v4505_v51 = vpack.c.bf16 %v593_v49, %v592_v48 }
  0x82   :  { %4449 = vmatpush3.bf16.msra.mxu0 %v5413_v26  ;;  %3822 = vmatprep.mubr.msk.f32.mxu0 %vm5226_vm0, %v5227_v1  ;;  %v917_v48 = vld [vmem:[#allocation6 + $0x110] sm:$0xff] }
  0x83   :  { %4450 = vmatprep.subr.bf16.mxu0 %v5225_v0  ;;  %3978 = vmatprep.mubr.msk.f32.mxu1 %vm5226_vm0, %v5227_v1 }
  0x84   :  { %4543 = vmatprep.subr.bf16.mxu1 %v5225_v0  ;;  %3979 = vmatmul.mubr.f32.gmra.mrb[10].mxu1 %v3424_v58  ;;  %v596_v58 = vld [vmem:[#allocation2 + $0x220] sm:$0xff] }
  0x85   :  { %3823 = vmatmul.mubr.f32.gmra.mrb[12].mxu0 %v3411_v37  ;;  %4545 = vmatpush3.bf16.msra.mxu1 %v4544_v60  ;;  %v5529_v37 = vpack.c.bf16 %v339_v32, %v338_v31  ;;  %v597_v60 = vld [vmem:[#allocation2 + $0x228] sm:$0xff]  ;;  %v3426_v31 = vld [vmem:[%s6440_s0 + $0x1c0] sm:$0xff] }
  0x86   :  { %4452 = vmatpush3.bf16.msra.mxu0 %v5428_v36  ;;  %3857 = vmatprep.mubr.msk.f32.mxu0 %vm5226_vm0, %v5227_v1  ;;  %v4511_v62 = vpack.c.bf16 %v597_v60, %v596_v58  ;;  %v3427_v32 = vld [vmem:[%s6440_s0 + $0x1c8] sm:$0xff] }
  0x87   :  { %4453 = vmatprep.subr.bf16.mxu0 %v5225_v0  ;;  %3981 = vmatprep.mubr.msk.f32.mxu1 %vm5226_vm0, %v5227_v1  ;;  %v923_v60 = vld [vmem:[#allocation6 + $0x140] sm:$0xff] }
  0x88   :  { %4546 = vmatprep.subr.bf16.mxu1 %v5225_v0  ;;  %3982 = vmatmul.mubr.f32.gmra.mrb[12].mxu1 %v3425_v8  ;;  %v600_v8 = vld [vmem:[#allocation2 + $0x240] sm:$0xff] }
  0x89   :  { %4548 = vmatpush3.bf16.msra.mxu1 %v4547_v9  ;;  %4069 = vmatprep.mubr.msk.f32.mxu1 %vm5226_vm0, %v5227_v1  ;;  %v601_v9 = vld [vmem:[#allocation2 + $0x248] sm:$0xff] }
  0x8a   :  { %4455 = vmatpush3.bf16.msra.mxu0 %v5443_v45  ;;  %4549 = vmatprep.subr.bf16.mxu1 %v5225_v0  ;;  %v4517_v11 = vpack.c.bf16 %v601_v9, %v600_v8  ;;  %v927_v8 = vld [vmem:[#allocation6 + $0x160] sm:$0xff]  ;;  %v929_v9 = vld [vmem:[#allocation6 + $0x170] sm:$0xff] }
  0x8b   :  { %4456 = vmatprep.subr.bf16.mxu0 %v5225_v0 }
  0x8d   :  { %3858 = vmatmul.mubr.f32.vlgmr.msra.gmra.mrb[14].mxu0 %v71_v54  ;;  %4551 = vmatpush3.bf16.msra.mxu1 %v4550_v21  ;;  %v595_v54 = vld [vmem:[#allocation2 + $0x218] sm:$0xff]  ;;  %v605_v21 = vld [vmem:[#allocation2 + $0x268] sm:$0xff] }
  0x8e   :  { %4458 = vmatpush3.bf16.msra.mxu0 %v5458_v55  ;;  %3860 = vmatprep.mubr.msk.f32.mxu0 %vm5226_vm0, %v5227_v1  ;;  %v4508_v57 = vpack.c.bf16 %v595_v54, %v594_v53  ;;  %v4523_v24 = vpack.c.bf16 %v605_v21, %v604_v20  ;;  %v919_v53 = vld [vmem:[#allocation6 + $0x120] sm:$0xff]  ;;  %v921_v54 = vld [vmem:[#allocation6 + $0x130] sm:$0xff] }
  0x8f   :  { %4459 = vmatprep.subr.bf16.mxu0 %v5225_v0  ;;  %4712 = vmatprep.subr.bf16.mxu1 %v5225_v0  ;;  %v931_v21 = vld [vmem:[#allocation6 + $0x180] sm:$0xff] }
  0x90   :  { %4070 = vmatmul.mubr.f32.vlgmr.msra.gmra.mrb[14].mxu1 %v3433_v28  ;;  %v607_v28 = vld [vmem:[#allocation2 + $0x278] sm:$0xff] }
  0x91   :  { %3861 = vmatmul.mubr.f32.gmra.mrb[16].mxu0 %v72_v63  ;;  %4072 = vmatprep.mubr.msk.f32.mxu1 %vm5226_vm0, %v5227_v1  ;;  %v598_v63 = vld [vmem:[#allocation2 + $0x230] sm:$0xff] }
  0x92   :  { %4461 = vmatpush3.bf16.msra.mxu0 %v5473_v2  ;;  %3863 = vmatprep.mubr.msk.f32.mxu0 %vm5226_vm0, %v5227_v1  ;;  %v4514_v6 = vpack.c.bf16 %v599_v3, %v598_v63  ;;  %v928_v3 = vld [vmem:[#allocation6 + $0x168] sm:$0xff] }
  0x93   :  { %4462 = vmatprep.subr.bf16.mxu0 %v5225_v0  ;;  %4714 = vmatpush3.bf16.msra.mxu1 %v5319_v5  ;;  %v3435_v5 = vld [vmem:[%s6440_s0 + $0x240] sm:$0xff] }
  0x94   :  { %4715 = vmatprep.subr.bf16.mxu1 %v5225_v0  ;;  %4073 = vmatmul.mubr.f32.gmra.mrb[16].mxu1 %v3434_v34  ;;  %v3448_v34 = vld [vmem:[%s6440_s0 + $0xa8] sm:$0xff] }
  0x95   :  { %3864 = vmatmul.mubr.f32.gmra.mrb[18].mxu0 %v73_v14  ;;  %4075 = vmatprep.mubr.msk.f32.mxu1 %vm5226_vm0, %v5227_v1  ;;  %v603_v14 = vld [vmem:[#allocation2 + $0x258] sm:$0xff] }
  0x96   :  { %4464 = vmatpush3.bf16.msra.mxu0 %v5488_v15  ;;  %3866 = vmatprep.mubr.msk.f32.mxu0 %vm5226_vm0, %v5227_v1  ;;  %v4520_v17 = vpack.c.bf16 %v603_v14, %v602_v12  ;;  %v2132_v12 = vld [vmem:[#allocation2 + $0x1a8] sm:$0xff] }
  0x97   :  { %4465 = vmatprep.subr.bf16.mxu0 %v5225_v0  ;;  %4717 = vmatpush3.bf16.msra.mxu1 %v5322_v7  ;;  %v3436_v7 = vld [vmem:[%s6440_s0 + $0x248] sm:$0xff] }
  0x98   :  { %4718 = vmatprep.subr.bf16.mxu1 %v5225_v0  ;;  %4076 = vmatmul.mubr.f32.gmra.mrb[18].mxu1 %v3435_v5  ;;  %v3432_v5 = vld [vmem:[%s6440_s0 + $0x1f0] sm:$0x1] }
  0x99   :  { %3867 = vmatmul.mubr.f32.gmra.mrb[20].mxu0 %v74_v22  ;;  %4078 = vmatprep.mubr.msk.f32.mxu1 %vm5226_vm0, %v5227_v1  ;;  %v3418_v22 = vld [vmem:[%s6440_s0 + $0x110] sm:$0x1] }
  0x9a   :  { %4467 = vmatpush3.bf16.msra.mxu0 %v5500_v23  ;;  %3869 = vmatprep.mubr.msk.f32.mxu0 %vm5226_vm0, %v5227_v1 }
  0x9b   :  { %4468 = vmatprep.subr.bf16.mxu0 %v5225_v0  ;;  %4720 = vmatpush3.bf16.msra.mxu1 %v5326_v10  ;;  %v3437_v10 = vld [vmem:[%s6440_s0 + $0x250] sm:$0xff] }
  0x9c   :  { %4721 = vmatprep.subr.bf16.mxu1 %v5225_v0  ;;  %4079 = vmatmul.mubr.f32.gmra.mrb[20].mxu1 %v3436_v7  ;;  %v915_v7 = vld [vmem:[#allocation6 + $0x100] sm:$0xff] }
  0x9d   :  { %3870 = vmatmul.mubr.f32.gmra.mrb[22].mxu0 %v75_v29  ;;  %4081 = vmatprep.mubr.msk.f32.mxu1 %vm5226_vm0, %v5227_v1  ;;  %v4526_v29 = vpack.c.bf16 %v607_v28, %v606_v25  ;;  %v4554_v49 = vpack.c.bf16 %v917_v48, %v915_v7  ;;  %v2133_v25 = vld [vmem:[#allocation2 + $0x1b0] sm:$0xff]  ;;  %v2134_v28 = vld [vmem:[#allocation2 + $0x1b8] sm:$0xff]  ;;  %v943_v48 = vld [vmem:[#allocation6 + $0x1e0] sm:$0xff] }
  0x9e   :  { %4470 = vmatpush3.bf16.msra.mxu0 %v5513_v30  ;;  %3872 = vmatprep.mubr.msk.f32.mxu0 %vm5226_vm0, %v5227_v1 }
  0x9f   :  { %4471 = vmatprep.subr.bf16.mxu0 %v5225_v0  ;;  %4723 = vmatpush3.bf16.msra.mxu1 %v5330_v13  ;;  %v3438_v13 = vld [vmem:[%s6440_s0 + $0x258] sm:$0xff] }
  0xa0   :  { %4724 = vmatprep.subr.bf16.mxu1 %v5225_v0  ;;  %4082 = vmatmul.mubr.f32.gmra.mrb[22].mxu1 %v3437_v10  ;;  %v920_v10 = vld [vmem:[#allocation6 + $0x128] sm:$0xff] }
  0xa1   :  { %3873 = vmatmul.mubr.f32.gmra.mrb[24].mxu0 %v76_v35  ;;  %4084 = vmatprep.mubr.msk.f32.mxu1 %vm5226_vm0, %v5227_v1  ;;  %v3428_v35 = vld [vmem:[%s6440_s0 + $0x1d0] sm:$0xff] }
  0xa2   :  { %4473 = vmatpush3.bf16.msra.mxu0 %v5529_v37  ;;  %3875 = vmatprep.mubr.msk.f32.mxu0 %vm5226_vm0, %v5227_v1 }
  0xa3   :  { %4474 = vmatprep.subr.bf16.mxu0 %v5225_v0  ;;  %4726 = vmatpush3.bf16.msra.mxu1 %v5334_v18  ;;  %v3439_v18 = vld [vmem:[%s6440_s0 + $0x260] sm:$0x1] }
  0xa4   :  { %4727 = vmatprep.subr.bf16.mxu1 %v5225_v0  ;;  %4085 = vmatmul.mubr.f32.gmra.mrb[24].mxu1 %v3438_v13  ;;  %v3455_v13 = vld [vmem:[%s6440_s0 + $0x118] sm:$0xff] }
  0xa5   :  { %3876 = vmatmul.mubr.f32.gmra.mrb[26].mxu0 %v77_v41  ;;  %4087 = vmatprep.mubr.msk.f32.mxu1 %vm5226_vm0, %v5227_v1  ;;  %v3453_v41 = vld [vmem:[%s6440_s0 + $0xd0] sm:$0xff] }
  0xa6   :  { %4476 = vmatpush3.bf16.msra.mxu0 %v5545_v42  ;;  %3910 = vmatprep.mubr.msk.f32.mxu0 %vm5226_vm0, %v5227_v1 }
  0xa7   :  { %4477 = vmatprep.subr.bf16.mxu0 %v5225_v0  ;;  %4729 = vmatpush3.bf16.msra.mxu1 %v5342_v27  ;;  %v3415_v27 = vld [vmem:[%s6440_s0 + $0xf8] sm:$0xff] }
  0xa8   :  { %4730 = vmatprep.subr.bf16.mxu1 %v5225_v0  ;;  %4088 = vmatmul.mubr.f32.gmra.mrb[26].mxu1 %v3439_v18  ;;  %v925_v18 = vld [vmem:[#allocation6 + $0x150] sm:$0xff] }
  0xa9   :  { %4122 = vmatprep.mubr.msk.f32.mxu1 %vm5226_vm0, %v5227_v1 }
  0xaa   :  { %4479 = vmatpush3.bf16.msra.mxu0 %v5556_v47 }
  0xab   :  { %4504 = vmatprep.subr.bf16.mxu0 %v5225_v0  ;;  %4732 = vmatpush3.bf16.msra.mxu1 %v5347_v33  ;;  %v3416_v33 = vld [vmem:[%s6440_s0 + $0x100] sm:$0xff] }
  0xac   :  { %4733 = vmatprep.subr.bf16.mxu1 %v5225_v0 }
  0xad   :  { %3911 = vmatmul.mubr.f32.vlgmr.msra.gmra.mrb[28].mxu0 %v3412_v50  ;;  %v922_v50 = vld [vmem:[#allocation6 + $0x138] sm:$0xff] }
  0xae   :  { %4506 = vmatpush3.bf16.msra.mxu0 %v4505_v51  ;;  %3913 = vmatprep.mubr.msk.f32.mxu0 %vm5226_vm0, %v5227_v1  ;;  %v4556_v51 = vpack.c.bf16 %v922_v50, %v920_v10  ;;  %v2139_v10 = vld [vmem:[#allocation2 + $0x1e0] sm:$0xff]  ;;  %v2140_v50 = vld [vmem:[#allocation2 + $0x1e8] sm:$0xff] }
  0xaf   :  { %4507 = vmatprep.subr.bf16.mxu0 %v5225_v0  ;;  %4735 = vmatpush3.bf16.msra.mxu1 %v5352_v39  ;;  %v3417_v39 = vld [vmem:[%s6440_s0 + $0x108] sm:$0xff] }
  0xb0   :  { %4736 = vmatprep.subr.bf16.mxu1 %v5225_v0 }
  0xb1   :  { %3914 = vmatmul.mubr.f32.gmra.mrb[30].mxu0 %v3413_v56  ;;  %v924_v56 = vld [vmem:[#allocation6 + $0x148] sm:$0xff] }
  0xb2   :  { %4509 = vmatpush3.bf16.msra.mxu0 %v4508_v57  ;;  %3916 = vmatprep.mubr.msk.f32.mxu0 %vm5226_vm0, %v5227_v1  ;;  %v926_v57 = vld [vmem:[#allocation6 + $0x158] sm:$0xff] }
  0xb3   :  { %4510 = vmatprep.subr.bf16.mxu0 %v5225_v0  ;;  %4123 = vmatmul.mubr.f32.vlgmr.msra.gmra.mrb[28].mxu1 %v3448_v34  ;;  %v4560_v58 = vpack.c.bf16 %v926_v57, %v924_v56  ;;  %v938_v34 = vld [vmem:[#allocation6 + $0x1b8] sm:$0xff]  ;;  %v2141_v56 = vld [vmem:[#allocation2 + $0x1f0] sm:$0xff] }
  0xb4   :  { %4738 = vmatpush3.bf16.msra.mxu1 %v5360_v46  ;;  %4125 = vmatprep.mubr.msk.f32.mxu1 %vm5226_vm0, %v5227_v1  ;;  %v3449_v46 = vld [vmem:[%s6440_s0 + $0xb0] sm:$0xff]  ;;  %v2142_v57 = vld [vmem:[#allocation2 + $0x1f8] sm:$0xff] }
  0xb5   :  { %3917 = vmatmul.mubr.f32.gmra.mrb[32].mxu0 %v3414_v61  ;;  %4739 = vmatprep.subr.bf16.mxu1 %v5225_v0  ;;  %v2129_v61 = vld [vmem:[#allocation2 + $0x190] sm:$0xff] }
  0xb6   :  { %4512 = vmatpush3.bf16.msra.mxu0 %v4511_v62  ;;  %3919 = vmatprep.mubr.msk.f32.mxu0 %vm5226_vm0, %v5227_v1  ;;  %v2130_v62 = vld [vmem:[#allocation2 + $0x198] sm:$0xff] }
  0xb7   :  { %4513 = vmatprep.subr.bf16.mxu0 %v5225_v0  ;;  %4126 = vmatmul.mubr.f32.gmra.mrb[30].mxu1 %v3449_v46  ;;  %v4788_v63 = vpack.c.bf16 %v2130_v62, %v2129_v61  ;;  %v937_v46 = vld [vmem:[#allocation6 + $0x1b0] sm:$0xff]  ;;  %v3462_v62 = vld [vmem:[%s6440_s0 + $0x188] sm:$0xff] }
  0xb8   :  { %4741 = vmatpush3.bf16.msra.mxu1 %v5365_v52  ;;  %4128 = vmatprep.mubr.msk.f32.mxu1 %vm5226_vm0, %v5227_v1  ;;  %v3431_v52 = vld [vmem:[%s6440_s0 + $0x1e8] sm:$0xff] }
  0xb9   :  { %3920 = vmatmul.mubr.f32.gmra.mrb[34].mxu0 %v3415_v27  ;;  %4742 = vmatprep.subr.bf16.mxu1 %v5225_v0  ;;  %v930_v27 = vld [vmem:[#allocation6 + $0x178] sm:$0xff] }
  0xba   :  { %4515 = vmatpush3.bf16.msra.mxu0 %v4514_v6  ;;  %3922 = vmatprep.mubr.msk.f32.mxu0 %vm5226_vm0, %v5227_v1  ;;  %v4564_v6 = vpack.c.bf16 %v930_v27, %v928_v3  ;;  %v2261_v3 = vld [vmem:[#allocation2 + $0x218] sm:$0xff] }
  0xbb   :  { %4516 = vmatprep.subr.bf16.mxu0 %v5225_v0 }
  0xbc   :  { %4744 = vmatpush3.bf16.msra.mxu1 %v5375_v59  ;;  %v3450_v59 = vld [vmem:[%s6440_s0 + $0xb8] sm:$0xff] }
  0xbd   :  { %3923 = vmatmul.mubr.f32.gmra.mrb[36].mxu0 %v3416_v33  ;;  %4745 = vmatprep.subr.bf16.mxu1 %v5225_v0  ;;  %v4566_v33 = vpack.c.bf16 %v929_v9, %v927_v8  ;;  %v2263_v8 = vld [vmem:[#allocation2 + $0x228] sm:$0xff]  ;;  %v3463_v9 = vld [vmem:[%s6440_s0 + $0x190] sm:$0xff] }
  0xbe   :  { %4518 = vmatpush3.bf16.msra.mxu0 %v4517_v11  ;;  %3925 = vmatprep.mubr.msk.f32.mxu0 %vm5226_vm0, %v5227_v1  ;;  %v2131_v11 = vld [vmem:[#allocation2 + $0x1a0] sm:$0xff] }
  0xbf   :  { %4519 = vmatprep.subr.bf16.mxu0 %v5225_v0  ;;  %4129 = vmatmul.mubr.f32.gmra.mrb[32].mxu1 %v3450_v59  ;;  %v4791_v14 = vpack.c.bf16 %v2132_v12, %v2131_v11  ;;  %v2136_v59 = vld [vmem:[#allocation2 + $0x1c8] sm:$0xff]  ;;  %v2264_v11 = vld [vmem:[#allocation2 + $0x230] sm:$0xff]  ;;  %v2265_v12 = vld [vmem:[#allocation2 + $0x238] sm:$0xff] }
  0xc0   :  { %4747 = vmatpush3.bf16.msra.mxu1 %v5385_v4  ;;  %4131 = vmatprep.mubr.msk.f32.mxu1 %vm5226_vm0, %v5227_v1  ;;  %v3451_v4 = vld [vmem:[%s6440_s0 + $0xc0] sm:$0xff] }
  0xc1   :  { %3926 = vmatmul.mubr.f32.gmra.mrb[38].mxu0 %v3417_v39  ;;  %4748 = vmatprep.subr.bf16.mxu1 %v5225_v0  ;;  %v932_v39 = vld [vmem:[#allocation6 + $0x188] sm:$0xff] }
  0xc2   :  { %4521 = vmatpush3.bf16.msra.mxu0 %v4520_v17  ;;  %3928 = vmatprep.mubr.msk.f32.mxu0 %vm5226_vm0, %v5227_v1  ;;  %v934_v17 = vld [vmem:[#allocation6 + $0x198] sm:$0xff] }
  0xc3   :  { %4522 = vmatprep.subr.bf16.mxu0 %v5225_v0  ;;  %4132 = vmatmul.mubr.f32.gmra.mrb[34].mxu1 %v3451_v4  ;;  %v4568_v20 = vpack.c.bf16 %v934_v17, %v932_v39  ;;  %v3458_v4 = vld [vmem:[%s6440_s0 + $0x130] sm:$0xff]  ;;  %v3464_v39 = vld [vmem:[%s6440_s0 + $0x198] sm:$0xff]  ;;  %v4818_v17 = vpack.c.bf16 %v2265_v12, %v2264_v11 }
  0xc4   :  { %4750 = vmatpush3.bf16.msra.mxu1 %v5398_v16  ;;  %4134 = vmatprep.mubr.msk.f32.mxu1 %vm5226_vm0, %v5227_v1  ;;  %v3452_v16 = vld [vmem:[%s6440_s0 + $0xc8] sm:$0xff] }
  0xc5   :  { %3929 = vmatmul.mubr.f32.gmra.mrb[40].mxu0 %v3418_v22  ;;  %4751 = vmatprep.subr.bf16.mxu1 %v5225_v0  ;;  %v933_v22 = vld [vmem:[#allocation6 + $0x190] sm:$0xff] }
  0xc6   :  { %4524 = vmatpush3.bf16.msra.mxu0 %v4523_v24  ;;  %4016 = vmatprep.mubr.msk.f32.mxu0 %vm5226_vm0, %v5227_v1  ;;  %v4570_v24 = vpack.c.bf16 %v933_v22, %v931_v21  ;;  %v2266_v21 = vld [vmem:[#allocation2 + $0x240] sm:$0xff]  ;;  %v2267_v22 = vld [vmem:[#allocation2 + $0x248] sm:$0xff] }
  0xc7   :  { %4525 = vmatprep.subr.bf16.mxu0 %v5225_v0  ;;  %4135 = vmatmul.mubr.f32.gmra.mrb[36].mxu1 %v3452_v16  ;;  %v940_v16 = vld [vmem:[#allocation6 + $0x1c8] sm:$0xff] }
  0xc8   :  { %4753 = vmatpush3.bf16.msra.mxu1 %v5413_v26  ;;  %4137 = vmatprep.mubr.msk.f32.mxu1 %vm5226_vm0, %v5227_v1  ;;  %v3454_v26 = vld [vmem:[%s6440_s0 + $0xd8] sm:$0x1] }
  0xc9   :  { %4754 = vmatprep.subr.bf16.mxu1 %v5225_v0 }
  0xca   :  { %4527 = vmatpush3.bf16.msra.mxu0 %v4526_v29  ;;  %v4794_v29 = vpack.c.bf16 %v2134_v28, %v2133_v25  ;;  %v3465_v25 = vld [vmem:[%s6440_s0 + $0x1a0] sm:$0xff]  ;;  %v4821_v28 = vpack.c.bf16 %v2267_v22, %v2266_v21 }
  0xcb   :  { %4138 = vmatmul.mubr.f32.gmra.mrb[38].mxu1 %v3453_v41  ;;  %v942_v41 = vld [vmem:[#allocation6 + $0x1d8] sm:$0xff] }
  0xcc   :  { %4756 = vmatpush3.bf16.msra.mxu1 %v5428_v36  ;;  %4140 = vmatprep.mubr.msk.f32.mxu1 %vm5226_vm0, %v5227_v1  ;;  %v3441_v36 = vld [vmem:[%s6440_s0 + $0x38] sm:$0xff] }
  0xcd   :  { %4017 = vmatmul.mubr.f32.vlgmr.msra.gmra.mrb[42].mxu0 %v3426_v31  ;;  %4757 = vmatprep.subr.bf16.mxu1 %v5225_v0  ;;  %v3457_v31 = vld [vmem:[%s6440_s0 + $0x128] sm:$0xff] }
  0xce   :  { %4019 = vmatprep.mubr.msk.f32.mxu0 %vm5226_vm0, %v5227_v1 }
  0xcf   :  { %4141 = vmatmul.mubr.f32.gmra.mrb[40].mxu1 %v3454_v26  ;;  %v4576_v26 = vpack.c.bf16 %v942_v41, %v940_v16 }
  0xd0   :  { %4759 = vmatpush3.bf16.msra.mxu1 %v5443_v45  ;;  %4175 = vmatprep.mubr.msk.f32.mxu1 %vm5226_vm0, %v5227_v1  ;;  %v3442_v45 = vld [vmem:[%s6440_s0 + $0x40] sm:$0xff] }
  0xd1   :  { %4020 = vmatmul.mubr.f32.gmra.mrb[44].mxu0 %v3427_v32  ;;  %4760 = vmatprep.subr.bf16.mxu1 %v5225_v0  ;;  %v936_v32 = vld [vmem:[#allocation6 + $0x1a8] sm:$0xff] }
  0xd2   :  { %4022 = vmatprep.mubr.msk.f32.mxu0 %vm5226_vm0, %v5227_v1 }
  0xd3   :  { %4176 = vmatmul.mubr.f32.vlgmr.msra.gmra.mrb[42].mxu1 %v3441_v36  ;;  %v939_v36 = vld [vmem:[#allocation6 + $0x1c0] sm:$0xff] }
  0xd4   :  { %4762 = vmatpush3.bf16.msra.mxu1 %v5458_v55  ;;  %4178 = vmatprep.mubr.msk.f32.mxu1 %vm5226_vm0, %v5227_v1  ;;  %v3443_v55 = vld [vmem:[%s6440_s0 + $0x48] sm:$0xff] }
  0xd5   :  { %4023 = vmatmul.mubr.f32.gmra.mrb[46].mxu0 %v3428_v35  ;;  %4763 = vmatprep.subr.bf16.mxu1 %v5225_v0  ;;  %v4572_v35 = vpack.c.bf16 %v938_v34, %v936_v32  ;;  %v2269_v32 = vld [vmem:[#allocation2 + $0x258] sm:$0xff] }
  0xd6   :  { %4025 = vmatprep.mubr.msk.f32.mxu0 %vm5226_vm0, %v5227_v1 }
  0xd7   :  { %4179 = vmatmul.mubr.f32.gmra.mrb[44].mxu1 %v3442_v45  ;;  %v941_v45 = vld [vmem:[#allocation6 + $0x1d0] sm:$0xff] }
  0xd8   :  { %4765 = vmatpush3.bf16.msra.mxu1 %v5473_v2  ;;  %4181 = vmatprep.mubr.msk.f32.mxu1 %vm5226_vm0, %v5227_v1  ;;  %v3444_v2 = vld [vmem:[%s6440_s0 + $0x50] sm:$0xff] }
  0xd9   :  { %4026 = vmatmul.mubr.f32.gmra.mrb[48].mxu0 %v3429_v38  ;;  %4766 = vmatprep.subr.bf16.mxu1 %v5225_v0  ;;  %v935_v38 = vld [vmem:[#allocation6 + $0x1a0] sm:$0xff] }
  0xda   :  { %4028 = vmatprep.mubr.msk.f32.mxu0 %vm5226_vm0, %v5227_v1 }
  0xdb   :  { %4182 = vmatmul.mubr.f32.gmra.mrb[46].mxu1 %v3443_v55  ;;  %v4578_v55 = vpack.c.bf16 %v941_v45, %v939_v36  ;;  %v2272_v36 = vld [vmem:[#allocation2 + $0x270] sm:$0xff]  ;;  %v2273_v45 = vld [vmem:[#allocation2 + $0x278] sm:$0xff] }
  0xdc   :  { %4768 = vmatpush3.bf16.msra.mxu1 %v5488_v15  ;;  %4184 = vmatprep.mubr.msk.f32.mxu1 %vm5226_vm0, %v5227_v1  ;;  %v3445_v15 = vld [vmem:[%s6440_s0 + $0x58] sm:$0xff] }
  0xdd   :  { %4029 = vmatmul.mubr.f32.gmra.mrb[50].mxu0 %v3430_v40  ;;  %4769 = vmatprep.subr.bf16.mxu1 %v5225_v0  ;;  %v4574_v40 = vpack.c.bf16 %v937_v46, %v935_v38 }
  0xde   :  { %4031 = vmatprep.mubr.msk.f32.mxu0 %vm5226_vm0, %v5227_v1 }
  0xdf   :  { %4185 = vmatmul.mubr.f32.gmra.mrb[48].mxu1 %v3444_v2  ;;  %v2137_v2 = vld [vmem:[#allocation2 + $0x1d0] sm:$0xff] }
  0xe0   :  { %4771 = vmatpush3.bf16.msra.mxu1 %v5500_v23  ;;  %4187 = vmatprep.mubr.msk.f32.mxu1 %vm5226_vm0, %v5227_v1  ;;  %v3446_v23 = vld [vmem:[%s6440_s0 + $0x60] sm:$0xff] }
  0xe1   :  { %4032 = vmatmul.mubr.f32.gmra.mrb[52].mxu0 %v3431_v52  ;;  %4772 = vmatprep.subr.bf16.mxu1 %v5225_v0  ;;  %v2135_v52 = vld [vmem:[#allocation2 + $0x1c0] sm:$0xff] }
  0xe2   :  { %4034 = vmatprep.mubr.msk.f32.mxu0 %vm5226_vm0, %v5227_v1 }
  0xe3   :  { %4188 = vmatmul.mubr.f32.gmra.mrb[50].mxu1 %v3445_v15  ;;  %v2138_v15 = vld [vmem:[#allocation2 + $0x1d8] sm:$0xff] }
  0xe4   :  { %4774 = vmatpush3.bf16.msra.mxu1 %v5513_v30  ;;  %4190 = vmatprep.mubr.msk.f32.mxu1 %vm5226_vm0, %v5227_v1  ;;  %v916_v30 = vld [vmem:[#allocation6 + $0x108] sm:$0xff] }
  0xe5   :  { %4035 = vmatmul.mubr.f32.gmra.mrb[54].mxu0 %v3432_v5  ;;  %4775 = vmatprep.subr.bf16.mxu1 %v5225_v0  ;;  %v4552_v44 = vpack.c.bf16 %v918_v43, %v916_v30  ;;  %v4797_v5 = vpack.c.bf16 %v2136_v59, %v2135_v52  ;;  %v3459_v30 = vld [vmem:[%s6440_s0 + $0x138] sm:$0xff]  ;;  %v944_v43 = vld [vmem:[#allocation6 + $0x1e8] sm:$0xff] }
  0xe6   :  { %1035 = vmatprep.mubr.f32.mxu0 %v5227_v1  ;;  %v2271_v52 = vld [vmem:[#allocation2 + $0x268] sm:$0xff] }
  0xe7   :  { %4191 = vmatmul.mubr.f32.gmra.mrb[52].mxu1 %v3446_v23  ;;  %4553 = vmatprep.subr.bf16.mxu0 %v4552_v44  ;;  %v4800_v23 = vpack.c.bf16 %v2138_v15, %v2137_v2  ;;  %v946_v44 = vld [vmem:[#allocation6 + $0x1f8] sm:$0xff]  ;;  %v3468_v2 = vld [vmem:[%s6440_s0 + $0x1b8] sm:$0x1]  ;;  %v4830_v15 = vpack.c.bf16 %v2273_v45, %v2272_v36 }
  0xe8   :  { %4777 = vmatpush3.bf16.msra.mxu1 %v5529_v37  ;;  %4193 = vmatprep.mubr.msk.f32.mxu1 %vm5226_vm0, %v5227_v1  ;;  %v3447_v37 = vld [vmem:[%s6440_s0 + $0x68] sm:$0x1]  ;;  %v4580_v7 = vpack.c.bf16 %v946_v44, %v944_v43 }
  0xe9   :  { %4778 = vmatprep.subr.bf16.mxu1 %v5225_v0  ;;  %4555 = vmatpush1.bf16.msra.mxu0 %v4554_v49  ;;  %v945_v49 = vld [vmem:[#allocation6 + $0x1f0] sm:$0xff] }
  0xea   :  { %4557 = vmatprep.subr.bf16.mxu0 %v4556_v51  ;;  %v4803_v51 = vpack.c.bf16 %v2140_v50, %v2139_v10 }
  0xeb   :  { %4194 = vmatmul.mubr.f32.gmra.mrb[54].mxu1 %v3447_v37  ;;  %v4582_v37 = vpack.c.bf16 %v945_v49, %v943_v48 }
  0xec   :  { %4780 = vmatpush3.bf16.msra.mxu1 %v5545_v42  ;;  %v4558_v42 = vpack.c.bf16 %v921_v54, %v919_v53  ;;  %4228 = vmatprep.mubr.msk.f32.mxu1 %vm5226_vm0, %v5227_v1  ;;  %v3460_v53 = vld [vmem:[%s6440_s0 + $0x140] sm:$0xff]  ;;  %v883_v54 = vld [vmem:[#allocation6 + $0x8] sm:$0xff] }
  0xed   :  { %4781 = vmatprep.subr.bf16.mxu1 %v5225_v0 }
  0xee   :  { %4559 = vmatpush1.bf16.msra.mxu0 %v4558_v42  ;;  %v885_v42 = vld [vmem:[#allocation6 + $0x18] sm:$0xff] }
  0xef   :  { %4561 = vmatprep.subr.bf16.mxu0 %v4560_v58  ;;  %v4806_v58 = vpack.c.bf16 %v2142_v57, %v2141_v56 }
  0xf0   :  { %4783 = vmatpush3.bf16.msra.mxu1 %v5556_v47  ;;  %v4562_v47 = vpack.c.bf16 %v925_v18, %v923_v60  ;;  %v3461_v60 = vld [vmem:[%s6440_s0 + $0x148] sm:$0x1]  ;;  %v2258_v18 = vld [vmem:[#allocation2 + $0x200] sm:$0xff] }
  0xf1   :  { %4784 = vmatprep.subr.bf16.mxu1 %v5225_v0 }
  0xf2   :  { %4563 = vmatpush1.bf16.msra.mxu0 %v4562_v47  ;;  %v2259_v47 = vld [vmem:[#allocation2 + $0x208] sm:$0xff] }
  0xf3   :  { %4229 = vmatmul.mubr.f32.vlgmr.msra.gmra.mrb[56].mxu1 %v3455_v13  ;;  %4565 = vmatprep.subr.bf16.mxu0 %v4564_v6  ;;  %v4584_v13 = vpack.c.bf16 %v885_v42, %v883_v54  ;;  %v4809_v61 = vpack.c.bf16 %v2259_v47, %v2258_v18  ;;  %v2262_v6 = vld [vmem:[#allocation2 + $0x220] sm:$0xff] }
  0xf4   :  { %4786 = vmatpush3.bf16.msra.mxu1 %v5336_v19  ;;  %4231 = vmatprep.mubr.msk.f32.mxu1 %vm5226_vm0, %v5227_v1  ;;  %v3456_v19 = vld [vmem:[%s6440_s0 + $0x120] sm:$0xff] }
  0xf5   :  { %4787 = vmatprep.subr.bf16.mxu1 %v5225_v0 }
  0xf6   :  { %4567 = vmatpush1.bf16.msra.mxu0 %v4566_v33  ;;  %v4815_v33 = vpack.c.bf16 %v2263_v8, %v2262_v6 }
  0xf7   :  { %4232 = vmatmul.mubr.f32.gmra.mrb[58].mxu1 %v3456_v19  ;;  %4569 = vmatprep.subr.bf16.mxu0 %v4568_v20 }
  0xf8   :  { %4789 = vmatpush3.bf16.msra.mxu1 %v4788_v63  ;;  %4234 = vmatprep.mubr.msk.f32.mxu1 %vm5226_vm0, %v5227_v1  ;;  %v2260_v63 = vld [vmem:[#allocation2 + $0x210] sm:$0xff] }
  0xf9   :  { %4790 = vmatprep.subr.bf16.mxu1 %v5225_v0  ;;  %v4812_v27 = vpack.c.bf16 %v2261_v3, %v2260_v63  ;;  %v3472_v63 = vld [vmem:[%s6440_s0 + $0x210] sm:$0xff] }
  0xfa   :  { %4571 = vmatpush1.bf16.msra.mxu0 %v4570_v24 }
  0xfb   :  { %4235 = vmatmul.mubr.f32.gmra.mrb[60].mxu1 %v3457_v31  ;;  %4573 = vmatprep.subr.bf16.mxu0 %v4572_v35  ;;  %v2268_v31 = vld [vmem:[#allocation2 + $0x250] sm:$0xff]  ;;  %v3466_v35 = vld [vmem:[%s6440_s0 + $0x1a8] sm:$0xff] }
  0xfc   :  { %4792 = vmatpush3.bf16.msra.mxu1 %v4791_v14  ;;  %4237 = vmatprep.mubr.msk.f32.mxu1 %vm5226_vm0, %v5227_v1  ;;  %v4824_v38 = vpack.c.bf16 %v2269_v32, %v2268_v31 }
  0xfd   :  { %4793 = vmatprep.subr.bf16.mxu1 %v5225_v0 }
  0xfe   :  { %4575 = vmatpush1.bf16.msra.mxu0 %v4574_v40  ;;  %v2270_v40 = vld [vmem:[#allocation2 + $0x260] sm:$0xff] }
  0xff   :  { %4238 = vmatmul.mubr.f32.gmra.mrb[62].mxu1 %v3458_v4  ;;  %4577 = vmatprep.subr.bf16.mxu0 %v4576_v26  ;;  %v4827_v4 = vpack.c.bf16 %v2271_v52, %v2270_v40 }
 0x100   :  { %4795 = vmatpush3.bf16.msra.mxu1 %v4794_v29  ;;  %4240 = vmatprep.mubr.msk.f32.mxu1 %vm5226_vm0, %v5227_v1 }
 0x101   :  { %4796 = vmatprep.subr.bf16.mxu1 %v5225_v0 }
 0x102   :  { %4579 = vmatpush1.bf16.msra.mxu0 %v4578_v55 }
 0x103   :  { %4241 = vmatmul.mubr.f32.gmra.mrb[64].mxu1 %v3459_v30  ;;  %4581 = vmatprep.subr.bf16.mxu0 %v4580_v7  ;;  %v3469_v7 = vld [vmem:[%s6440_s0 + $0x1f8] sm:$0xff] }
 0x104   :  { %4798 = vmatpush3.bf16.msra.mxu1 %v4797_v5  ;;  %4243 = vmatprep.mubr.msk.f32.mxu1 %vm5226_vm0, %v5227_v1  ;;  %v3467_v5 = vld [vmem:[%s6440_s0 + $0x1b0] sm:$0xff] }
 0x105   :  { %4799 = vmatprep.subr.bf16.mxu1 %v5225_v0 }
 0x106   :  { %4583 = vmatpush1.bf16.msra.mxu0 %v4582_v37 }
 0x107   :  { %4244 = vmatmul.mubr.f32.gmra.mrb[66].mxu1 %v3460_v53  ;;  %4585 = vmatprep.subr.bf16.mxu0 %v4584_v13  ;;  %v3470_v53 = vld [vmem:[%s6440_s0 + $0x200] sm:$0xff] }
 0x108   :  { %4801 = vmatpush3.bf16.msra.mxu1 %v4800_v23  ;;  %4246 = vmatprep.mubr.msk.f32.mxu1 %vm5226_vm0, %v5227_v1 }
 0x109   :  { %4802 = vmatprep.subr.bf16.mxu1 %v5225_v0 }
 0x10b   :  { %4247 = vmatmul.mubr.f32.gmra.mrb[68].mxu1 %v3461_v60 }
 0x10c   :  { %4804 = vmatpush3.bf16.msra.mxu1 %v4803_v51  ;;  %4281 = vmatprep.mubr.msk.f32.mxu1 %vm5226_vm0, %v5227_v1 }
 0x10d   :  { %4805 = vmatprep.subr.bf16.mxu1 %v5225_v0 }
 0x110   :  { %4807 = vmatpush3.bf16.msra.mxu1 %v4806_v58  ;;  %v3471_v58 = vld [vmem:[%s6440_s0 + $0x208] sm:$0xff] }
 0x111   :  { %4808 = vmatprep.subr.bf16.mxu1 %v5225_v0 }
 0x113   :  { %4282 = vmatmul.mubr.f32.vlgmr.msra.gmra.mrb[70].mxu1 %v3462_v62 }
 0x114   :  { %4810 = vmatpush3.bf16.msra.mxu1 %v4809_v61  ;;  %4284 = vmatprep.mubr.msk.f32.mxu1 %vm5226_vm0, %v5227_v1 }
 0x115   :  { %4811 = vmatprep.subr.bf16.mxu1 %v5225_v0 }
 0x117   :  { %4285 = vmatmul.mubr.f32.gmra.mrb[72].mxu1 %v3463_v9 }
 0x118   :  { %4813 = vmatpush3.bf16.msra.mxu1 %v4812_v27  ;;  %4287 = vmatprep.mubr.msk.f32.mxu1 %vm5226_vm0, %v5227_v1 }
 0x119   :  { %4814 = vmatprep.subr.bf16.mxu1 %v5225_v0 }
 0x11b   :  { %4288 = vmatmul.mubr.f32.gmra.mrb[74].mxu1 %v3464_v39 }
 0x11c   :  { %4816 = vmatpush3.bf16.msra.mxu1 %v4815_v33  ;;  %4290 = vmatprep.mubr.msk.f32.mxu1 %vm5226_vm0, %v5227_v1  ;;  %v3473_v33 = vld [vmem:[%s6440_s0 + $0x218] sm:$0xff] }
 0x11d   :  { %4817 = vmatprep.subr.bf16.mxu1 %v5225_v0 }
 0x11f   :  { %4291 = vmatmul.mubr.f32.gmra.mrb[76].mxu1 %v3465_v25 }
 0x120   :  { %4819 = vmatpush3.bf16.msra.mxu1 %v4818_v17  ;;  %4293 = vmatprep.mubr.msk.f32.mxu1 %vm5226_vm0, %v5227_v1 }
 0x121   :  { %4820 = vmatprep.subr.bf16.mxu1 %v5225_v0 }
 0x123   :  { %4294 = vmatmul.mubr.f32.gmra.mrb[78].mxu1 %v3466_v35 }
 0x124   :  { %4822 = vmatpush3.bf16.msra.mxu1 %v4821_v28  ;;  %4296 = vmatprep.mubr.msk.f32.mxu1 %vm5226_vm0, %v5227_v1 }
 0x125   :  { %4823 = vmatprep.subr.bf16.mxu1 %v5225_v0 }
 0x127   :  { %4297 = vmatmul.mubr.f32.gmra.mrb[80].mxu1 %v3467_v5 }
 0x128   :  { %4825 = vmatpush3.bf16.msra.mxu1 %v4824_v38  ;;  %4299 = vmatprep.mubr.msk.f32.mxu1 %vm5226_vm0, %v5227_v1 }
 0x129   :  { %4826 = vmatprep.subr.bf16.mxu1 %v5225_v0 }
 0x12b   :  { %4300 = vmatmul.mubr.f32.gmra.mrb[82].mxu1 %v3468_v2 }
 0x12c   :  { %4828 = vmatpush3.bf16.msra.mxu1 %v4827_v4  ;;  %4334 = vmatprep.mubr.msk.f32.mxu1 %vm5226_vm0, %v5227_v1 }
 0x12d   :  { %4829 = vmatprep.subr.bf16.mxu1 %v5225_v0 }
 0x130   :  { %4831 = vmatpush3.bf16.msra.mxu1 %v4830_v15 }
 0x133   :  { %4335 = vmatmul.mubr.f32.vlgmr.msra.gmra.mrb[84].mxu1 %v3469_v7 }
 0x134   :  { %4337 = vmatprep.mubr.msk.f32.mxu1 %vm5226_vm0, %v5227_v1 }
 0x137   :  { %4338 = vmatmul.mubr.f32.gmra.mrb[86].mxu1 %v3470_v53 }
 0x138   :  { %4340 = vmatprep.mubr.msk.f32.mxu1 %vm5226_vm0, %v5227_v1 }
 0x13b   :  { %4341 = vmatmul.mubr.f32.gmra.mrb[88].mxu1 %v3471_v58 }
 0x13c   :  { %4343 = vmatprep.mubr.msk.f32.mxu1 %vm5226_vm0, %v5227_v1 }
 0x13f   :  { %4344 = vmatmul.mubr.f32.gmra.mrb[90].mxu1 %v3472_v63 }
 0x140   :  { %v5824_v19 = vpop.f32.mrb[0].mxu0  ;;  %4346 = vmatprep.mubr.msk.f32.mxu1 %vm5226_vm0, %v5227_v1 }
 0x141   :  { %v3806_v14 = vpop.f32.mrb[1].mxu0 }
 0x142   :  { %v3474_v14 = vld [vmem:[%s6440_s0 + $0x220] sm:$0xff] }
 0x143   :  { %v5854_v16 = vpop.f32.mrb[0].mxu1  ;;  %4347 = vmatmul.mubr.f32.gmra.mrb[92].mxu1 %v3473_v33 }
 0x144   :  { %v5832_v20 = vpop.f32.mrb[2].mxu0  ;;  %v3965_v41 = vpop.f32.mrb[1].mxu1  ;;  %4349 = vmatprep.mubr.msk.f32.mxu1 %vm5226_vm0, %v5227_v1 }
 0x145   :  { %v3809_v24 = vpop.f32.mrb[3].mxu0 }
 0x146   :  { %v3475_v24 = vld [vmem:[%s6440_s0 + $0x228] sm:$0x1] }
 0x147   :  { %v5862_v23 = vpop.f32.mrb[2].mxu1  ;;  %4350 = vmatmul.mubr.f32.gmra.mrb[94].mxu1 %v3474_v14 }
 0x148   :  { %v5840_v29 = vpop.f32.mrb[4].mxu0  ;;  %v3968_v30 = vpop.f32.mrb[3].mxu1  ;;  %4352 = vmatprep.mubr.msk.f32.mxu1 %vm5226_vm0, %v5227_v1 }
 0x149   :  { %v3812_v34 = vpop.f32.mrb[5].mxu0 }
 0x14b   :  { %v5869_v48 = vpop.f32.mrb[4].mxu1  ;;  %4353 = vmatmul.mubr.f32.gmra.mrb[96].mxu1 %v3475_v24 }
 0x14c   :  { %v5848_v46 = vpop.f32.mrb[6].mxu0  ;;  %v3971_v49 = vpop.f32.mrb[5].mxu1  ;;  %2799 = vmatprep.mubr.f32.mxu1 %v5227_v1 }
 0x14d   :  { %v3815_v59 = vpop.f32.mrb[7].mxu0 }
 0x14f   :  { %v5873_v50 = vpop.f32.mrb[6].mxu1 }
 0x150   :  { %v205_v26 = vpop.f32.mrb[8].mxu0  ;;  %v3974_v51 = vpop.f32.mrb[7].mxu1 }
 0x151   :  { %v3818_v55 = vpop.f32.mrb[9].mxu0 }
 0x153   :  { %v5878_v54 = vpop.f32.mrb[8].mxu1 }
 0x154   :  { %v210_v43 = vpop.f32.mrb[10].mxu0  ;;  %v3977_v42 = vpop.f32.mrb[9].mxu1 }
 0x155   :  { %v3821_v44 = vpop.f32.mrb[11].mxu0 }
 0x157   :  { %v5886_v60 = vpop.f32.mrb[10].mxu1 }
 0x158   :  { %v215_v37 = vpop.f32.mrb[12].mxu0  ;;  %v3980_v18 = vpop.f32.mrb[11].mxu1 }
 0x159   :  { %v3824_v10 = vpop.f32.mrb[13].mxu0 }
 0x15b   :  { %v5894_v3 = vpop.f32.mrb[12].mxu1 }
 0x15c   :  { %v3983_v27 = vpop.f32.mrb[13].mxu1 }
 0x160   :  { %v285_v13 = vpop.f32.mrb[14].mxu0 }
 0x161   :  { %v286_v56 = vadd.f32 %v285_v13, %v5824_v19  ;;  %v3859_v57 = vpop.f32.mrb[15].mxu0 }
 0x163   :  { %v806_v39 = vpop.f32.mrb[14].mxu1 }
 0x164   :  { %v290_v47 = vpop.f32.mrb[16].mxu0  ;;  %v4071_v17 = vpop.f32.mrb[15].mxu1 }
 0x165   :  { %v291_v61 = vadd.f32 %v290_v47, %v5832_v20  ;;  %v3862_v62 = vpop.f32.mrb[17].mxu0 }
 0x167   :  { %v811_v25 = vpop.f32.mrb[16].mxu1 }
 0x168   :  { %v295_v6 = vpop.f32.mrb[18].mxu0  ;;  %v4074_v28 = vpop.f32.mrb[17].mxu1 }
 0x169   :  { %v296_v8 = vadd.f32 %v295_v6, %v5840_v29  ;;  %v3865_v9 = vpop.f32.mrb[19].mxu0 }
 0x16b   :  { %v5914_v34 = vpop.f32.mrb[18].mxu1 }
 0x16c   :  { %v300_v19 = vpop.f32.mrb[20].mxu0  ;;  %v4077_v35 = vpop.f32.mrb[19].mxu1 }
 0x16d   :  { %v301_v11 = vadd.f32 %v300_v19, %v5848_v46  ;;  %v3868_v12 = vpop.f32.mrb[21].mxu0  ;;  %v5937_v19 = vld [vmem:[#allocation4] ss:$0 sm:$0xff] }
 0x16f   :  { %v5916_v52 = vpop.f32.mrb[20].mxu1 }
 0x170   :  { %v305_v20 = vpop.f32.mrb[22].mxu0  ;;  %v4080_v59 = vpop.f32.mrb[21].mxu1 }
 0x171   :  { %v306_v21 = vadd.f32 %v305_v20, %v205_v26  ;;  %v3871_v22 = vpop.f32.mrb[23].mxu0 }
 0x173   :  { %v5918_v5 = vpop.f32.mrb[22].mxu1 }
 0x174   :  { %v310_v29 = vpop.f32.mrb[24].mxu0  ;;  %v4083_v4 = vpop.f32.mrb[23].mxu1 }
 0x175   :  { %v311_v31 = vadd.f32 %v310_v29, %v210_v43  ;;  %v3874_v32 = vpop.f32.mrb[25].mxu0  ;;  %v882_v29 = vld [vmem:[#allocation6] sm:$0xff] }
 0x177   :  { %v5920_v45 = vpop.f32.mrb[24].mxu1 }
 0x178   :  { %v315_v38 = vpop.f32.mrb[26].mxu0  ;;  %v4086_v2 = vpop.f32.mrb[25].mxu1 }
 0x179   :  { %v316_v46 = vadd.f32 %v315_v38, %v215_v37  ;;  %v3877_v40 = vpop.f32.mrb[27].mxu0 }
 0x17a   :  { %v889_v40 = vld [vmem:[#allocation6 + $0x38] sm:$0xff] }
 0x17b   :  { %v5923_v44 = vpop.f32.mrb[26].mxu1 }
 0x17c   :  { %v4089_v49 = vpop.f32.mrb[27].mxu1 }
 0x180   :  { %v410_v41 = vpop.f32.mrb[28].mxu0 }
 0x181   :  { %v444_v26 = vadd.f32 %v410_v41, %v286_v56  ;;  %v3912_v36 = vpop.f32.mrb[29].mxu0 }
 0x183   :  { %v576_v55 = vadd.f32 %v5854_v16, %v444_v26 }
 0x184   :  { %v415_v15 = vpop.f32.mrb[30].mxu0 }
 0x185   :  { %v445_v30 = vadd.f32 %v415_v15, %v291_v61  ;;  %v3915_v43 = vpop.f32.mrb[31].mxu0  ;;  %v886_v15 = vld [vmem:[#allocation6 + $0x20] sm:$0xff] }
 0x187   :  { %v577_v7 = vadd.f32 %v5862_v23, %v445_v30  ;;  %v888_v30 = vld [vmem:[#allocation6 + $0x30] sm:$0xff] }
 0x188   :  { %v420_v37 = vpop.f32.mrb[32].mxu0 }
 0x189   :  { %v446_v10 = vadd.f32 %v420_v37, %v296_v8  ;;  %v3918_v51 = vpop.f32.mrb[33].mxu0 }
 0x18b   :  { %v578_v53 = vadd.f32 %v5869_v48, %v446_v10 }
 0x18c   :  { %v425_v42 = vpop.f32.mrb[34].mxu0 }
 0x18d   :  { %v447_v13 = vadd.f32 %v425_v42, %v301_v11  ;;  %v3921_v56 = vpop.f32.mrb[35].mxu0 }
 0x18e   :  { %v893_v56 = vld [vmem:[#allocation6 + $0x58] sm:$0xff] }
 0x18f   :  { %v579_v57 = vadd.f32 %v5873_v50, %v447_v13  ;;  %v891_v13 = vld [vmem:[#allocation6 + $0x48] sm:$0xff] }
 0x190   :  { %v430_v16 = vpop.f32.mrb[36].mxu0 }
 0x191   :  { %v448_v58 = vadd.f32 %v430_v16, %v306_v21  ;;  %v3924_v18 = vpop.f32.mrb[37].mxu0 }
 0x193   :  { %v5929_v47 = vadd.f32 %v5878_v54, %v448_v58 }
 0x194   :  { %v435_v61 = vpop.f32.mrb[38].mxu0 }
 0x195   :  { %v449_v62 = vadd.f32 %v435_v61, %v311_v31  ;;  %v3927_v23 = vpop.f32.mrb[39].mxu0  ;;  %v884_v31 = vld [vmem:[#allocation6 + $0x10] sm:$0xff] }
 0x196   :  { %v4586_v38 = vpack.c.bf16 %v884_v31, %v882_v29  ;;  %v4590_v23 = vpack.c.bf16 %v888_v30, %v886_v15 }
 0x197   :  { %v5932_v63 = vadd.f32 %v5886_v60, %v449_v62 }
 0x198   :  { %v440_v27 = vpop.f32.mrb[40].mxu0 }
 0x199   :  { %v450_v6 = vadd.f32 %v440_v27, %v316_v46  ;;  %v3930_v48 = vpop.f32.mrb[41].mxu0  ;;  %v887_v46 = vld [vmem:[#allocation6 + $0x28] sm:$0xff] }
 0x19a   :  { %v4588_v51 = vpack.c.bf16 %v889_v40, %v887_v46  ;;  %v892_v48 = vld [vmem:[#allocation6 + $0x50] sm:$0xff] }
 0x19b   :  { %v5935_v8 = vadd.f32 %v5894_v3, %v450_v6  ;;  %v890_v6 = vld [vmem:[#allocation6 + $0x40] sm:$0xff] }
 0x19c   :  { %v4594_v31 = vpack.c.bf16 %v892_v48, %v890_v6 }
 0x1a0   :  { %v674_v9 = vpop.f32.mrb[42].mxu0 }
 0x1a1   :  { %v708_v50 = vadd.f32 %v674_v9, %v576_v55  ;;  %v4018_v33 = vpop.f32.mrb[43].mxu0 }
 0x1a3   :  { %v840_v11 = vadd.f32 %v806_v39, %v708_v50 }
 0x1a4   :  { %v679_v54 = vpop.f32.mrb[44].mxu0 }
 0x1a5   :  { %v854_v12 = vadd.f32 %v5937_v19, %v840_v11  ;;  %v709_v14 = vadd.f32 %v679_v54, %v577_v7  ;;  %v4021_v17 = vpop.f32.mrb[45].mxu0  ;;  %v4592_v54 = vpack.c.bf16 %v893_v56, %v891_v13 }
 0x1a6   :  { %v895_v17 = vld [vmem:[#allocation6 + $0x68] sm:$0xff] }
 0x1a7   :  { %vm861_vm1 = vcmp.ge.f32.partialorder %v854_v12, 0.0  ;;  %v868_v60 = vmul.f32 0.01, %v854_v12  ;;  %v841_v20 = vadd.f32 %v811_v25, %v709_v14 }
 0x1a8   :  { %v684_v21 = vpop.f32.mrb[46].mxu0 }
 0x1a9   :  { %v5940_v22 = vsel %vm861_vm1, %v854_v12, %v868_v60  ;;  %v855_v3 = vadd.f32 %v5937_v19, %v841_v20  ;;  %v710_v24 = vadd.f32 %v684_v21, %v578_v53  ;;  %v4024_v28 = vpop.f32.mrb[47].mxu0  ;;  %v897_v60 = vld [vmem:[#allocation6 + $0x78] sm:$0xff] }
 0x1aa   :  { %v954_v25 = vrot.slane %v5940_v22, 1  ;;  %v1207_v59 = vrot.slane %v5940_v22, 2  ;;  %v1371_v4 = vrot.slane %v5940_v22, 3  ;;  %v1536_v2 = vrot.slane %v5940_v22, 4 }
 0x1ab   :  { %vm862_vm5 = vcmp.ge.f32.partialorder %v855_v3, 0.0  ;;  %v869_v39 = vmul.f32 0.01, %v855_v3  ;;  %v842_v32 = vadd.f32 %v5914_v34, %v710_v24 }
 0x1ac   :  { %v689_v35 = vpop.f32.mrb[48].mxu0 }
 0x1ad   :  { %v5947_v41 = vsel %vm862_vm5, %v855_v3, %v869_v39  ;;  %v856_v26 = vadd.f32 %v5937_v19, %v842_v32  ;;  %v711_v36 = vadd.f32 %v689_v35, %v579_v57  ;;  %v4027_v55 = vpop.f32.mrb[49].mxu0  ;;  %v894_v32 = vld [vmem:[#allocation6 + $0x60] sm:$0xff]  ;;  %v896_v35 = vld [vmem:[#allocation6 + $0x70] sm:$0xff] }
 0x1ae   :  { %v955_v34 = vrot.slane %v5947_v41, 1  ;;  %v1208_v43 = vrot.slane %v5947_v41, 2  ;;  %v1372_v7 = vrot.slane %v5947_v41, 3  ;;  %v1537_v49 = vrot.slane %v5947_v41, 4  ;;  %v901_v55 = vld [vmem:[#allocation6 + $0x98] sm:$0xff] }
 0x1af   :  { %vm863_vm7 = vcmp.ge.f32.partialorder %v856_v26, 0.0  ;;  %v870_v37 = vmul.f32 0.01, %v856_v26  ;;  %v843_v10 = vadd.f32 %v5916_v52, %v711_v36  ;;  %v899_v36 = vld [vmem:[#allocation6 + $0x88] sm:$0xff] }
 0x1b0   :  { %v694_v53 = vpop.f32.mrb[50].mxu0  ;;  %v956_v42 = vsel %vm953_vm2, %v954_v25, %v955_v34  ;;  %v5958_v57 = vsel %vm1206_vm3, %v1207_v59, %v1208_v43  ;;  %v5961_v16 = vsel %vm1370_vm4, %v1371_v4, %v1372_v7  ;;  %v5964_v58 = vsel %vm1535_vm6, %v1536_v2, %v1537_v49 }
 0x1b1   :  { %v5966_v18 = vsel %vm863_vm7, %v856_v26, %v870_v37  ;;  %v857_v61 = vadd.f32 %v5937_v19, %v843_v10  ;;  %v712_v52 = vadd.f32 %v694_v53, %v5929_v47  ;;  %1036 = vmatmul.mubr.f32.vlgmr.msra.gmra.mrb[56].mxu0 %v956_v42  ;;  %v4030_v62 = vpop.f32.mrb[51].mxu0  ;;  %v4596_v59 = vpack.c.bf16 %v897_v60, %v895_v17  ;;  %v898_v10 = vld [vmem:[#allocation6 + $0x80] sm:$0xff]  ;;  %v904_v60 = vld [vmem:[#allocation6 + $0xb0] sm:$0xff] }
 0x1b2   :  { %4587 = vmatpush1.bf16.msra.mxu0 %v4586_v38  ;;  %1041 = vmatprep.mubr.f32.mxu0 %v5227_v1  ;;  %v957_v27 = vrot.slane %v5966_v18, 1  ;;  %v1210_v9 = vrot.slane %v5966_v18, 2  ;;  %v1374_v50 = vrot.slane %v5966_v18, 3  ;;  %v1539_v33 = vrot.slane %v5966_v18, 4  ;;  %v903_v62 = vld [vmem:[#allocation6 + $0xa8] sm:$0xff]  ;;  %v902_v17 = vld [vmem:[#allocation6 + $0xa0] sm:$0xff] }
 0x1b3   :  { %vm864_vm8 = vcmp.ge.f32.partialorder %v857_v61, 0.0  ;;  %v871_v11 = vmul.f32 0.01, %v857_v61  ;;  %v844_v47 = vadd.f32 %v5918_v5, %v712_v52  ;;  %4589 = vmatprep.subr.bf16.mxu0 %v4588_v51  ;;  %v900_v51 = vld [vmem:[#allocation6 + $0x90] sm:$0xff] }
 0x1b4   :  { %v699_v12 = vpop.f32.mrb[52].mxu0  ;;  %v958_v14 = vsel %vm953_vm2, %v955_v34, %v957_v27  ;;  %v5978_v20 = vsel %vm1206_vm3, %v1208_v43, %v1210_v9  ;;  %v5981_v21 = vsel %vm1370_vm4, %v1372_v7, %v1374_v50  ;;  %v5984_v3 = vsel %vm1535_vm6, %v1537_v49, %v1539_v33 }
 0x1b5   :  { %v5986_v24 = vsel %vm864_vm8, %v857_v61, %v871_v11  ;;  %v858_v5 = vadd.f32 %v5937_v19, %v844_v47  ;;  %v713_v28 = vadd.f32 %v699_v12, %v5932_v63  ;;  %1042 = vmatmul.mubr.f32.gmra.mrb[58].mxu0 %v958_v14  ;;  %v4033_v29 = vpop.f32.mrb[53].mxu0  ;;  %v4598_v7 = vpack.c.bf16 %v896_v35, %v894_v32 }
 0x1b6   :  { %4591 = vmatpush1.bf16.msra.mxu0 %v4590_v23  ;;  %1047 = vmatprep.mubr.f32.mxu0 %v5227_v1  ;;  %v959_v39 = vrot.slane %v5986_v24, 1  ;;  %v1212_v25 = vrot.slane %v5986_v24, 2  ;;  %v1376_v38 = vrot.slane %v5986_v24, 3  ;;  %v1541_v46 = vrot.slane %v5986_v24, 4  ;;  %v905_v23 = vld [vmem:[#allocation6 + $0xb8] sm:$0xff] }
 0x1b7   :  { %vm865_vm9 = vcmp.ge.f32.partialorder %v858_v5, 0.0  ;;  %v872_v40 = vmul.f32 0.01, %v858_v5  ;;  %v845_v63 = vadd.f32 %v5920_v45, %v713_v28  ;;  %4593 = vmatprep.subr.bf16.mxu0 %v4592_v54  ;;  %v4600_v61 = vpack.c.bf16 %v901_v55, %v899_v36  ;;  %v909_v28 = vld [vmem:[#allocation6 + $0xd8] sm:$0xff]  ;;  %v910_v55 = vld [vmem:[#allocation6 + $0xe0] sm:$0xff] }
 0x1b8   :  { %v704_v4 = vpop.f32.mrb[54].mxu0  ;;  %v960_v26 = vsel %vm953_vm2, %v957_v27, %v959_v39  ;;  %v5998_v2 = vsel %vm1206_vm3, %v1210_v9, %v1212_v25  ;;  %v6001_v34 = vsel %vm1370_vm4, %v1374_v50, %v1376_v38  ;;  %v6004_v15 = vsel %vm1535_vm6, %v1539_v33, %v1541_v46 }
 0x1b9   :  { %v6006_v30 = vsel %vm865_vm9, %v858_v5, %v872_v40  ;;  %v859_v45 = vadd.f32 %v5937_v19, %v845_v63  ;;  %v714_v43 = vadd.f32 %v704_v4, %v5935_v8  ;;  %1048 = vmatmul.mubr.f32.gmra.mrb[60].mxu0 %v960_v26  ;;  %v4036_v49 = vpop.f32.mrb[55].mxu0  ;;  %v4604_v14 = vpack.c.bf16 %v905_v23, %v903_v62  ;;  %v907_v5 = vld [vmem:[#allocation6 + $0xc8] sm:$0xff]  ;;  %v908_v40 = vld [vmem:[#allocation6 + $0xd0] sm:$0xff]  ;;  %v1185_v62 = vld [vmem:[#allocation6 + $0x258] sm:$0xff] }
 0x1ba   :  { %4595 = vmatpush1.bf16.msra.mxu0 %v4594_v31  ;;  %1053 = vmatprep.mubr.f32.mxu0 %v5227_v1  ;;  %v961_v37 = vrot.slane %v6006_v30, 1  ;;  %v1214_v53 = vrot.slane %v6006_v30, 2  ;;  %v1378_v42 = vrot.slane %v6006_v30, 3  ;;  %v1543_v13 = vrot.slane %v6006_v30, 4  ;;  %v911_v63 = vld [vmem:[#allocation6 + $0xe8] sm:$0xff] }
 0x1bb   :  { %vm866_vm10 = vcmp.ge.f32.partialorder %v859_v45, 0.0  ;;  %v873_v56 = vmul.f32 0.01, %v859_v45  ;;  %v846_v8 = vadd.f32 %v5923_v44, %v714_v43  ;;  %4597 = vmatprep.subr.bf16.mxu0 %v4596_v59  ;;  %v4602_v44 = vpack.c.bf16 %v900_v51, %v898_v10  ;;  %v913_v59 = vld [vmem:[#allocation6 + $0xf8] sm:$0xff]  ;;  %v1175_v43 = vld [vmem:[#allocation6 + $0x208] sm:$0xff]  ;;  %v1174_v10 = vld [vmem:[#allocation6 + $0x200] sm:$0xff] }
 0x1bc   :  { %v962_v52 = vsel %vm953_vm2, %v959_v39, %v961_v37  ;;  %v6018_v27 = vsel %vm1206_vm3, %v1212_v25, %v1214_v53  ;;  %v6021_v6 = vsel %vm1370_vm4, %v1376_v38, %v1378_v42  ;;  %v6024_v48 = vsel %vm1535_vm6, %v1541_v46, %v1543_v13  ;;  %v906_v46 = vld [vmem:[#allocation6 + $0xc0] sm:$0xff]  ;;  %v1176_v51 = vld [vmem:[#allocation6 + $0x210] sm:$0xff] }
 0x1bd   :  { %v6026_v9 = vsel %vm866_vm10, %v859_v45, %v873_v56  ;;  %v860_v50 = vadd.f32 %v5937_v19, %v846_v8  ;;  %1054 = vmatmul.mubr.f32.gmra.mrb[62].mxu0 %v962_v52  ;;  %v4606_v35 = vpack.c.bf16 %v904_v60, %v902_v17  ;;  %v4608_v38 = vpack.c.bf16 %v909_v28, %v907_v5  ;;  %v912_v45 = vld [vmem:[#allocation6 + $0xf0] sm:$0xff]  ;;  %v1178_v8 = vld [vmem:[#allocation6 + $0x220] sm:$0xff]  ;;  %v1183_v52 = vld [vmem:[#allocation6 + $0x248] sm:$0xff] }
 0x1be   :  { %4599 = vmatpush1.bf16.msra.mxu0 %v4598_v7  ;;  %1059 = vmatprep.mubr.f32.mxu0 %v5227_v1  ;;  %v963_v33 = vrot.slane %v6026_v9, 1  ;;  %v1216_v11 = vrot.slane %v6026_v9, 2  ;;  %v1380_v47 = vrot.slane %v6026_v9, 3  ;;  %v1545_v54 = vrot.slane %v6026_v9, 4  ;;  %v1177_v7 = vld [vmem:[#allocation6 + $0x218] sm:$0xff]  ;;  %v1186_v60 = vld [vmem:[#allocation6 + $0x260] sm:$0xff] }
 0x1bf   :  { %vm867_vm11 = vcmp.ge.f32.partialorder %v860_v50, 0.0  ;;  %v874_v12 = vmul.f32 0.01, %v860_v50  ;;  %4601 = vmatprep.subr.bf16.mxu0 %v4600_v61  ;;  %v4610_v26 = vpack.c.bf16 %v908_v40, %v906_v46  ;;  %v4612_v36 = vpack.c.bf16 %v913_v59, %v911_v63  ;;  %v1180_v61 = vld [vmem:[#allocation6 + $0x230] sm:$0xff]  ;;  %v1193_v5 = vld [vmem:[#allocation6 + $0x298] sm:$0xff]  ;;  %v1194_v63 = vld [vmem:[#allocation6 + $0x2a0] sm:$0xff] }
 0x1c0   :  { %v964_v19 = vsel %vm953_vm2, %v961_v37, %v963_v33  ;;  %v6038_v29 = vsel %vm1206_vm3, %v1214_v53, %v1216_v11  ;;  %v6043_v31 = vsel %vm1370_vm4, %v1378_v42, %v1380_v47  ;;  %v6046_v39 = vsel %vm1535_vm6, %v1543_v13, %v1545_v54  ;;  %v1179_v53 = vld [vmem:[#allocation6 + $0x228] sm:$0xff]  ;;  %v1181_v42 = vld [vmem:[#allocation6 + $0x238] sm:$0xff] }
 0x1c1   :  { %1060 = vmatmul.mubr.f32.gmra.mrb[64].mxu0 %v964_v19  ;;  %v881_v32 = vsel %vm867_vm11, %v860_v50, %v874_v12  ;;  %v4614_v49 = vpack.c.bf16 %v912_v45, %v910_v55  ;;  %v4616_v37 = vpack.c.bf16 %v1177_v7, %v1175_v43  ;;  %v4618_v13 = vpack.c.bf16 %v1176_v51, %v1174_v10  ;;  %v1189_v12 = vld [vmem:[#allocation6 + $0x278] sm:$0xff]  ;;  %v1191_v19 = vld [vmem:[#allocation6 + $0x288] sm:$0xff]  ;;  %v1198_v45 = vld [vmem:[#allocation6 + $0x2c0] sm:$0xff] }
 0x1c2   :  { %4603 = vmatpush1.bf16.msra.mxu0 %v4602_v44  ;;  %1065 = vmatprep.mubr.f32.mxu0 %v5227_v1  ;;  %v1547_v25 = vrot.slane %v881_v32, 4  ;;  %v4620_v56 = vpack.c.bf16 %v1181_v42, %v1179_v53  ;;  %v4622_v23 = vpack.c.bf16 %v1180_v61, %v1178_v8  ;;  %v4624_v50 = vpack.c.bf16 %v1185_v62, %v1183_v52  ;;  %v1182_v44 = vld [vmem:[#allocation6 + $0x240] sm:$0xff]  ;;  %v1199_v59 = vld [vmem:[#allocation6 + $0x2c8] sm:$0xff]  ;;  %v1205_v7 = vld [vmem:[#allocation6 + $0x2f8] sm:$0xff]  ;;  %v1854_v42 = vpop.f32.mrb[28].mxu1 }
 0x1c3   :  { %4605 = vmatprep.subr.bf16.mxu0 %v4604_v14  ;;  %v4632_v32 = vpack.c.bf16 %v1193_v5, %v1191_v19  ;;  %v1203_v43 = vld [vmem:[#allocation6 + $0x2e8] sm:$0xff]  ;;  %v1202_v10 = vld [vmem:[#allocation6 + $0x2e0] sm:$0xff]  ;;  %v1341_v53 = vld [vmem:[#allocation6 + $0x318] sm:$0xff] }
 0x1c4   :  { %v6050_v4 = vsel %vm1535_vm6, %v1545_v54, %v1547_v25  ;;  %v1187_v54 = vld [vmem:[#allocation6 + $0x268] sm:$0xff]  ;;  %v1338_v61 = vld [vmem:[#allocation6 + $0x300] sm:$0xff]  ;;  %v1340_v52 = vld [vmem:[#allocation6 + $0x310] sm:$0xff] }
 0x1c5   :  { %1066 = vmatmul.mubr.f32.gmra.mrb[66].mxu0 %v963_v33  ;;  %v1184_v33 = vld [vmem:[#allocation6 + $0x250] sm:$0xff]  ;;  %v4628_v17 = vpack.c.bf16 %v1189_v12, %v1187_v54  ;;  %v1195_v25 = vld [vmem:[#allocation6 + $0x2a8] sm:$0xff]  ;;  %v4650_v54 = vpack.c.bf16 %v1340_v52, %v1338_v61  ;;  %v1349_v5 = vld [vmem:[#allocation6 + $0x358] sm:$0xff] }
 0x1c6   :  { %4607 = vmatpush1.bf16.msra.mxu0 %v4606_v35  ;;  %1136 = vmatprep.mubr.f32.mxu0 %v5227_v1  ;;  %v4626_v14 = vpack.c.bf16 %v1184_v33, %v1182_v44  ;;  %v1190_v35 = vld [vmem:[#allocation6 + $0x280] sm:$0xff]  ;;  %v1339_v51 = vld [vmem:[#allocation6 + $0x308] sm:$0xff] }
 0x1c7   :  { %4609 = vmatprep.subr.bf16.mxu0 %v4608_v38  ;;  %v1197_v38 = vld [vmem:[#allocation6 + $0x2b8] sm:$0xff]  ;;  %v4648_v8 = vpack.c.bf16 %v1341_v53, %v1339_v51  ;;  %v1347_v19 = vld [vmem:[#allocation6 + $0x348] sm:$0xff] }
 0x1c8   :  { %v4636_v40 = vpack.c.bf16 %v1197_v38, %v1195_v25  ;;  %v4656_v25 = vpack.c.bf16 %v1349_v5, %v1347_v19  ;;  %v1346_v38 = vld [vmem:[#allocation6 + $0x340] sm:$0xff]  ;;  %v1359_v52 = vld [vmem:[#allocation6 + $0x3a8] sm:$0xff]  ;;  %v1365_v5 = vld [vmem:[#allocation6 + $0x3d8] sm:$0xff] }
 0x1c9   :  { %v1363_v19 = vld [vmem:[#allocation6 + $0x3c8] sm:$0xff] }
 0x1ca   :  { %4611 = vmatpush1.bf16.msra.mxu0 %v4610_v26  ;;  %v1201_v26 = vld [vmem:[#allocation6 + $0x2d8] sm:$0xff] }
 0x1cb   :  { %4613 = vmatprep.subr.bf16.mxu0 %v4612_v36  ;;  %v4640_v55 = vpack.c.bf16 %v1201_v26, %v1199_v59 }
 0x1ce   :  { %4615 = vmatpush1.bf16.msra.mxu0 %v4614_v49 }
 0x1cf   :  { %4617 = vmatprep.subr.bf16.mxu0 %v4616_v37  ;;  %v4644_v37 = vpack.c.bf16 %v1205_v7, %v1203_v43  ;;  %v1355_v7 = vld [vmem:[#allocation6 + $0x388] sm:$0xff] }
 0x1d1   :  { %1137 = vmatmul.mubr.f32.vlgmr.msra.gmra.mrb[56].mxu0 %v5940_v22  ;;  %v1188_v22 = vld [vmem:[#allocation6 + $0x270] sm:$0xff] }
 0x1d2   :  { %4619 = vmatpush1.bf16.msra.mxu0 %v4618_v13  ;;  %1142 = vmatprep.mubr.f32.mxu0 %v5227_v1  ;;  %v4630_v28 = vpack.c.bf16 %v1188_v22, %v1186_v60  ;;  %v1344_v60 = vld [vmem:[#allocation6 + $0x330] sm:$0xff] }
 0x1d3   :  { %4621 = vmatprep.subr.bf16.mxu0 %v4620_v56  ;;  %v4124_v56 = vpop.f32.mrb[29].mxu1 }
 0x1d4   :  { %v1859_v62 = vpop.f32.mrb[30].mxu1  ;;  %v1354_v56 = vld [vmem:[#allocation6 + $0x380] sm:$0xff] }
 0x1d5   :  { %1143 = vmatmul.mubr.f32.gmra.mrb[58].mxu0 %v5947_v41  ;;  %v1192_v41 = vld [vmem:[#allocation6 + $0x290] sm:$0xff]  ;;  %v4127_v44 = vpop.f32.mrb[31].mxu1 }
 0x1d6   :  { %4623 = vmatpush1.bf16.msra.mxu0 %v4622_v23  ;;  %1148 = vmatprep.mubr.f32.mxu0 %v5227_v1  ;;  %v4634_v46 = vpack.c.bf16 %v1192_v41, %v1190_v35  ;;  %v1343_v23 = vld [vmem:[#allocation6 + $0x328] sm:$0xff]  ;;  %v1864_v33 = vpop.f32.mrb[32].mxu1 }
 0x1d7   :  { %4625 = vmatprep.subr.bf16.mxu0 %v4624_v50  ;;  %v1345_v50 = vld [vmem:[#allocation6 + $0x338] sm:$0xff]  ;;  %v4130_v12 = vpop.f32.mrb[33].mxu1 }
 0x1d8   :  { %v1869_v22 = vpop.f32.mrb[34].mxu1 }
 0x1d9   :  { %1149 = vmatmul.mubr.f32.gmra.mrb[60].mxu0 %v5966_v18  ;;  %v1196_v18 = vld [vmem:[#allocation6 + $0x2b0] sm:$0xff] }
 0x1da   :  { %4627 = vmatpush1.bf16.msra.mxu0 %v4626_v14  ;;  %1154 = vmatprep.mubr.f32.mxu0 %v5227_v1  ;;  %v4638_v36 = vpack.c.bf16 %v1196_v18, %v1194_v63  ;;  %v4652_v14 = vpack.c.bf16 %v1345_v50, %v1343_v23  ;;  %v1351_v63 = vld [vmem:[#allocation6 + $0x368] sm:$0xff]  ;;  %v1353_v18 = vld [vmem:[#allocation6 + $0x378] sm:$0xff] }
 0x1db   :  { %4629 = vmatprep.subr.bf16.mxu0 %v4628_v17  ;;  %v1342_v17 = vld [vmem:[#allocation6 + $0x320] sm:$0xff]  ;;  %v1361_v23 = vld [vmem:[#allocation6 + $0x3b8] sm:$0xff] }
 0x1dc   :  { %v4654_v35 = vpack.c.bf16 %v1344_v60, %v1342_v17  ;;  %v1360_v17 = vld [vmem:[#allocation6 + $0x3b0] sm:$0xff] }
 0x1dd   :  { %1155 = vmatmul.mubr.f32.gmra.mrb[62].mxu0 %v5986_v24  ;;  %v1200_v24 = vld [vmem:[#allocation6 + $0x2d0] sm:$0xff] }
 0x1de   :  { %4631 = vmatpush1.bf16.msra.mxu0 %v4630_v28  ;;  %1160 = vmatprep.mubr.f32.mxu0 %v5227_v1  ;;  %v4642_v49 = vpack.c.bf16 %v1200_v24, %v1198_v45  ;;  %v4133_v28 = vpop.f32.mrb[35].mxu1  ;;  %v1350_v45 = vld [vmem:[#allocation6 + $0x360] sm:$0xff]  ;;  %v1352_v24 = vld [vmem:[#allocation6 + $0x370] sm:$0xff] }
 0x1df   :  { %4633 = vmatprep.subr.bf16.mxu0 %v4632_v32  ;;  %v1874_v32 = vpop.f32.mrb[36].mxu1 }
 0x1e0   :  { %v4136_v41 = vpop.f32.mrb[37].mxu1 }
 0x1e1   :  { %1161 = vmatmul.mubr.f32.gmra.mrb[64].mxu0 %v6006_v30  ;;  %v1204_v30 = vld [vmem:[#allocation6 + $0x2f0] sm:$0xff] }
 0x1e2   :  { %4635 = vmatpush1.bf16.msra.mxu0 %v4634_v46  ;;  %1166 = vmatprep.mubr.f32.mxu0 %v5227_v1  ;;  %v4646_v13 = vpack.c.bf16 %v1204_v30, %v1202_v10  ;;  %v1348_v46 = vld [vmem:[#allocation6 + $0x350] sm:$0xff] }
 0x1e3   :  { %4637 = vmatprep.subr.bf16.mxu0 %v4636_v40  ;;  %v1879_v40 = vpop.f32.mrb[38].mxu1 }
 0x1e4   :  { %v4139_v59 = vpop.f32.mrb[39].mxu1 }
 0x1e5   :  { %1167 = vmatmul.mubr.f32.gmra.mrb[66].mxu0 %v6026_v9  ;;  %v1884_v26 = vpop.f32.mrb[40].mxu1  ;;  %v1369_v59 = vld [vmem:[#allocation6 + $0x3f8] sm:$0xff]  ;;  %v2390_v9 = vld [vmem:[#allocation2 + $0x288] sm:$0xff] }
 0x1e6   :  { %4639 = vmatpush1.bf16.msra.mxu0 %v4638_v36  ;;  %1288 = vmatprep.mubr.f32.mxu0 %v5227_v1  ;;  %v4142_v36 = vpop.f32.mrb[41].mxu1 }
 0x1e7   :  { %4641 = vmatprep.subr.bf16.mxu0 %v4640_v55  ;;  %v4660_v55 = vpack.c.bf16 %v1353_v18, %v1351_v63  ;;  %v1954_v43 = vpop.f32.mrb[42].mxu1  ;;  %v1367_v18 = vld [vmem:[#allocation6 + $0x3e8] sm:$0xff] }
 0x1e8   :  { %v4177_v10 = vpop.f32.mrb[43].mxu1 }
 0x1e9   :  { %v1959_v30 = vpop.f32.mrb[44].mxu1  ;;  %v1505_v10 = vld [vmem:[#allocation6 + $0x418] sm:$0xff] }
 0x1ea   :  { %4643 = vmatpush1.bf16.msra.mxu0 %v4642_v49  ;;  %v1357_v49 = vld [vmem:[#allocation6 + $0x398] sm:$0xff]  ;;  %v1960_v51 = vadd.f32 %v1959_v30, %v1859_v62  ;;  %v4180_v53 = vpop.f32.mrb[45].mxu1  ;;  %v4668_v62 = vpack.c.bf16 %v1361_v23, %v1359_v52  ;;  %v1507_v52 = vld [vmem:[#allocation6 + $0x428] sm:$0xff] }
 0x1eb   :  { %4645 = vmatprep.subr.bf16.mxu0 %v4644_v37  ;;  %v1955_v37 = vadd.f32 %v1954_v43, %v1854_v42  ;;  %v1964_v61 = vpop.f32.mrb[46].mxu1  ;;  %v1368_v43 = vld [vmem:[#allocation6 + $0x3f0] sm:$0xff]  ;;  %v1509_v23 = vld [vmem:[#allocation6 + $0x438] sm:$0xff] }
 0x1ec   :  { %v1965_v50 = vadd.f32 %v1964_v61, %v1864_v33  ;;  %v4183_v44 = vpop.f32.mrb[47].mxu1  ;;  %v1504_v61 = vld [vmem:[#allocation6 + $0x410] sm:$0xff] }
 0x1ed   :  { %v1969_v42 = vpop.f32.mrb[48].mxu1 }
 0x1ee   :  { %4647 = vmatpush1.bf16.msra.mxu0 %v4646_v13  ;;  %v4664_v13 = vpack.c.bf16 %v1357_v49, %v1355_v7  ;;  %v4186_v12 = vpop.f32.mrb[49].mxu1  ;;  %v1503_v49 = vld [vmem:[#allocation6 + $0x408] sm:$0xff] }
 0x1ef   :  { %4649 = vmatprep.subr.bf16.mxu0 %v4648_v8  ;;  %v1356_v8 = vld [vmem:[#allocation6 + $0x390] sm:$0xff]  ;;  %v1974_v60 = vpop.f32.mrb[50].mxu1 }
 0x1f0   :  { %v1975_v28 = vadd.f32 %v1974_v60, %v1874_v32  ;;  %v1508_v60 = vld [vmem:[#allocation6 + $0x430] sm:$0xff] }
 0x1f1   :  { %1289 = vmatmul.mubr.f32.vlgmr.msra.gmra.mrb[56].mxu0 %v5958_v57  ;;  %v4658_v57 = vpack.c.bf16 %v1348_v46, %v1346_v38  ;;  %v1362_v38 = vld [vmem:[#allocation6 + $0x3c0] sm:$0xff]  ;;  %v1364_v46 = vld [vmem:[#allocation6 + $0x3d0] sm:$0xff] }
 0x1f2   :  { %4651 = vmatpush1.bf16.msra.mxu0 %v4650_v54  ;;  %1294 = vmatprep.mubr.f32.mxu0 %v5227_v1  ;;  %v1970_v54 = vadd.f32 %v1969_v42, %v1869_v22  ;;  %v4672_v22 = vpack.c.bf16 %v1365_v5, %v1363_v19  ;;  %v4674_v32 = vpack.c.bf16 %v1364_v46, %v1362_v38  ;;  %v1511_v19 = vld [vmem:[#allocation6 + $0x448] sm:$0xff]  ;;  %v1513_v5 = vld [vmem:[#allocation6 + $0x458] sm:$0xff]  ;;  %v1510_v38 = vld [vmem:[#allocation6 + $0x440] sm:$0xff] }
 0x1f3   :  { %4653 = vmatprep.subr.bf16.mxu0 %v4652_v14  ;;  %v1358_v14 = vld [vmem:[#allocation6 + $0x3a0] sm:$0xff]  ;;  %v1512_v46 = vld [vmem:[#allocation6 + $0x450] sm:$0xff] }
 0x1f5   :  { %1295 = vmatmul.mubr.f32.gmra.mrb[58].mxu0 %v5978_v20  ;;  %v4662_v20 = vpack.c.bf16 %v1352_v24, %v1350_v45  ;;  %v4676_v45 = vpack.c.bf16 %v1369_v59, %v1367_v18  ;;  %v1366_v24 = vld [vmem:[#allocation6 + $0x3e0] sm:$0xff]  ;;  %v1515_v18 = vld [vmem:[#allocation6 + $0x468] sm:$0xff]  ;;  %v1517_v59 = vld [vmem:[#allocation6 + $0x478] sm:$0xff] }
 0x1f6   :  { %4655 = vmatpush1.bf16.msra.mxu0 %v4654_v35  ;;  %1300 = vmatprep.mubr.f32.mxu0 %v5227_v1  ;;  %v4189_v35 = vpop.f32.mrb[51].mxu1  ;;  %v4678_v53 = vpack.c.bf16 %v1368_v43, %v1366_v24  ;;  %v1516_v24 = vld [vmem:[#allocation6 + $0x470] sm:$0xff] }
 0x1f7   :  { %4657 = vmatprep.subr.bf16.mxu0 %v4656_v25  ;;  %v1979_v33 = vpop.f32.mrb[52].mxu1 }
 0x1f8   :  { %v1980_v41 = vadd.f32 %v1979_v33, %v1879_v40  ;;  %v4192_v25 = vpop.f32.mrb[53].mxu1 }
 0x1f9   :  { %1301 = vmatmul.mubr.f32.gmra.mrb[60].mxu0 %v5998_v2  ;;  %v4666_v2 = vpack.c.bf16 %v1356_v8, %v1354_v56  ;;  %v1984_v63 = vpop.f32.mrb[54].mxu1  ;;  %v4680_v56 = vpack.c.bf16 %v1505_v10, %v1503_v49  ;;  %v1502_v8 = vld [vmem:[#allocation6 + $0x400] sm:$0xff]  ;;  %v1521_v49 = vld [vmem:[#allocation6 + $0x498] sm:$0xff] }
 0x1fa   :  { %4659 = vmatpush1.bf16.msra.mxu0 %v4658_v57  ;;  %1306 = vmatprep.mubr.f32.mxu0 %v5227_v1  ;;  %v1985_v57 = vadd.f32 %v1984_v63, %v1884_v26  ;;  %v4195_v36 = vpop.f32.mrb[55].mxu1  ;;  %v4682_v12 = vpack.c.bf16 %v1504_v61, %v1502_v8  ;;  %v1523_v8 = vld [vmem:[#allocation6 + $0x4a8] sm:$0xff]  ;;  %v1525_v61 = vld [vmem:[#allocation6 + $0x4b8] sm:$0xff] }
 0x1fb   :  { %4661 = vmatprep.subr.bf16.mxu0 %v4660_v55 }
 0x1fd   :  { %1307 = vmatmul.mubr.f32.gmra.mrb[62].mxu0 %v6018_v27  ;;  %v4670_v27 = vpack.c.bf16 %v1360_v17, %v1358_v14  ;;  %v4684_v14 = vpack.c.bf16 %v1509_v23, %v1507_v52  ;;  %v1506_v17 = vld [vmem:[#allocation6 + $0x420] sm:$0xff]  ;;  %v4700_v23 = vpack.c.bf16 %v1525_v61, %v1523_v8  ;;  %v2400_v8 = vld [vmem:[#allocation2 + $0x2d8] sm:$0xff] }
 0x1fe   :  { %4663 = vmatpush1.bf16.msra.mxu0 %v4662_v20  ;;  %1312 = vmatprep.mubr.f32.mxu0 %v5227_v1 }
 0x1ff   :  { %4665 = vmatprep.subr.bf16.mxu0 %v4664_v13 }
 0x201   :  { %1313 = vmatmul.mubr.f32.gmra.mrb[64].mxu0 %v6038_v29  ;;  %v2078_v29 = vpop.f32.mrb[56].mxu1 }
 0x202   :  { %4667 = vmatpush1.bf16.msra.mxu0 %v4666_v2  ;;  %1318 = vmatprep.mubr.f32.mxu0 %v5227_v1  ;;  %v2112_v55 = vadd.f32 %v2078_v29, %v1955_v37  ;;  %v4230_v40 = vpop.f32.mrb[57].mxu1  ;;  %v4690_v29 = vpack.c.bf16 %v1512_v46, %v1510_v38 }
 0x203   :  { %4669 = vmatprep.subr.bf16.mxu0 %v4668_v62  ;;  %v2083_v7 = vpop.f32.mrb[58].mxu1  ;;  %v4692_v40 = vpack.c.bf16 %v1517_v59, %v1515_v18 }
 0x204   :  { %v2113_v30 = vadd.f32 %v2083_v7, %v1960_v51  ;;  %v4233_v26 = vpop.f32.mrb[59].mxu1  ;;  %v1519_v7 = vld [vmem:[#allocation6 + $0x488] sm:$0xff] }
 0x205   :  { %1319 = vmatmul.mubr.f32.gmra.mrb[66].mxu0 %v1216_v11  ;;  %v2088_v20 = vpop.f32.mrb[60].mxu1 }
 0x206   :  { %4671 = vmatpush1.bf16.msra.mxu0 %v4670_v27  ;;  %1452 = vmatprep.mubr.f32.mxu0 %v5227_v1  ;;  %v2114_v11 = vadd.f32 %v2088_v20, %v1965_v50  ;;  %v4236_v13 = vpop.f32.mrb[61].mxu1 }
 0x207   :  { %4673 = vmatprep.subr.bf16.mxu0 %v4672_v22  ;;  %v2093_v37 = vpop.f32.mrb[62].mxu1  ;;  %v4688_v22 = vpack.c.bf16 %v1513_v5, %v1511_v19  ;;  %v1518_v13 = vld [vmem:[#allocation6 + $0x480] sm:$0xff]  ;;  %v1531_v19 = vld [vmem:[#allocation6 + $0x4e8] sm:$0xff]  ;;  %v1533_v5 = vld [vmem:[#allocation6 + $0x4f8] sm:$0xff] }
 0x208   :  { %v2115_v44 = vadd.f32 %v2093_v37, %v1970_v54  ;;  %v4239_v42 = vpop.f32.mrb[63].mxu1  ;;  %v4686_v54 = vpack.c.bf16 %v1508_v60, %v1506_v17  ;;  %v1526_v60 = vld [vmem:[#allocation6 + $0x4c0] sm:$0xff] }
 0x209   :  { %v2098_v2 = vpop.f32.mrb[64].mxu1  ;;  %v1524_v42 = vld [vmem:[#allocation6 + $0x4b0] sm:$0xff] }
 0x20a   :  { %4675 = vmatpush1.bf16.msra.mxu0 %v4674_v32  ;;  %v2116_v62 = vadd.f32 %v2098_v2, %v1975_v28  ;;  %v4242_v51 = vpop.f32.mrb[65].mxu1  ;;  %v1527_v2 = vld [vmem:[#allocation6 + $0x4c8] sm:$0xff] }
 0x20b   :  { %4677 = vmatprep.subr.bf16.mxu0 %v4676_v45  ;;  %v2103_v50 = vpop.f32.mrb[66].mxu1  ;;  %v1514_v45 = vld [vmem:[#allocation6 + $0x460] sm:$0xff] }
 0x20c   :  { %v6078_v35 = vadd.f32 %v2103_v50, %v1980_v41  ;;  %v4245_v33 = vpop.f32.mrb[67].mxu1  ;;  %v4694_v26 = vpack.c.bf16 %v1516_v24, %v1514_v45  ;;  %v1528_v50 = vld [vmem:[#allocation6 + $0x4d0] sm:$0xff]  ;;  %v2394_v45 = vld [vmem:[#allocation2 + $0x2a8] sm:$0xff] }
 0x20d   :  { %v2108_v27 = vpop.f32.mrb[68].mxu1 }
 0x20e   :  { %4679 = vmatpush1.bf16.msra.mxu0 %v4678_v53  ;;  %v6082_v25 = vadd.f32 %v2108_v27, %v1985_v57  ;;  %v4248_v28 = vpop.f32.mrb[69].mxu1  ;;  %v4696_v53 = vpack.c.bf16 %v1521_v49, %v1519_v7  ;;  %v2396_v49 = vld [vmem:[#allocation2 + $0x2b8] sm:$0xff] }
 0x20f   :  { %4681 = vmatprep.subr.bf16.mxu0 %v4680_v56  ;;  %v2209_v63 = vpop.f32.mrb[70].mxu1  ;;  %v1520_v56 = vld [vmem:[#allocation6 + $0x490] sm:$0xff]  ;;  %v1530_v28 = vld [vmem:[#allocation6 + $0x4e0] sm:$0xff] }
 0x210   :  { %v6084_v41 = vadd.f32 %v2209_v63, %v2112_v55  ;;  %v4283_v36 = vpop.f32.mrb[71].mxu1  ;;  %v2389_v63 = vld [vmem:[#allocation2 + $0x280] sm:$0xff] }
 0x211   :  { %1453 = vmatmul.mubr.f32.vlgmr.msra.gmra.mrb[56].mxu0 %v5961_v16  ;;  %v2214_v16 = vpop.f32.mrb[72].mxu1  ;;  %v4833_v59 = vpack.c.bf16 %v2390_v9, %v2389_v63  ;;  %v2392_v36 = vld [vmem:[#allocation2 + $0x298] sm:$0xff]  ;;  %v2580_v63 = vld [vmem:[#allocation6 + $0x108] sm:$0xff] }
 0x212   :  { %4683 = vmatpush1.bf16.msra.mxu0 %v4682_v12  ;;  %1458 = vmatprep.mubr.f32.mxu0 %v5227_v1  ;;  %v6088_v57 = vadd.f32 %v2214_v16, %v2113_v30  ;;  %v4286_v32 = vpop.f32.mrb[73].mxu1  ;;  %v1529_v12 = vld [vmem:[#allocation6 + $0x4d8] sm:$0xff] }
 0x213   :  { %4685 = vmatprep.subr.bf16.mxu0 %v4684_v14  ;;  %v2219_v43 = vpop.f32.mrb[74].mxu1  ;;  %v2582_v9 = vld [vmem:[#allocation6 + $0x118] sm:$0xff] }
 0x214   :  { %v6090_v55 = vadd.f32 %v2219_v43, %v2114_v11  ;;  %v4289_v10 = vpop.f32.mrb[75].mxu1 }
 0x215   :  { %1459 = vmatmul.mubr.f32.gmra.mrb[58].mxu0 %v5981_v21  ;;  %v2224_v21 = vpop.f32.mrb[76].mxu1 }
 0x216   :  { %4687 = vmatpush1.bf16.msra.mxu0 %v4686_v54  ;;  %1464 = vmatprep.mubr.f32.mxu0 %v5227_v1  ;;  %v6094_v30 = vadd.f32 %v2224_v21, %v2115_v44  ;;  %v4292_v20 = vpop.f32.mrb[77].mxu1  ;;  %v1522_v44 = vld [vmem:[#allocation6 + $0x4a0] sm:$0xff]  ;;  %v4708_v54 = vpack.c.bf16 %v1533_v5, %v1531_v19  ;;  %v2550_v19 = vld [vmem:[#allocation6 + $0x18] sm:$0xff] }
 0x217   :  { %4689 = vmatprep.subr.bf16.mxu0 %v4688_v22  ;;  %v2229_v11 = vpop.f32.mrb[78].mxu1  ;;  %v1532_v22 = vld [vmem:[#allocation6 + $0x4f0] sm:$0xff]  ;;  %v2398_v20 = vld [vmem:[#allocation2 + $0x2c8] sm:$0xff] }
 0x218   :  { %v6098_v37 = vadd.f32 %v2229_v11, %v2116_v62  ;;  %v4295_v52 = vpop.f32.mrb[79].mxu1  ;;  %v4704_v62 = vpack.c.bf16 %v1529_v12, %v1527_v2  ;;  %v4710_v38 = vpack.c.bf16 %v1532_v22, %v1530_v28  ;;  %v2403_v2 = vld [vmem:[#allocation2 + $0x2f0] sm:$0xff]  ;;  %v2404_v12 = vld [vmem:[#allocation2 + $0x2f8] sm:$0xff]  ;;  %v2551_v22 = vld [vmem:[#allocation6 + $0x20] sm:$0xff] }
 0x219   :  { %1465 = vmatmul.mubr.f32.gmra.mrb[60].mxu0 %v6001_v34  ;;  %v4698_v34 = vpack.c.bf16 %v1520_v56, %v1518_v13  ;;  %v2234_v51 = vpop.f32.mrb[80].mxu1  ;;  %v2402_v52 = vld [vmem:[#allocation2 + $0x2e8] sm:$0xff] }
 0x21a   :  { %4691 = vmatpush1.bf16.msra.mxu0 %v4690_v29  ;;  %1470 = vmatprep.mubr.f32.mxu0 %v5227_v1  ;;  %v6103_v14 = vadd.f32 %v2234_v51, %v6078_v35  ;;  %v4298_v17 = vpop.f32.mrb[81].mxu1  ;;  %v4854_v51 = vpack.c.bf16 %v2404_v12, %v2403_v2  ;;  %v2565_v2 = vld [vmem:[#allocation6 + $0x90] sm:$0xff] }
 0x21b   :  { %4693 = vmatprep.subr.bf16.mxu0 %v4692_v40  ;;  %v2239_v33 = vpop.f32.mrb[82].mxu1  ;;  %v3480_v17 = vld [vmem:[%s6440_s0 + $0x288] sm:$0xff] }
 0x21c   :  { %v6109_v27 = vadd.f32 %v2239_v33, %v6082_v25  ;;  %v4301_v35 = vpop.f32.mrb[83].mxu1  ;;  %v2391_v25 = vld [vmem:[#allocation2 + $0x290] sm:$0xff]  ;;  %v2547_v33 = vld [vmem:[#allocation6] sm:$0xff] }
 0x21d   :  { %1471 = vmatmul.mubr.f32.gmra.mrb[62].mxu0 %v6021_v6  ;;  %v4702_v6 = vpack.c.bf16 %v1524_v42, %v1522_v44  ;;  %v2340_v46 = vpop.f32.mrb[84].mxu1  ;;  %v4836_v29 = vpack.c.bf16 %v2392_v36, %v2391_v25  ;;  %v2552_v35 = vld [vmem:[#allocation6 + $0x28] sm:$0xff]  ;;  %v2558_v25 = vld [vmem:[#allocation6 + $0x58] sm:$0xff]  ;;  %v2579_v36 = vld [vmem:[#allocation6 + $0x100] sm:$0xff] }
 0x21e   :  { %4695 = vmatpush1.bf16.msra.mxu0 %v4694_v26  ;;  %1476 = vmatprep.mubr.f32.mxu0 %v5227_v1  ;;  %v4336_v18 = vpop.f32.mrb[85].mxu1 }
 0x21f   :  { %4697 = vmatprep.subr.bf16.mxu0 %v4696_v53  ;;  %v2345_v16 = vpop.f32.mrb[86].mxu1  ;;  %v2556_v18 = vld [vmem:[#allocation6 + $0x48] sm:$0xff] }
 0x220   :  { %v6118_v32 = vadd.f32 %v2345_v16, %v6088_v57  ;;  %v4339_v40 = vpop.f32.mrb[87].mxu1  ;;  %v2395_v57 = vld [vmem:[#allocation2 + $0x2b0] sm:$0xff] }
 0x221   :  { %1477 = vmatmul.mubr.f32.gmra.mrb[64].mxu0 %v6043_v31  ;;  %v4706_v31 = vpack.c.bf16 %v1528_v50, %v1526_v60  ;;  %v2350_v24 = vpop.f32.mrb[88].mxu1  ;;  %v3482_v60 = vld [vmem:[%s6440_s0 + $0x298] sm:$0x1]  ;;  %v2548_v50 = vld [vmem:[#allocation6 + $0x8] sm:$0xff] }
 0x222   :  { %4699 = vmatpush1.bf16.msra.mxu0 %v4698_v34  ;;  %1482 = vmatprep.mubr.f32.mxu0 %v5227_v1  ;;  %v6124_v43 = vadd.f32 %v2350_v24, %v6090_v55  ;;  %v4342_v7 = vpop.f32.mrb[89].mxu1  ;;  %v2397_v55 = vld [vmem:[#allocation2 + $0x2c0] sm:$0xff]  ;;  %v4888_v5 = vpack.c.bf16 %v2550_v19, %v2548_v50  ;;  %v2581_v16 = vld [vmem:[#allocation6 + $0x110] sm:$0xff] }
 0x223   :  { %4701 = vmatprep.subr.bf16.mxu0 %v4700_v23  ;;  %v2355_v10 = vpop.f32.mrb[90].mxu1  ;;  %v4858_v40 = vpack.c.bf16 %v2581_v16, %v2579_v36  ;;  %v2586_v7 = vld [vmem:[#allocation6 + $0x138] sm:$0xff]  ;;  %v2567_v19 = vld [vmem:[#allocation6 + $0xa0] sm:$0xff]  ;;  %v2576_v16 = vld [vmem:[#allocation6 + $0xe8] sm:$0xff] }
 0x224   :  { %v6130_v21 = vadd.f32 %v2355_v10, %v6094_v30  ;;  %v4345_v26 = vpop.f32.mrb[91].mxu1  ;;  %v2399_v30 = vld [vmem:[#allocation2 + $0x2d0] sm:$0xff]  ;;  %4889 = vmatprep.subr.bf16.mxu1 %v4888_v5  ;;  %v2562_v10 = vld [vmem:[#allocation6 + $0x78] sm:$0xff] }
 0x225   :  { %1483 = vmatmul.mubr.f32.gmra.mrb[66].mxu0 %v1380_v47  ;;  %v6112_v47 = vadd.f32 %v2340_v46, %v6084_v41  ;;  %v2393_v41 = vld [vmem:[#allocation2 + $0x2a0] sm:$0xff]  ;;  %v2360_v53 = vpop.f32.mrb[92].mxu1  ;;  %v2585_v26 = vld [vmem:[#allocation6 + $0x130] sm:$0xff] }
 0x226   :  { %4703 = vmatpush1.bf16.msra.mxu0 %v4702_v6  ;;  %1619 = vmatprep.mubr.f32.mxu0 %v5227_v1  ;;  %v6136_v13 = vadd.f32 %v2360_v53, %v6098_v37  ;;  %v4348_v56 = vpop.f32.mrb[93].mxu1  ;;  %v2401_v37 = vld [vmem:[#allocation2 + $0x2e0] sm:$0xff]  ;;  %v3477_v6 = vld [vmem:[%s6440_s0 + $0x270] sm:$0xff] }
 0x227   :  { %4705 = vmatprep.subr.bf16.mxu0 %v4704_v62  ;;  %v2365_v61 = vpop.f32.mrb[94].mxu1  ;;  %v4851_v44 = vpack.c.bf16 %v2402_v52, %v2401_v37  ;;  %v3481_v62 = vld [vmem:[%s6440_s0 + $0x290] sm:$0xff]  ;;  %v2559_v53 = vld [vmem:[#allocation6 + $0x60] sm:$0xff]  ;;  %v2602_v36 = vld [vmem:[#allocation6 + $0x1b8] sm:$0xff] }
 0x228   :  { %v6142_v11 = vadd.f32 %v2365_v61, %v6103_v14  ;;  %v4351_v34 = vpop.f32.mrb[95].mxu1  ;;  %v3479_v14 = vld [vmem:[%s6440_s0 + $0x280] sm:$0xff]  ;;  %v2564_v61 = vld [vmem:[#allocation6 + $0x88] sm:$0xff]  ;;  %v2589_v52 = vld [vmem:[#allocation6 + $0x150] sm:$0xff] }
 0x229   :  { %v2370_v23 = vpop.f32.mrb[96].mxu1  ;;  %v2566_v34 = vld [vmem:[#allocation6 + $0x98] sm:$0xff]  ;;  %v2587_v37 = vld [vmem:[#allocation6 + $0x140] sm:$0xff]  ;;  %v2569_v5 = vld [vmem:[#allocation6 + $0xb0] sm:$0xff] }
 0x22a   :  { %4707 = vmatpush1.bf16.msra.mxu0 %v4706_v31  ;;  %v4354_v42 = vpop.f32.mrb[97].mxu1  ;;  %v2549_v31 = vld [vmem:[#allocation6 + $0x10] sm:$0xff] }
 0x22b   :  { %4709 = vmatprep.subr.bf16.mxu0 %v4708_v54  ;;  %v2554_v54 = vld [vmem:[#allocation6 + $0x38] sm:$0xff]  ;;  %v2563_v42 = vld [vmem:[#allocation6 + $0x80] sm:$0xff] }
 0x22c   :  { %v4892_v28 = vpack.c.bf16 %v2554_v54, %v2552_v35  ;;  %v4906_v12 = vpack.c.bf16 %v2565_v2, %v2563_v42  ;;  %v2572_v35 = vld [vmem:[#allocation6 + $0xc8] sm:$0xff]  ;;  %v1668_v2 = vld [vmem:[#allocation7] sm:$0x3] }
 0x22e   :  { %4711 = vmatpush1.bf16.msra.mxu0 %v4710_v38  ;;  %v2553_v38 = vld [vmem:[#allocation6 + $0x30] sm:$0xff] }
 0x22f   :  { %4832 = vmatprep.subr.bf16.mxu0 %v5225_v0  ;;  %v4894_v46 = vpack.c.bf16 %v2553_v38, %v2551_v22  ;;  %v2595_v38 = vld [vmem:[#allocation6 + $0x180] sm:$0xff] }
 0x231   :  { %1620 = vmatmul.mubr.f32.vlgmr.msra.gmra.mrb[56].mxu0 %v5964_v58  ;;  %v4839_v58 = vpack.c.bf16 %v2394_v45, %v2393_v41  ;;  %v2555_v41 = vld [vmem:[#allocation6 + $0x40] sm:$0xff]  ;;  %v2557_v45 = vld [vmem:[#allocation6 + $0x50] sm:$0xff] }
 0x232   :  { %4834 = vmatpush3.bf16.msra.mxu0 %v4833_v59  ;;  %1625 = vmatprep.mubr.f32.mxu0 %v5227_v1  ;;  %v4856_v59 = vpack.c.bf16 %v2582_v9, %v2580_v63  ;;  %v4898_v24 = vpack.c.bf16 %v2557_v45, %v2555_v41  ;;  %v2571_v63 = vld [vmem:[#allocation6 + $0xc0] sm:$0xff] }
 0x233   :  { %4835 = vmatprep.subr.bf16.mxu0 %v5225_v0  ;;  %v2599_v41 = vld [vmem:[#allocation6 + $0x1a0] sm:$0xff] }
 0x235   :  { %1626 = vmatmul.mubr.f32.gmra.mrb[58].mxu0 %v5984_v3  ;;  %v4842_v3 = vpack.c.bf16 %v2396_v49, %v2395_v57  ;;  %v2560_v57 = vld [vmem:[#allocation6 + $0x68] sm:$0xff] }
 0x236   :  { %4837 = vmatpush3.bf16.msra.mxu0 %v4836_v29  ;;  %1631 = vmatprep.mubr.f32.mxu0 %v5227_v1  ;;  %v4896_v29 = vpack.c.bf16 %v2558_v25, %v2556_v18  ;;  %v2573_v18 = vld [vmem:[#allocation6 + $0xd0] sm:$0xff]  ;;  %v2600_v25 = vld [vmem:[#allocation6 + $0x1a8] sm:$0xff] }
 0x237   :  { %4838 = vmatprep.subr.bf16.mxu0 %v5225_v0 }
 0x239   :  { %1632 = vmatmul.mubr.f32.gmra.mrb[60].mxu0 %v6004_v15  ;;  %v4845_v15 = vpack.c.bf16 %v2398_v20, %v2397_v55  ;;  %v4900_v55 = vpack.c.bf16 %v2562_v10, %v2560_v57  ;;  %v2604_v10 = vld [vmem:[#allocation6 + $0x1c8] sm:$0xff] }
 0x23a   :  { %4840 = vmatpush3.bf16.msra.mxu0 %v4839_v58  ;;  %1637 = vmatprep.mubr.f32.mxu0 %v5227_v1  ;;  %v2584_v58 = vld [vmem:[#allocation6 + $0x128] sm:$0xff] }
 0x23b   :  { %4841 = vmatprep.subr.bf16.mxu0 %v5225_v0  ;;  %v4860_v49 = vpack.c.bf16 %v2586_v7, %v2584_v58  ;;  %v2575_v58 = vld [vmem:[#allocation6 + $0xe0] sm:$0xff]  ;;  %v2577_v7 = vld [vmem:[#allocation6 + $0xf0] sm:$0xff] }
 0x23d   :  { %1638 = vmatmul.mubr.f32.gmra.mrb[62].mxu0 %v6024_v48  ;;  %v4848_v48 = vpack.c.bf16 %v2400_v8, %v2399_v30  ;;  %v2588_v30 = vld [vmem:[#allocation6 + $0x148] sm:$0xff]  ;;  %v2590_v8 = vld [vmem:[#allocation6 + $0x158] sm:$0xff] }
 0x23e   :  { %4843 = vmatpush3.bf16.msra.mxu0 %v4842_v3  ;;  %1643 = vmatprep.mubr.f32.mxu0 %v5227_v1  ;;  %v2583_v3 = vld [vmem:[#allocation6 + $0x120] sm:$0xff] }
 0x23f   :  { %4844 = vmatprep.subr.bf16.mxu0 %v5225_v0  ;;  %v4862_v20 = vpack.c.bf16 %v2585_v26, %v2583_v3  ;;  %v2606_v3 = vld [vmem:[#allocation6 + $0x1d8] sm:$0xff]  ;;  %v2837_v26 = vld [vmem:[#allocation6 + $0x208] sm:$0xff] }
 0x241   :  { %1644 = vmatmul.mubr.f32.gmra.mrb[64].mxu0 %v6046_v39  ;;  %v6149_v39 = vadd.f32 %v2370_v23, %v6109_v27  ;;  %v4890_v27 = vpack.c.bf16 %v2549_v31, %v2547_v33  ;;  %v4904_v23 = vpack.c.bf16 %v2566_v34, %v2564_v61  ;;  %v4910_v33 = vpack.c.bf16 %v2569_v5, %v2567_v19  ;;  %v2596_v31 = vld [vmem:[#allocation6 + $0x188] sm:$0xff]  ;;  %v2610_v61 = vld [vmem:[#allocation6 + $0x1f8] sm:$0xff]  ;;  %v2607_v34 = vld [vmem:[#allocation6 + $0x1e0] sm:$0xff] }
 0x242   :  { %4846 = vmatpush3.bf16.msra.mxu0 %v4845_v15  ;;  %1649 = vmatprep.mubr.f32.mxu0 %v5227_v1  ;;  %v2561_v15 = vld [vmem:[#allocation6 + $0x70] sm:$0xff] }
 0x243   :  { %4847 = vmatprep.subr.bf16.mxu0 %v5225_v0  ;;  %4891 = vmatpush1.bf16.msra.mxu1 %v4890_v27  ;;  %v4902_v56 = vpack.c.bf16 %v2561_v15, %v2559_v53  ;;  %v2598_v27 = vld [vmem:[#allocation6 + $0x198] sm:$0xff]  ;;  %v2603_v53 = vld [vmem:[#allocation6 + $0x1c0] sm:$0xff]  ;;  %v2605_v15 = vld [vmem:[#allocation6 + $0x1d0] sm:$0xff] }
 0x244   :  { %4893 = vmatprep.subr.bf16.mxu1 %v4892_v28  ;;  %v4872_v54 = vpack.c.bf16 %v2598_v27, %v2596_v31  ;;  %v2574_v28 = vld [vmem:[#allocation6 + $0xd8] sm:$0xff] }
 0x245   :  { %1650 = vmatmul.mubr.f32.gmra.mrb[66].mxu0 %v6050_v4  ;;  %v3476_v4 = vld [vmem:[%s6440_s0 + $0x268] sm:$0xff]  ;;  %v4912_v22 = vpack.c.bf16 %v2574_v28, %v2572_v35 }
 0x246   :  { %4849 = vmatpush3.bf16.msra.mxu0 %v4848_v48  ;;  %4387 = vmatprep.mubr.msk.f32.mxu0 %vm5226_vm0, %v5227_v1  ;;  %v4864_v48 = vpack.c.bf16 %v2590_v8, %v2588_v30  ;;  %v4882_v30 = vpack.c.bf16 %v2605_v15, %v2603_v53  ;;  %v2608_v8 = vld [vmem:[#allocation6 + $0x1e8] sm:$0xff] }
 0x247   :  { %4850 = vmatprep.subr.bf16.mxu0 %v5225_v0  ;;  %4895 = vmatpush1.bf16.msra.mxu1 %v4894_v46  ;;  %v2597_v46 = vld [vmem:[#allocation6 + $0x190] sm:$0xff] }
 0x248   :  { %4897 = vmatprep.subr.bf16.mxu1 %v4896_v29  ;;  %v4874_v9 = vpack.c.bf16 %v2597_v46, %v2595_v38  ;;  %v4876_v29 = vpack.c.bf16 %v2602_v36, %v2600_v25 }
 0x24a   :  { %4852 = vmatpush3.bf16.msra.mxu0 %v4851_v44  ;;  %v4866_v44 = vpack.c.bf16 %v2589_v52, %v2587_v37  ;;  %v2609_v37 = vld [vmem:[#allocation6 + $0x1f0] sm:$0xff] }
 0x24b   :  { %4853 = vmatprep.subr.bf16.mxu0 %v5225_v0  ;;  %v3478_v0 = vld [vmem:[%s6440_s0 + $0x278] sm:$0xff]  ;;  %4899 = vmatpush1.bf16.msra.mxu1 %v4898_v24  ;;  %v4886_v52 = vpack.c.bf16 %v2609_v37, %v2607_v34 }
 0x24c   :  { %4901 = vmatprep.subr.bf16.mxu1 %v4900_v55  ;;  %v2601_v24 = vld [vmem:[#allocation6 + $0x1b0] sm:$0xff]  ;;  %v4880_v55 = vpack.c.bf16 %v2606_v3, %v2604_v10 }
 0x24d   :  { %v4878_v57 = vpack.c.bf16 %v2601_v24, %v2599_v41 }
 0x24e   :  { %4855 = vmatpush3.bf16.msra.mxu0 %v4854_v51  ;;  %v2592_v51 = vld [vmem:[#allocation6 + $0x168] sm:$0xff] }
 0x24f   :  { %4857 = vmatprep.subr.bf16.mxu0 %v4856_v59  ;;  %4903 = vmatpush1.bf16.msra.mxu1 %v4902_v56  ;;  %v4914_v59 = vpack.c.bf16 %v2573_v18, %v2571_v63 }
 0x250   :  { %4905 = vmatprep.subr.bf16.mxu1 %v4904_v23  ;;  %v1670_v23 = vlaneseq }
 0x251   :  { %4388 = vmatmul.mubr.f32.vlgmr.msra.gmra.mrb[68].mxu0 %v3476_v4  ;;  %v2594_v4 = vld [vmem:[#allocation6 + $0x178] sm:$0xff] }
 0x252   :  { %4390 = vmatprep.mubr.msk.f32.mxu0 %vm5226_vm0, %v5227_v1  ;;  %4859 = vmatpush1.bf16.msra.mxu0 %v4858_v40  ;;  %v2578_v40 = vld [vmem:[#allocation6 + $0xf8] sm:$0xff] }
 0x253   :  { %4861 = vmatprep.subr.bf16.mxu0 %v4860_v49  ;;  %4907 = vmatpush1.bf16.msra.mxu1 %v4906_v12  ;;  %v4916_v45 = vpack.c.bf16 %v2578_v40, %v2576_v16  ;;  %v4918_v49 = vpack.c.bf16 %v2577_v7, %v2575_v58 }
 0x255   :  { %4391 = vmatmul.mubr.f32.gmra.mrb[70].mxu0 %v3477_v6  ;;  %v2568_v6 = vld [vmem:[#allocation6 + $0xa8] sm:$0xff] }
 0x256   :  { %4393 = vmatprep.mubr.msk.f32.mxu0 %vm5226_vm0, %v5227_v1  ;;  %4863 = vmatpush1.bf16.msra.mxu0 %v4862_v20  ;;  %v2839_v20 = vld [vmem:[#allocation6 + $0x218] sm:$0xff] }
 0x257   :  { %4865 = vmatprep.subr.bf16.mxu0 %v4864_v48  ;;  %v4920_v56 = vpack.c.bf16 %v2839_v20, %v2837_v26  ;;  %v4884_v48 = vpack.c.bf16 %v2610_v61, %v2608_v8 }
 0x259   :  { %4394 = vmatmul.mubr.f32.gmra.mrb[72].mxu0 %v3478_v0  ;;  %v4868_v0 = vpack.c.bf16 %v2594_v4, %v2592_v51 }
 0x25a   :  { %4396 = vmatprep.mubr.msk.f32.mxu0 %vm5226_vm0, %v5227_v1  ;;  %4867 = vmatpush1.bf16.msra.mxu0 %v4866_v44  ;;  %v6187_v44 = vshrl.u32 %v1670_v23, 7  ;;  %v6239_v23 = vld [vmem:[#allocation4] ss:$0 sm:$0xff] }
 0x25b   :  { %4869 = vmatprep.subr.bf16.mxu0 %v4868_v0 }
 0x25c   :  { %v1672_v42 = vsub.s32 0, %v6187_v44  ;;  %v1676_v12 = vsub.s32 1, %v6187_v44 }
 0x25d   :  { %4397 = vmatmul.mubr.f32.gmra.mrb[74].mxu0 %v3479_v14  ;;  %v2570_v14 = vld [vmem:[#allocation6 + $0xb8] sm:$0xff] }
 0x25e   :  { %4399 = vmatprep.mubr.msk.f32.mxu0 %vm5226_vm0, %v5227_v1  ;;  %v1673_v51 = vrot.slane %v1668_v2, %v1672_v42  ;;  %v6195_v4 = vrot.slane %v1668_v2, %v1676_v12 }
 0x261   :  { %4400 = vmatmul.mubr.f32.gmra.mrb[76].mxu0 %v3480_v17  ;;  %v2591_v17 = vld [vmem:[#allocation6 + $0x160] sm:$0xff] }
 0x262   :  { %4402 = vmatprep.mubr.msk.f32.mxu0 %vm5226_vm0, %v5227_v1 }
 0x265   :  { %4403 = vmatmul.mubr.f32.gmra.mrb[78].mxu0 %v3481_v62  ;;  %v2593_v62 = vld [vmem:[#allocation6 + $0x170] sm:$0xff] }
 0x266   :  { %4405 = vmatprep.mubr.msk.f32.mxu0 %vm5226_vm0, %v5227_v1  ;;  %v4870_v50 = vpack.c.bf16 %v2593_v62, %v2591_v17 }
 0x268   :  { %4871 = vmatpush1.bf16.msra.mxu0 %v4870_v50 }
 0x269   :  { %4406 = vmatmul.mubr.f32.gmra.mrb[80].mxu0 %v3482_v60  ;;  %v4908_v60 = vpack.c.bf16 %v2570_v14, %v2568_v6  ;;  %4873 = vmatprep.subr.bf16.mxu0 %v4872_v54 }
 0x26a   :  { %2698 = vmatprep.mubr.f32.mxu0 %v5227_v1 }
 0x26b   :  { %4909 = vmatprep.subr.bf16.mxu1 %v4908_v60 }
 0x26c   :  { %4911 = vmatpush1.bf16.msra.mxu1 %v4910_v33  ;;  %4875 = vmatpush1.bf16.msra.mxu0 %v4874_v9 }
 0x26d   :  { %4913 = vmatprep.subr.bf16.mxu1 %v4912_v22  ;;  %4877 = vmatprep.subr.bf16.mxu0 %v4876_v29 }
 0x270   :  { %4915 = vmatpush1.bf16.msra.mxu1 %v4914_v59  ;;  %4879 = vmatpush1.bf16.msra.mxu0 %v4878_v57 }
 0x271   :  { %4917 = vmatprep.subr.bf16.mxu1 %v4916_v45  ;;  %4881 = vmatprep.subr.bf16.mxu0 %v4880_v55 }
 0x274   :  { %4919 = vmatpush1.bf16.msra.mxu1 %v4918_v49  ;;  %4883 = vmatpush1.bf16.msra.mxu0 %v4882_v30 }
 0x275   :  { %4921 = vmatprep.subr.bf16.mxu1 %v4920_v56  ;;  %4885 = vmatprep.subr.bf16.mxu0 %v4884_v48 }
 0x278   :  { %4887 = vmatpush1.bf16.msra.mxu0 %v4886_v52 }
 0x304   :  { %v1621_v6 = vpop.f32.mrb[56].mxu0 }
 0x305   :  { %v1680_v0 = vadd.f32 %v1673_v51, %v1621_v6  ;;  %v1623_v14 = vpop.f32.mrb[57].mxu0  ;;  %v2838_v6 = vld [vmem:[#allocation6 + $0x210] sm:$0xff] }
 0x306   :  { %v1681_v17 = vadd.f32 %v6195_v4, %v1623_v14  ;;  %v2841_v14 = vld [vmem:[#allocation6 + $0x228] sm:$0xff] }
 0x307   :  { %vm1692_vm12 = vcmp.ge.f32.partialorder %v1680_v0, 0.0  ;;  %v1704_v62 = vmul.f32 0.01, %v1680_v0 }
 0x308   :  { %vm1693_vm13 = vcmp.ge.f32.partialorder %v1681_v17, 0.0  ;;  %v1705_v60 = vmul.f32 0.01, %v1681_v17  ;;  %v1627_v50 = vpop.f32.mrb[58].mxu0 }
 0x309   :  { %v1716_v19 = vsel %vm1692_vm12, %v1680_v0, %v1704_v62  ;;  %v1682_v5 = vadd.f32 %v1673_v51, %v1627_v50  ;;  %v1629_v33 = vpop.f32.mrb[59].mxu0 }
 0x30a   :  { %1728 = vst [vmem:[%s6445_s5] sm:$0xff] %v1716_v19  ;;  %v1717_v31 = vsel %vm1693_vm13, %v1681_v17, %v1705_v60  ;;  %v1683_v27 = vadd.f32 %v6195_v4, %v1629_v33  ;;  %v2843_v17 = vld [vmem:[#allocation6 + $0x238] sm:$0xff] }
 0x30b   :  { %1729 = vst [vmem:[%s6445_s5 + $0x8] sm:$0xff] %v1717_v31  ;;  %vm1694_vm14 = vcmp.ge.f32.partialorder %v1682_v5, 0.0  ;;  %v1706_v35 = vmul.f32 0.01, %v1682_v5  ;;  %v4924_v33 = vpack.c.bf16 %v2843_v17, %v2841_v14  ;;  %v2840_v31 = vld [vmem:[#allocation6 + $0x220] sm:$0xff] }
 0x30c   :  { %vm1695_vm15 = vcmp.ge.f32.partialorder %v1683_v27, 0.0  ;;  %v1707_v54 = vmul.f32 0.01, %v1683_v27  ;;  %v1633_v28 = vpop.f32.mrb[60].mxu0 }
 0x30d   :  { %v1718_v22 = vsel %vm1694_vm14, %v1682_v5, %v1706_v35  ;;  %v1684_v38 = vadd.f32 %v1673_v51, %v1633_v28  ;;  %v1635_v46 = vpop.f32.mrb[61].mxu0  ;;  %v2845_v35 = vld [vmem:[#allocation6 + $0x248] sm:$0xff]  ;;  %v2847_v28 = vld [vmem:[#allocation6 + $0x258] sm:$0xff] }
 0x30e   :  { %1730 = vst [vmem:[%s6445_s5 + $0x10] sm:$0xff] %v1718_v22  ;;  %v1719_v63 = vsel %vm1695_vm15, %v1683_v27, %v1707_v54  ;;  %v1685_v9 = vadd.f32 %v6195_v4, %v1635_v46  ;;  %v2842_v27 = vld [vmem:[#allocation6 + $0x230] sm:$0xff]  ;;  %v2844_v22 = vld [vmem:[#allocation6 + $0x240] sm:$0xff] }
 0x30f   :  { %1731 = vst [vmem:[%s6445_s5 + $0x18] sm:$0xff] %v1719_v63  ;;  %vm1696_vm0 = vcmp.ge.f32.partialorder %v1684_v38, 0.0  ;;  %v1708_v18 = vmul.f32 0.01, %v1684_v38 }
 0x310   :  { %vm1697_vm1 = vcmp.ge.f32.partialorder %v1685_v9, 0.0  ;;  %v1709_v59 = vmul.f32 0.01, %v1685_v9  ;;  %v1639_v25 = vpop.f32.mrb[62].mxu0 }
 0x311   :  { %v1720_v36 = vsel %vm1696_vm0, %v1684_v38, %v1708_v18  ;;  %v1686_v16 = vadd.f32 %v1673_v51, %v1639_v25  ;;  %v1641_v29 = vpop.f32.mrb[63].mxu0  ;;  %v2846_v38 = vld [vmem:[#allocation6 + $0x250] sm:$0xff]  ;;  %v4926_v18 = vpack.c.bf16 %v2842_v27, %v2840_v31  ;;  %v4928_v25 = vpack.c.bf16 %v2847_v28, %v2845_v35  ;;  %v2859_v31 = vld [vmem:[#allocation6 + $0x2b8] sm:$0xff] }
 0x312   :  { %1732 = vst [vmem:[%s6445_s5 + $0x20] sm:$0xff] %v1720_v36  ;;  %v1721_v40 = vsel %vm1697_vm1, %v1685_v9, %v1709_v59  ;;  %v1687_v41 = vadd.f32 %v6195_v4, %v1641_v29  ;;  %v4930_v36 = vpack.c.bf16 %v2846_v38, %v2844_v22  ;;  %v2851_v29 = vld [vmem:[#allocation6 + $0x278] sm:$0xff]  ;;  %v2856_v22 = vld [vmem:[#allocation6 + $0x2a0] sm:$0xff] }
 0x313   :  { %1733 = vst [vmem:[%s6445_s5 + $0x28] sm:$0xff] %v1721_v40  ;;  %vm1698_vm5 = vcmp.ge.f32.partialorder %v1686_v16, 0.0  ;;  %v1710_v45 = vmul.f32 0.01, %v1686_v16 }
 0x314   :  { %vm1699_vm7 = vcmp.ge.f32.partialorder %v1687_v41, 0.0  ;;  %v1711_v24 = vmul.f32 0.01, %v1687_v41  ;;  %v1645_v58 = vpop.f32.mrb[64].mxu0 }
 0x315   :  { %v1722_v7 = vsel %vm1698_vm5, %v1686_v16, %v1710_v45  ;;  %v1688_v57 = vadd.f32 %v1673_v51, %v1645_v58  ;;  %v1647_v49 = vpop.f32.mrb[65].mxu0  ;;  %v2849_v16 = vld [vmem:[#allocation6 + $0x268] sm:$0xff] }
 0x316   :  { %1734 = vst [vmem:[%s6445_s5 + $0x30] sm:$0xff] %v1722_v7  ;;  %v1723_v10 = vsel %vm1699_vm7, %v1687_v41, %v1711_v24  ;;  %v1689_v3 = vadd.f32 %v6195_v4, %v1647_v49  ;;  %v6248_v24 = vld [vmem:[#allocation6 + $0x260] sm:$0xff]  ;;  %v2850_v49 = vld [vmem:[#allocation6 + $0x270] sm:$0xff] }
 0x317   :  { %1735 = vst [vmem:[%s6445_s5 + $0x38] sm:$0xff] %v1723_v10  ;;  %vm1700_vm8 = vcmp.ge.f32.partialorder %v1688_v57, 0.0  ;;  %v1712_v26 = vmul.f32 0.01, %v1688_v57 }
 0x318   :  { %vm1701_vm9 = vcmp.ge.f32.partialorder %v1689_v3, 0.0  ;;  %v1713_v55 = vmul.f32 0.01, %v1689_v3  ;;  %v1651_v20 = vpop.f32.mrb[66].mxu0 }
 0x319   :  { %v1724_v53 = vsel %vm1700_vm8, %v1688_v57, %v1712_v26  ;;  %v1690_v15 = vadd.f32 %v1673_v51, %v1651_v20  ;;  %v1653_v56 = vpop.f32.mrb[67].mxu0 }
 0x31a   :  { %1736 = vst [vmem:[%s6445_s5 + $0x40] sm:$0xff] %v1724_v53  ;;  %v1725_v30 = vsel %vm1701_vm9, %v1689_v3, %v1713_v55  ;;  %v1691_v8 = vadd.f32 %v6195_v4, %v1653_v56  ;;  %v2836_v4 = vld [vmem:[#allocation6 + $0x200] sm:$0xff] }
 0x31b   :  { %1737 = vst [vmem:[%s6445_s5 + $0x48] sm:$0xff] %v1725_v30  ;;  %vm1702_vm10 = vcmp.ge.f32.partialorder %v1690_v15, 0.0  ;;  %v1714_v61 = vmul.f32 0.01, %v1690_v15  ;;  %v4922_v5 = vpack.c.bf16 %v2838_v6, %v2836_v4  ;;  %v2853_v30 = vld [vmem:[#allocation6 + $0x288] sm:$0xff]  ;;  %v2854_v6 = vld [vmem:[#allocation6 + $0x290] sm:$0xff] }
 0x31c   :  { %vm1703_vm11 = vcmp.ge.f32.partialorder %v1691_v8, 0.0  ;;  %v1715_v48 = vmul.f32 0.01, %v1691_v8 }
 0x31d   :  { %v1726_v34 = vsel %vm1702_vm10, %v1690_v15, %v1714_v61  ;;  %v4932_v15 = vpack.c.bf16 %v2851_v29, %v2849_v16 }
 0x31e   :  { %1738 = vst [vmem:[%s6445_s5 + $0x50] sm:$0x1f] %v1726_v34  ;;  %v1727_v37 = vsel %vm1703_vm11, %v1691_v8, %v1715_v48  ;;  %v2855_v8 = vld [vmem:[#allocation6 + $0x298] sm:$0xff] }
 0x31f   :  { %1739 = vst [vmem:[%s6445_s5 + $0x58] sm:$0x1f] %v1727_v37 }
 0x324   :  { %v2471_v52 = vpop.f32.mrb[68].mxu0 }
 0x325   :  { %v2505_v2 = vadd.f32 %v2471_v52, %v6112_v47  ;;  %v4389_v51 = vpop.f32.mrb[69].mxu0  ;;  %v4934_v52 = vpack.c.bf16 %v2850_v49, %v6248_v24 }
 0x327   :  { %v2519_v0 = vadd.f32 %v6239_v23, %v2505_v2  ;;  %v6265_v2 = vld [vmem:[#allocation6 + $0x280] sm:$0xff] }
 0x328   :  { %v2476_v62 = vpop.f32.mrb[70].mxu0  ;;  %v4938_v28 = vpack.c.bf16 %v2854_v6, %v6265_v2 }
 0x329   :  { %vm2526_vm12 = vcmp.ge.f32.partialorder %v2519_v0, 0.0  ;;  %v2533_v60 = vmul.f32 0.01, %v2519_v0  ;;  %v2506_v50 = vadd.f32 %v2476_v62, %v6118_v32  ;;  %v4392_v19 = vpop.f32.mrb[71].mxu0 }
 0x32a   :  { %v4936_v19 = vpack.c.bf16 %v2855_v8, %v2853_v30  ;;  %v2862_v8 = vld [vmem:[#allocation6 + $0x2d0] sm:$0xff] }
 0x32b   :  { %v2520_v47 = vadd.f32 %v6239_v23, %v2506_v50  ;;  %v2540_v54 = vsel %vm2526_vm12, %v2519_v0, %v2533_v60 }
 0x32c   :  { %v2481_v46 = vpop.f32.mrb[72].mxu0  ;;  %2800 = vmatmul.mubr.f32.vlgmr.msra.gmra.mrb[98].mxu1 %v2540_v54  ;;  %v2617_v59 = vrot.slane %v2540_v54, 1  ;;  %v2868_v40 = vrot.slane %v2540_v54, 2  ;;  %v3030_v58 = vrot.slane %v2540_v54, 3  ;;  %v3193_v7 = vrot.slane %v2540_v54, 4 }
 0x32d   :  { %vm2527_vm13 = vcmp.ge.f32.partialorder %v2520_v47, 0.0  ;;  %v2534_v63 = vmul.f32 0.01, %v2520_v47  ;;  %v2507_v9 = vadd.f32 %v2481_v46, %v6124_v43  ;;  %4923 = vmatpush1.bf16.msra.mxu1 %v4922_v5  ;;  %v4395_v32 = vpop.f32.mrb[73].mxu0  ;;  %2805 = vmatprep.mubr.f32.mxu1 %v5227_v1 }
 0x32e   :  { %4925 = vmatprep.subr.bf16.mxu1 %v4924_v33  ;;  %v2857_v33 = vld [vmem:[#allocation6 + $0x2a8] sm:$0xff] }
 0x32f   :  { %v2521_v41 = vadd.f32 %v6239_v23, %v2507_v9  ;;  %v2541_v45 = vsel %vm2527_vm13, %v2520_v47, %v2534_v63  ;;  %v2858_v63 = vld [vmem:[#allocation6 + $0x2b0] sm:$0xff]  ;;  %v4940_v16 = vpack.c.bf16 %v2859_v31, %v2857_v33 }
 0x330   :  { %v2486_v43 = vpop.f32.mrb[74].mxu0  ;;  %2806 = vmatmul.mubr.f32.gmra.mrb[100].mxu1 %v2541_v45  ;;  %v2618_v57 = vrot.slane %v2541_v45, 1  ;;  %v2869_v10 = vrot.slane %v2541_v45, 2  ;;  %v3031_v3 = vrot.slane %v2541_v45, 3  ;;  %v3194_v26 = vrot.slane %v2541_v45, 4 }
 0x331   :  { %vm2528_vm14 = vcmp.ge.f32.partialorder %v2521_v41, 0.0  ;;  %v2535_v55 = vmul.f32 0.01, %v2521_v41  ;;  %v2508_v20 = vadd.f32 %v2486_v43, %v6130_v21  ;;  %4927 = vmatpush1.bf16.msra.mxu1 %v4926_v18  ;;  %v4398_v53 = vpop.f32.mrb[75].mxu0  ;;  %2811 = vmatprep.mubr.f32.mxu1 %v5227_v1  ;;  %v4942_v43 = vpack.c.bf16 %v2858_v63, %v2856_v22 }
 0x332   :  { %v2619_v56 = vsel %vm953_vm2, %v2617_v59, %v2618_v57  ;;  %4929 = vmatprep.subr.bf16.mxu1 %v4928_v25  ;;  %v6254_v61 = vsel %vm1206_vm3, %v2868_v40, %v2869_v10  ;;  %v6257_v48 = vsel %vm1370_vm4, %v3030_v58, %v3031_v3  ;;  %v6260_v34 = vsel %vm1535_vm6, %v3193_v7, %v3194_v26  ;;  %v2861_v40 = vld [vmem:[#allocation6 + $0x2c8] sm:$0xff] }
 0x333   :  { %v2522_v21 = vadd.f32 %v6239_v23, %v2508_v20  ;;  %2699 = vmatmul.mubr.f32.vlgmr.msra.gmra.mrb[82].mxu0 %v2619_v56  ;;  %v2542_v37 = vsel %vm2528_vm14, %v2521_v41, %v2535_v55  ;;  %v2863_v41 = vld [vmem:[#allocation6 + $0x2d8] sm:$0xff] }
 0x334   :  { %v2491_v51 = vpop.f32.mrb[76].mxu0  ;;  %2812 = vmatmul.mubr.f32.gmra.mrb[102].mxu1 %v2542_v37  ;;  %2704 = vmatprep.mubr.f32.mxu0 %v5227_v1  ;;  %v2620_v4 = vrot.slane %v2542_v37, 1  ;;  %v2871_v0 = vrot.slane %v2542_v37, 2  ;;  %v3033_v14 = vrot.slane %v2542_v37, 3  ;;  %v3196_v17 = vrot.slane %v2542_v37, 4  ;;  %v2867_v37 = vld [vmem:[#allocation6 + $0x2f8] sm:$0xff] }
 0x335   :  { %vm2529_vm15 = vcmp.ge.f32.partialorder %v2522_v21, 0.0  ;;  %v2536_v62 = vmul.f32 0.01, %v2522_v21  ;;  %v2509_v60 = vadd.f32 %v2491_v51, %v6136_v13  ;;  %4931 = vmatpush1.bf16.msra.mxu1 %v4930_v36  ;;  %v4401_v50 = vpop.f32.mrb[77].mxu0  ;;  %2817 = vmatprep.mubr.f32.mxu1 %v5227_v1  ;;  %v4944_v53 = vpack.c.bf16 %v2863_v41, %v2861_v40  ;;  %v3004_v40 = vld [vmem:[#allocation6 + $0x330] sm:$0xff]  ;;  %v3007_v41 = vld [vmem:[#allocation6 + $0x348] sm:$0xff] }
 0x336   :  { %v2621_v5 = vsel %vm953_vm2, %v2618_v57, %v2620_v4  ;;  %4933 = vmatprep.subr.bf16.mxu1 %v4932_v15  ;;  %v6272_v27 = vsel %vm1206_vm3, %v2869_v10, %v2871_v0  ;;  %v6275_v35 = vsel %vm1370_vm4, %v3031_v3, %v3033_v14  ;;  %v6278_v47 = vsel %vm1535_vm6, %v3194_v26, %v3196_v17  ;;  %v2860_v15 = vld [vmem:[#allocation6 + $0x2c0] sm:$0xff] }
 0x337   :  { %v2523_v13 = vadd.f32 %v6239_v23, %v2509_v60  ;;  %2705 = vmatmul.mubr.f32.gmra.mrb[84].mxu0 %v2621_v5  ;;  %v2543_v54 = vsel %vm2529_vm15, %v2522_v21, %v2536_v62  ;;  %v2865_v21 = vld [vmem:[#allocation6 + $0x2e8] sm:$0xff]  ;;  %v2866_v5 = vld [vmem:[#allocation6 + $0x2f0] sm:$0xff] }
 0x338   :  { %v2496_v38 = vpop.f32.mrb[78].mxu0  ;;  %2818 = vmatmul.mubr.f32.gmra.mrb[104].mxu1 %v2543_v54  ;;  %2710 = vmatprep.mubr.f32.mxu0 %v5227_v1  ;;  %v2622_v46 = vrot.slane %v2543_v54, 1  ;;  %v2873_v9 = vrot.slane %v2543_v54, 2  ;;  %v3035_v32 = vrot.slane %v2543_v54, 3  ;;  %v3198_v18 = vrot.slane %v2543_v54, 4  ;;  %v2999_v54 = vld [vmem:[#allocation6 + $0x308] sm:$0xff] }
 0x339   :  { %vm2530_vm0 = vcmp.ge.f32.partialorder %v2523_v13, 0.0  ;;  %v2537_v59 = vmul.f32 0.01, %v2523_v13  ;;  %v2510_v25 = vadd.f32 %v2496_v38, %v6142_v11  ;;  %4935 = vmatpush1.bf16.msra.mxu1 %v4934_v52  ;;  %v4404_v36 = vpop.f32.mrb[79].mxu0  ;;  %2823 = vmatprep.mubr.f32.mxu1 %v5227_v1  ;;  %v4948_v60 = vpack.c.bf16 %v2867_v37, %v2865_v21  ;;  %v3019_v21 = vld [vmem:[#allocation6 + $0x3a8] sm:$0xff]  ;;  %v3021_v37 = vld [vmem:[#allocation6 + $0x3b8] sm:$0xff] }
 0x33a   :  { %v2623_v29 = vsel %vm953_vm2, %v2620_v4, %v2622_v46  ;;  %4937 = vmatprep.subr.bf16.mxu1 %v4936_v19  ;;  %v6288_v45 = vsel %vm1206_vm3, %v2871_v0, %v2873_v9  ;;  %v6291_v24 = vsel %vm1370_vm4, %v3033_v14, %v3035_v32  ;;  %v6294_v58 = vsel %vm1535_vm6, %v3196_v17, %v3198_v18  ;;  %v2864_v19 = vld [vmem:[#allocation6 + $0x2e0] sm:$0xff] }
 0x33b   :  { %v2524_v11 = vadd.f32 %v6239_v23, %v2510_v25  ;;  %2711 = vmatmul.mubr.f32.gmra.mrb[86].mxu0 %v2623_v29  ;;  %v2544_v7 = vsel %vm2530_vm0, %v2523_v13, %v2537_v59  ;;  %v3003_v59 = vld [vmem:[#allocation6 + $0x328] sm:$0xff]  ;;  %v3005_v25 = vld [vmem:[#allocation6 + $0x338] sm:$0xff]  ;;  %v3002_v29 = vld [vmem:[#allocation6 + $0x320] sm:$0xff] }
 0x33c   :  { %v2501_v57 = vpop.f32.mrb[80].mxu0  ;;  %2824 = vmatmul.mubr.f32.gmra.mrb[106].mxu1 %v2544_v7  ;;  %2716 = vmatprep.mubr.f32.mxu0 %v5227_v1  ;;  %v2624_v49 = vrot.slane %v2544_v7, 1  ;;  %v2875_v10 = vrot.slane %v2544_v7, 2  ;;  %v3037_v3 = vrot.slane %v2544_v7, 3  ;;  %v3200_v26 = vrot.slane %v2544_v7, 4 }
 0x33d   :  { %vm2531_vm1 = vcmp.ge.f32.partialorder %v2524_v11, 0.0  ;;  %v2538_v55 = vmul.f32 0.01, %v2524_v11  ;;  %v2511_v20 = vadd.f32 %v2501_v57, %v6149_v39  ;;  %4939 = vmatpush1.bf16.msra.mxu1 %v4938_v28  ;;  %2829 = vmatprep.mubr.f32.mxu1 %v5227_v1  ;;  %v4407_v56 = vpop.f32.mrb[81].mxu0  ;;  %v3001_v28 = vld [vmem:[#allocation6 + $0x318] sm:$0xff]  ;;  %v4958_v7 = vpack.c.bf16 %v3004_v40, %v3002_v29  ;;  %v3006_v57 = vld [vmem:[#allocation6 + $0x340] sm:$0xff] }
 0x33e   :  { %v2625_v30 = vsel %vm953_vm2, %v2622_v46, %v2624_v49  ;;  %4941 = vmatprep.subr.bf16.mxu1 %v4940_v16  ;;  %v6303_v52 = vsel %vm1206_vm3, %v2873_v9, %v2875_v10  ;;  %v6306_v2 = vsel %vm1370_vm4, %v3035_v32, %v3037_v3  ;;  %v6309_v39 = vsel %vm1535_vm6, %v3198_v18, %v3200_v26  ;;  %v2998_v9 = vld [vmem:[#allocation6 + $0x300] sm:$0xff]  ;;  %v3000_v32 = vld [vmem:[#allocation6 + $0x310] sm:$0xff] }
 0x33f   :  { %v2525_v51 = vadd.f32 %v6239_v23, %v2511_v20  ;;  %2717 = vmatmul.mubr.f32.gmra.mrb[88].mxu0 %v2625_v30  ;;  %v6313_v4 = vsel %vm2531_vm1, %v2524_v11, %v2538_v55  ;;  %v4946_v23 = vpack.c.bf16 %v2862_v8, %v2860_v15  ;;  %v4950_v46 = vpack.c.bf16 %v2866_v5, %v2864_v19  ;;  %v3009_v11 = vld [vmem:[#allocation6 + $0x358] sm:$0xff]  ;;  %v3010_v20 = vld [vmem:[#allocation6 + $0x360] sm:$0xff]  ;;  %v3027_v5 = vld [vmem:[#allocation6 + $0x3e8] sm:$0xff] }
 0x340   :  { %2830 = vmatmul.mubr.f32.gmra.mrb[108].mxu1 %v6313_v4  ;;  %2722 = vmatprep.mubr.f32.mxu0 %v5227_v1  ;;  %v2626_v6 = vrot.slane %v6313_v4, 1  ;;  %v2877_v0 = vrot.slane %v6313_v4, 2  ;;  %v3039_v14 = vrot.slane %v6313_v4, 3  ;;  %v3202_v17 = vrot.slane %v6313_v4, 4  ;;  %v3017_v15 = vld [vmem:[#allocation6 + $0x398] sm:$0xff]  ;;  %v3014_v8 = vld [vmem:[#allocation6 + $0x380] sm:$0xff] }
 0x341   :  { %vm2532_vm5 = vcmp.ge.f32.partialorder %v2525_v51, 0.0  ;;  %v2539_v62 = vmul.f32 0.01, %v2525_v51  ;;  %4943 = vmatpush1.bf16.msra.mxu1 %v4942_v43  ;;  %2949 = vmatprep.mubr.f32.mxu1 %v5227_v1  ;;  %v4952_v63 = vpack.c.bf16 %v3001_v28, %v2999_v54  ;;  %v4954_v36 = vpack.c.bf16 %v3000_v32, %v2998_v9  ;;  %v3022_v19 = vld [vmem:[#allocation6 + $0x3c0] sm:$0xff]  ;;  %v3029_v54 = vld [vmem:[#allocation6 + $0x3f8] sm:$0xff] }
 0x342   :  { %v2627_v50 = vsel %vm953_vm2, %v2624_v49, %v2626_v6  ;;  %4945 = vmatprep.subr.bf16.mxu1 %v4944_v53  ;;  %v6326_v33 = vsel %vm1206_vm3, %v2875_v10, %v2877_v0  ;;  %v6331_v31 = vsel %vm1370_vm4, %v3037_v3, %v3039_v14  ;;  %v6334_v13 = vsel %vm1535_vm6, %v3200_v26, %v3202_v17  ;;  %v3008_v49 = vld [vmem:[#allocation6 + $0x350] sm:$0xff]  ;;  %v3011_v10 = vld [vmem:[#allocation6 + $0x368] sm:$0xff]  ;;  %v3013_v3 = vld [vmem:[#allocation6 + $0x378] sm:$0xff] }
 0x343   :  { %2723 = vmatmul.mubr.f32.gmra.mrb[90].mxu0 %v2627_v50  ;;  %v2546_v22 = vsel %vm2532_vm5, %v2525_v51, %v2539_v62  ;;  %v4956_v16 = vpack.c.bf16 %v3005_v25, %v3003_v59  ;;  %v4960_v43 = vpack.c.bf16 %v3009_v11, %v3007_v41  ;;  %v4962_v26 = vpack.c.bf16 %v3008_v49, %v3006_v57  ;;  %v3015_v53 = vld [vmem:[#allocation6 + $0x388] sm:$0xff]  ;;  %v3160_v59 = vld [vmem:[#allocation6 + $0x400] sm:$0xff]  ;;  %v3162_v25 = vld [vmem:[#allocation6 + $0x410] sm:$0xff] }
 0x344   :  { %2728 = vmatprep.mubr.f32.mxu0 %v5227_v1  ;;  %v3204_v38 = vrot.slane %v2546_v22, 4  ;;  %v4964_v55 = vpack.c.bf16 %v3013_v3, %v3011_v10  ;;  %v4968_v30 = vpack.c.bf16 %v3017_v15, %v3015_v53  ;;  %v3023_v62 = vld [vmem:[#allocation6 + $0x3c8] sm:$0xff]  ;;  %v4980_v22 = vpack.c.bf16 %v3029_v54, %v3027_v5  ;;  %v3164_v40 = vld [vmem:[#allocation6 + $0x420] sm:$0xff]  ;;  %v3166_v41 = vld [vmem:[#allocation6 + $0x430] sm:$0xff] }
 0x345   :  { %4947 = vmatpush1.bf16.msra.mxu1 %v4946_v23  ;;  %v3025_v23 = vld [vmem:[#allocation6 + $0x3d8] sm:$0xff]  ;;  %v3169_v11 = vld [vmem:[#allocation6 + $0x448] sm:$0xff]  ;;  %v3168_v49 = vld [vmem:[#allocation6 + $0x440] sm:$0xff] }
 0x346   :  { %4949 = vmatprep.subr.bf16.mxu1 %v4948_v60  ;;  %v6339_v18 = vsel %vm1535_vm6, %v3202_v17, %v3204_v38  ;;  %v3018_v17 = vld [vmem:[#allocation6 + $0x3a0] sm:$0xff]  ;;  %v4976_v50 = vpack.c.bf16 %v3025_v23, %v3023_v62  ;;  %v3028_v38 = vld [vmem:[#allocation6 + $0x3f0] sm:$0xff]  ;;  %v3173_v3 = vld [vmem:[#allocation6 + $0x468] sm:$0xff] }
 0x347   :  { %2729 = vmatmul.mubr.f32.gmra.mrb[92].mxu0 %v2626_v6  ;;  %v4972_v6 = vpack.c.bf16 %v3021_v37, %v3019_v21  ;;  %v3170_v10 = vld [vmem:[#allocation6 + $0x450] sm:$0xff]  ;;  %v3177_v53 = vld [vmem:[#allocation6 + $0x488] sm:$0xff]  ;;  %v3179_v15 = vld [vmem:[#allocation6 + $0x498] sm:$0xff] }
 0x348   :  { %v3183_v21 = vld [vmem:[#allocation6 + $0x4b8] sm:$0xff]  ;;  %v3190_v54 = vld [vmem:[#allocation6 + $0x4f0] sm:$0xff] }
 0x349   :  { %4951 = vmatpush1.bf16.msra.mxu1 %v4950_v46  ;;  %v3161_v46 = vld [vmem:[#allocation6 + $0x408] sm:$0xff] }
 0x34a   :  { %4953 = vmatprep.subr.bf16.mxu1 %v4952_v63  ;;  %v3163_v63 = vld [vmem:[#allocation6 + $0x418] sm:$0xff] }
 0x34b   :  { %v4984_v32 = vpack.c.bf16 %v3163_v63, %v3161_v46 }
 0x34c   :  { %2950 = vmatmul.mubr.f32.vlgmr.msra.gmra.mrb[98].mxu1 %v6254_v61  ;;  %v3012_v61 = vld [vmem:[#allocation6 + $0x370] sm:$0xff] }
 0x34d   :  { %4955 = vmatpush1.bf16.msra.mxu1 %v4954_v36  ;;  %2955 = vmatprep.mubr.f32.mxu1 %v5227_v1  ;;  %v4966_v56 = vpack.c.bf16 %v3012_v61, %v3010_v20  ;;  %v3165_v36 = vld [vmem:[#allocation6 + $0x428] sm:$0xff]  ;;  %v3172_v61 = vld [vmem:[#allocation6 + $0x460] sm:$0xff] }
 0x34e   :  { %4957 = vmatprep.subr.bf16.mxu1 %v4956_v16  ;;  %v3167_v16 = vld [vmem:[#allocation6 + $0x438] sm:$0xff] }
 0x34f   :  { %v4988_v29 = vpack.c.bf16 %v3167_v16, %v3165_v36 }
 0x350   :  { %2956 = vmatmul.mubr.f32.gmra.mrb[100].mxu1 %v6272_v27  ;;  %v3016_v27 = vld [vmem:[#allocation6 + $0x390] sm:$0xff] }
 0x351   :  { %4959 = vmatpush1.bf16.msra.mxu1 %v4958_v7  ;;  %2961 = vmatprep.mubr.f32.mxu1 %v5227_v1  ;;  %v4970_v51 = vpack.c.bf16 %v3016_v27, %v3014_v8  ;;  %v3171_v7 = vld [vmem:[#allocation6 + $0x458] sm:$0xff]  ;;  %v3176_v8 = vld [vmem:[#allocation6 + $0x480] sm:$0xff]  ;;  %v3181_v27 = vld [vmem:[#allocation6 + $0x4a8] sm:$0xff] }
 0x352   :  { %4961 = vmatprep.subr.bf16.mxu1 %v4960_v43  ;;  %v4990_v43 = vpack.c.bf16 %v3166_v41, %v3164_v40  ;;  %v4992_v57 = vpack.c.bf16 %v3171_v7, %v3169_v11 }
 0x354   :  { %2962 = vmatmul.mubr.f32.gmra.mrb[102].mxu1 %v6288_v45  ;;  %v3020_v45 = vld [vmem:[#allocation6 + $0x3b0] sm:$0xff] }
 0x355   :  { %4963 = vmatpush1.bf16.msra.mxu1 %v4962_v26  ;;  %2967 = vmatprep.mubr.f32.mxu1 %v5227_v1  ;;  %v4974_v60 = vpack.c.bf16 %v3020_v45, %v3018_v17  ;;  %v3175_v26 = vld [vmem:[#allocation6 + $0x478] sm:$0xff]  ;;  %v3185_v17 = vld [vmem:[#allocation6 + $0x4c8] sm:$0xff] }
 0x356   :  { %4965 = vmatprep.subr.bf16.mxu1 %v4964_v55  ;;  %v4994_v55 = vpack.c.bf16 %v3170_v10, %v3168_v49  ;;  %v4996_v20 = vpack.c.bf16 %v3175_v26, %v3173_v3  ;;  %v3187_v45 = vld [vmem:[#allocation6 + $0x4d8] sm:$0xff] }
 0x357   :  { %v5008_v23 = vpack.c.bf16 %v3187_v45, %v3185_v17 }
 0x358   :  { %2968 = vmatmul.mubr.f32.gmra.mrb[104].mxu1 %v6303_v52  ;;  %v3024_v52 = vld [vmem:[#allocation6 + $0x3d0] sm:$0xff] }
 0x359   :  { %4967 = vmatpush1.bf16.msra.mxu1 %v4966_v56  ;;  %2973 = vmatprep.mubr.f32.mxu1 %v5227_v1  ;;  %v4978_v28 = vpack.c.bf16 %v3024_v52, %v3022_v19  ;;  %v3191_v19 = vld [vmem:[#allocation6 + $0x4f8] sm:$0xff] }
 0x35a   :  { %4969 = vmatprep.subr.bf16.mxu1 %v4968_v30  ;;  %v5000_v30 = vpack.c.bf16 %v3179_v15, %v3177_v53 }
 0x35c   :  { %2974 = vmatmul.mubr.f32.gmra.mrb[106].mxu1 %v6326_v33  ;;  %v3026_v33 = vld [vmem:[#allocation6 + $0x3e0] sm:$0xff] }
 0x35d   :  { %4971 = vmatpush1.bf16.msra.mxu1 %v4970_v51  ;;  %2979 = vmatprep.mubr.f32.mxu1 %v5227_v1  ;;  %v4982_v9 = vpack.c.bf16 %v3028_v38, %v3026_v33  ;;  %v5004_v51 = vpack.c.bf16 %v3183_v21, %v3181_v27 }
 0x35e   :  { %4973 = vmatprep.subr.bf16.mxu1 %v4972_v6  ;;  %v3180_v6 = vld [vmem:[#allocation6 + $0x4a0] sm:$0xff] }
 0x360   :  { %2980 = vmatmul.mubr.f32.gmra.mrb[108].mxu1 %v2877_v0  ;;  %v4986_v0 = vpack.c.bf16 %v3162_v25, %v3160_v59 }
 0x361   :  { %4975 = vmatpush1.bf16.msra.mxu1 %v4974_v60  ;;  %3111 = vmatprep.mubr.f32.mxu1 %v5227_v1  ;;  %v3184_v60 = vld [vmem:[#allocation6 + $0x4c0] sm:$0xff] }
 0x362   :  { %4977 = vmatprep.subr.bf16.mxu1 %v4976_v50  ;;  %v3189_v50 = vld [vmem:[#allocation6 + $0x4e8] sm:$0xff] }
 0x363   :  { %v5012_v5 = vpack.c.bf16 %v3191_v19, %v3189_v50 }
 0x365   :  { %4979 = vmatpush1.bf16.msra.mxu1 %v4978_v28 }
 0x366   :  { %4981 = vmatprep.subr.bf16.mxu1 %v4980_v22 }
 0x369   :  { %4983 = vmatpush1.bf16.msra.mxu1 %v4982_v9 }
 0x36a   :  { %4985 = vmatprep.subr.bf16.mxu1 %v4984_v32  ;;  %v3325_v32 = vld [vmem:[#allocation7] sm:$0x3] }
 0x36c   :  { %3112 = vmatmul.mubr.f32.vlgmr.msra.gmra.mrb[98].mxu1 %v6257_v48  ;;  %v3174_v48 = vld [vmem:[#allocation6 + $0x470] sm:$0xff] }
 0x36d   :  { %4987 = vmatpush1.bf16.msra.mxu1 %v4986_v0  ;;  %3117 = vmatprep.mubr.f32.mxu1 %v5227_v1  ;;  %v4998_v56 = vpack.c.bf16 %v3174_v48, %v3172_v61 }
 0x36e   :  { %4989 = vmatprep.subr.bf16.mxu1 %v4988_v29 }
 0x370   :  { %3118 = vmatmul.mubr.f32.gmra.mrb[100].mxu1 %v6275_v35  ;;  %v3178_v35 = vld [vmem:[#allocation6 + $0x490] sm:$0xff] }
 0x371   :  { %4991 = vmatpush1.bf16.msra.mxu1 %v4990_v43  ;;  %3123 = vmatprep.mubr.f32.mxu1 %v5227_v1  ;;  %v5002_v37 = vpack.c.bf16 %v3178_v35, %v3176_v8 }
 0x372   :  { %4993 = vmatprep.subr.bf16.mxu1 %v4992_v57 }
 0x374   :  { %3124 = vmatmul.mubr.f32.gmra.mrb[102].mxu1 %v6291_v24  ;;  %v3182_v24 = vld [vmem:[#allocation6 + $0x4b0] sm:$0xff] }
 0x375   :  { %4995 = vmatpush1.bf16.msra.mxu1 %v4994_v55  ;;  %3129 = vmatprep.mubr.f32.mxu1 %v5227_v1  ;;  %v5006_v62 = vpack.c.bf16 %v3182_v24, %v3180_v6 }
 0x376   :  { %4997 = vmatprep.subr.bf16.mxu1 %v4996_v20 }
 0x378   :  { %3130 = vmatmul.mubr.f32.gmra.mrb[104].mxu1 %v6306_v2  ;;  %v3186_v2 = vld [vmem:[#allocation6 + $0x4d0] sm:$0xff] }
 0x379   :  { %4999 = vmatpush1.bf16.msra.mxu1 %v4998_v56  ;;  %3135 = vmatprep.mubr.f32.mxu1 %v5227_v1  ;;  %v5010_v52 = vpack.c.bf16 %v3186_v2, %v3184_v60 }
 0x37a   :  { %5001 = vmatprep.subr.bf16.mxu1 %v5000_v30 }
 0x37c   :  { %3136 = vmatmul.mubr.f32.gmra.mrb[106].mxu1 %v6331_v31  ;;  %v3188_v31 = vld [vmem:[#allocation6 + $0x4e0] sm:$0xff] }
 0x37d   :  { %5003 = vmatpush1.bf16.msra.mxu1 %v5002_v37  ;;  %3141 = vmatprep.mubr.f32.mxu1 %v5227_v1  ;;  %v5014_v28 = vpack.c.bf16 %v3190_v54, %v3188_v31 }
 0x37e   :  { %5005 = vmatprep.subr.bf16.mxu1 %v5004_v51 }
 0x380   :  { %3142 = vmatmul.mubr.f32.gmra.mrb[108].mxu1 %v3039_v14 }
 0x381   :  { %5007 = vmatpush1.bf16.msra.mxu1 %v5006_v62  ;;  %3276 = vmatprep.mubr.f32.mxu1 %v5227_v1 }
 0x382   :  { %5009 = vmatprep.subr.bf16.mxu1 %v5008_v23 }
 0x385   :  { %5011 = vmatpush1.bf16.msra.mxu1 %v5010_v52 }
 0x386   :  { %5013 = vmatprep.subr.bf16.mxu1 %v5012_v5 }
 0x389   :  { %5015 = vmatpush1.bf16.msra.mxu1 %v5014_v28 }
 0x38c   :  { %3277 = vmatmul.mubr.f32.vlgmr.msra.gmra.mrb[98].mxu1 %v6260_v34 }
 0x38d   :  { %3282 = vmatprep.mubr.f32.mxu1 %v5227_v1 }
 0x390   :  { %3283 = vmatmul.mubr.f32.gmra.mrb[100].mxu1 %v6278_v47 }
 0x391   :  { %3288 = vmatprep.mubr.f32.mxu1 %v5227_v1 }
 0x394   :  { %3289 = vmatmul.mubr.f32.gmra.mrb[102].mxu1 %v6294_v58 }
 0x395   :  { %3294 = vmatprep.mubr.f32.mxu1 %v5227_v1 }
 0x398   :  { %3295 = vmatmul.mubr.f32.gmra.mrb[104].mxu1 %v6309_v39 }
 0x399   :  { %3300 = vmatprep.mubr.f32.mxu1 %v5227_v1 }
 0x39c   :  { %3301 = vmatmul.mubr.f32.gmra.mrb[106].mxu1 %v6334_v13 }
 0x39d   :  { %3306 = vmatprep.mubr.f32.mxu1 %v5227_v1  ;;  %v6384_v1 = vrot.slane %v3325_v32, %v1672_v42 }
 0x3a0   :  { %3307 = vmatmul.mubr.f32.gmra.mrb[108].mxu1 %v6339_v18  ;;  %v6388_v18 = vrot.slane %v3325_v32, %v1676_v12 }
 0x406   :  { %v2700_v34 = vpop.f32.mrb[82].mxu0 }
 0x407   :  { %v2702_v4 = vpop.f32.mrb[83].mxu0 }
 0x40a   :  { %v2706_v14 = vpop.f32.mrb[84].mxu0 }
 0x40b   :  { %v2708_v47 = vpop.f32.mrb[85].mxu0 }
 0x40e   :  { %v2712_v22 = vpop.f32.mrb[86].mxu0 }
 0x40f   :  { %v2714_v33 = vpop.f32.mrb[87].mxu0 }
 0x412   :  { %v2718_v38 = vpop.f32.mrb[88].mxu0 }
 0x413   :  { %v2720_v58 = vpop.f32.mrb[89].mxu0 }
 0x416   :  { %v2724_v46 = vpop.f32.mrb[90].mxu0 }
 0x417   :  { %v2726_v63 = vpop.f32.mrb[91].mxu0 }
 0x41a   :  { %v6378_v9 = vpop.f32.mrb[92].mxu0 }
 0x41b   :  { %v6380_v39 = vpop.f32.mrb[93].mxu0 }
 0x45f   :  { %v3278_v13 = vpop.f32.mrb[98].mxu1 }
 0x460   :  { %v5016_v59 = vadd.f32 %v3278_v13, %v2700_v34  ;;  %v3280_v25 = vpop.f32.mrb[99].mxu1 }
 0x461   :  { %v5017_v36 = vadd.f32 %v3280_v25, %v2702_v4 }
 0x462   :  { %v3337_v16 = vadd.f32 %v5016_v59, %v6384_v1 }
 0x463   :  { %v3338_v0 = vadd.f32 %v5017_v36, %v6388_v18  ;;  %v3284_v29 = vpop.f32.mrb[100].mxu1 }
 0x464   :  { %vm3349_vm2 = vcmp.ge.f32.partialorder %v3337_v16, 0.0  ;;  %v3361_v40 = vmul.f32 0.01, %v3337_v16  ;;  %v5018_v41 = vadd.f32 %v3284_v29, %v2706_v14  ;;  %v3286_v11 = vpop.f32.mrb[101].mxu1 }
 0x465   :  { %vm3350_vm3 = vcmp.ge.f32.partialorder %v3338_v0, 0.0  ;;  %v3362_v42 = vmul.f32 0.01, %v3338_v0  ;;  %v5019_v7 = vadd.f32 %v3286_v11, %v2708_v47 }
 0x466   :  { %v3373_v43 = vsel %vm3349_vm2, %v3337_v16, %v3361_v40  ;;  %v3339_v44 = vadd.f32 %v5018_v41, %v6384_v1 }
 0x467   :  { %3484 = vst [vmem:[%s6445_s5 + $0x60] sm:$0xff] %v3373_v43  ;;  %v3374_v12 = vsel %vm3350_vm3, %v3338_v0, %v3362_v42  ;;  %v3340_v57 = vadd.f32 %v5019_v7, %v6388_v18  ;;  %v3290_v49 = vpop.f32.mrb[102].mxu1 }
 0x468   :  { %3485 = vst [vmem:[%s6445_s5 + $0x68] sm:$0xff] %v3374_v12  ;;  %vm3351_vm4 = vcmp.ge.f32.partialorder %v3339_v44, 0.0  ;;  %v3363_v10 = vmul.f32 0.01, %v3339_v44  ;;  %v5020_v3 = vadd.f32 %v3290_v49, %v2712_v22  ;;  %v3292_v26 = vpop.f32.mrb[103].mxu1 }
 0x469   :  { %vm3352_vm6 = vcmp.ge.f32.partialorder %v3340_v57, 0.0  ;;  %v3364_v55 = vmul.f32 0.01, %v3340_v57  ;;  %v5021_v20 = vadd.f32 %v3292_v26, %v2714_v33 }
 0x46a   :  { %v3375_v61 = vsel %vm3351_vm4, %v3339_v44, %v3363_v10  ;;  %v3341_v48 = vadd.f32 %v5020_v3, %v6384_v1 }
 0x46b   :  { %3486 = vst [vmem:[%s6445_s5 + $0x70] sm:$0xff] %v3375_v61  ;;  %v3376_v53 = vsel %vm3352_vm6, %v3340_v57, %v3364_v55  ;;  %v3342_v15 = vadd.f32 %v5021_v20, %v6388_v18  ;;  %v3296_v56 = vpop.f32.mrb[104].mxu1 }
 0x46c   :  { %3487 = vst [vmem:[%s6445_s5 + $0x78] sm:$0xff] %v3376_v53  ;;  %vm3353_vm7 = vcmp.ge.f32.partialorder %v3341_v48, 0.0  ;;  %v3365_v30 = vmul.f32 0.01, %v3341_v48  ;;  %v5022_v8 = vadd.f32 %v3296_v56, %v2718_v38  ;;  %v3298_v35 = vpop.f32.mrb[105].mxu1 }
 0x46d   :  { %vm3354_vm8 = vcmp.ge.f32.partialorder %v3342_v15, 0.0  ;;  %v3366_v27 = vmul.f32 0.01, %v3342_v15  ;;  %v5023_v21 = vadd.f32 %v3298_v35, %v2720_v58 }
 0x46e   :  { %v3377_v37 = vsel %vm3353_vm7, %v3341_v48, %v3365_v30  ;;  %v3343_v51 = vadd.f32 %v5022_v8, %v6384_v1 }
 0x46f   :  { %3488 = vst [vmem:[%s6445_s5 + $0x80] sm:$0xff] %v3377_v37  ;;  %v3378_v6 = vsel %vm3354_vm8, %v3342_v15, %v3366_v27  ;;  %v3344_v24 = vadd.f32 %v5023_v21, %v6388_v18  ;;  %v3302_v17 = vpop.f32.mrb[106].mxu1 }
 0x470   :  { %3489 = vst [vmem:[%s6445_s5 + $0x88] sm:$0xff] %v3378_v6  ;;  %vm3355_vm9 = vcmp.ge.f32.partialorder %v3343_v51, 0.0  ;;  %v3367_v45 = vmul.f32 0.01, %v3343_v51  ;;  %v5024_v62 = vadd.f32 %v3302_v17, %v2724_v46  ;;  %v3304_v23 = vpop.f32.mrb[107].mxu1 }
 0x471   :  { %vm3356_vm10 = vcmp.ge.f32.partialorder %v3344_v24, 0.0  ;;  %v3368_v60 = vmul.f32 0.01, %v3344_v24  ;;  %v5025_v2 = vadd.f32 %v3304_v23, %v2726_v63 }
 0x472   :  { %v3379_v50 = vsel %vm3355_vm9, %v3343_v51, %v3367_v45  ;;  %v3345_v19 = vadd.f32 %v5024_v62, %v6384_v1 }
 0x473   :  { %3490 = vst [vmem:[%s6445_s5 + $0x90] sm:$0xff] %v3379_v50  ;;  %v3380_v52 = vsel %vm3356_vm10, %v3344_v24, %v3368_v60  ;;  %v3346_v5 = vadd.f32 %v5025_v2, %v6388_v18  ;;  %v3308_v31 = vpop.f32.mrb[108].mxu1 }
 0x474   :  { %3491 = vst [vmem:[%s6445_s5 + $0x98] sm:$0xff] %v3380_v52  ;;  %vm3357_vm11 = vcmp.ge.f32.partialorder %v3345_v19, 0.0  ;;  %v3369_v54 = vmul.f32 0.01, %v3345_v19  ;;  %v5026_v28 = vadd.f32 %v3308_v31, %v6378_v9  ;;  %v3310_v34 = vpop.f32.mrb[109].mxu1 }
 0x475   :  { %vm3358_vm12 = vcmp.ge.f32.partialorder %v3346_v5, 0.0  ;;  %v3370_v4 = vmul.f32 0.01, %v3346_v5  ;;  %v5027_v14 = vadd.f32 %v3310_v34, %v6380_v39 }
 0x476   :  { %v3381_v47 = vsel %vm3357_vm11, %v3345_v19, %v3369_v54  ;;  %v3347_v22 = vadd.f32 %v5026_v28, %v6384_v1 }
 0x477   :  { %3492 = vst [vmem:[%s6445_s5 + $0xa0] sm:$0xff] %v3381_v47  ;;  %v3382_v33 = vsel %vm3358_vm12, %v3346_v5, %v3370_v4  ;;  %v3348_v38 = vadd.f32 %v5027_v14, %v6388_v18 }
 0x478   :  { %3493 = vst [vmem:[%s6445_s5 + $0xa8] sm:$0xff] %v3382_v33  ;;  %vm3359_vm13 = vcmp.ge.f32.partialorder %v3347_v22, 0.0  ;;  %v3371_v58 = vmul.f32 0.01, %v3347_v22 }
 0x479   :  { %vm3360_vm14 = vcmp.ge.f32.partialorder %v3348_v38, 0.0  ;;  %v3372_v46 = vmul.f32 0.01, %v3348_v38 }
 0x47a   :  { %v3383_v63 = vsel %vm3359_vm13, %v3347_v22, %v3371_v58 }
 0x47b   :  { %3494 = vst [vmem:[%s6445_s5 + $0xb0] sm:$0x1f] %v3383_v63  ;;  %v3384_v9 = vsel %vm3360_vm14, %v3348_v38, %v3372_v46 }
 0x47c   :  { %3495 = vst [vmem:[%s6445_s5 + $0xb8] sm:$0x1f] %v3384_v9 }
 0x47d   :  { %3402 = vsyncpa [#allocation3], 1 }
 0x47e   :  { %3403 = vsyncpa [#allocation5], 1 }
 0x47f   :  { %3404 = vsyncpa [#allocation8], 1 }

</bundles_post_ra>
